<compile_context>
chip_gen: v7x
topology: tpu7x:2x2x1
jax: 0.10.0
libtpu: 0.0.40
codegen_flags: <defaults>
</compile_context>

<pallas_src>
import math
from functools import partial

import jax
import jax.numpy as jnp
import numpy as np
from jax.experimental import pallas as pl
from jax.experimental.pallas import tpu as pltpu

# ---- hyperparameters (SchNorbInteraction.__init__) --------------------------
N_SPATIAL_BASIS = 16   # n_spatial_basis  (size of f_ij expansion)
N_FACTORS = 32         # n_factors
N_COSINE_BASIS = 32    # n_cosine_basis   (atom feature size)
DIMS = 3               # dims
CUTOFF = 5.0           # cutoff (CosineCutoff)
LOG2 = math.log(2.0)


# ---- fused Pallas kernel: one batch element per grid step --------------------
def _schnorb_kernel(
    pdata_ref,   # [1, P, S+5]   columns = [f_ij | r | mask | cos]
    xi_ref,      # [1, A, C]
    gmat_ref,    # [1, P, A]     bf16 one-hot neighbor-gather matrix
    comb_ref,    # [1, P, A]     bf16 (broadcast-over-own-neighbors + gather) matrix
    agg_ref,     # [A, P]        bf16 sum-over-own-neighbors matrix
    w_in2f_ref, wf1_ref, wf2_ref, wfo_ref, wa1_ref, wa2_ref, wpe1_ref, wpe2_ref,
    bias_ref,    # [1, 6F + C + 6C]  packed biases (f32)
    vi_ref,      # out [1, A, C]
    v_ref,       # out [1, P, 3C]  already (c*DIMS + d) interleaved
    *, cutoff, s, f, c,
):
    p = pdata_ref.shape[1]                     # P (static)
    m = DIMS * c                               # 3C

    pdata = pdata_ref[0]                       # [P, S+5]
    fij = pdata[:, 0:s]                        # [P, S]
    r = pdata[:, s:s + 1]                      # [P, 1]
    mask = pdata[:, s + 1:s + 2]               # [P, 1]
    cos = pdata[:, s + 2:s + 2 + DIMS]         # [P, 3]
    xi = xi_ref[0]                             # [A, C]
    gmat = gmat_ref[0]                         # [P, A] bf16
    comb = comb_ref[0]                         # [P, A] bf16
    agg = agg_ref[...]                         # [A, P] bf16

    # packed-bias offsets (static)
    o_bf1, o_bf2, o_bfo = 0, f, 2 * f
    o_ba1, o_ba2 = 3 * f, 4 * f
    o_bpe1 = 4 * f + c
    o_bpe2 = 6 * f + c

    def ssp(x):  # shifted softplus: softplus(x) - log(2)
        return jnp.maximum(x, 0.0) + jnp.log(1.0 + jnp.exp(-jnp.abs(x))) - LOG2

    def dense(x, w_ref, b_off=None, b_n=None, act=False):
        # bf16 operands on the MXU, f32 accumulate; bias / activation in f32 on the VPU.
        y = jnp.dot(x.astype(jnp.bfloat16), w_ref[...],
                    preferred_element_type=jnp.float32)
        if b_off is not None:
            y = y + bias_ref[:, b_off:b_off + b_n]
        if act:
            y = ssp(y)
        return y

    # ---------------- FTLayer (CFConv w/o aggregation) -----------------------
    cut = jnp.where(r < cutoff,
                    0.5 * (jnp.cos(r * (math.pi / cutoff)) + 1.0),
                    0.0)                                              # CosineCutoff
    h = dense(fij, wf1_ref, o_bf1, f, act=True)                       # filter_network[0]
    wfilt = dense(h, wf2_ref, o_bf2, f) * cut                         # filter_network[1] * cutoff
    yi = dense(xi, w_in2f_ref)                                        # in2f (no bias)  [A, F]
    yj = jnp.dot(gmat, yi.astype(jnp.bfloat16),
                 preferred_element_type=jnp.float32)                  # neighbor gather [P, F]
    v = dense(yj * wfilt, wfo_ref, o_bfo, f, act=True)                # f2out           [P, F]

    # interleaved cos slab: col j -> cos[:, j % DIMS]  (pure VPU select, no MXU)
    lane = jax.lax.broadcasted_iota(jnp.int32, (p, m), 1) % DIMS
    c0 = jnp.broadcast_to(cos[:, 0:1], (p, m))
    c1 = jnp.broadcast_to(cos[:, 1:2], (p, m))
    c2 = jnp.broadcast_to(cos[:, 2:3], (p, m))
    cos_slab = jnp.where(lane == 0, c0, jnp.where(lane == 1, c1, c2))  # [P, 3C]

    # ---------------- fused pairnet | envnet (interleaved-widened 2nd layer) -
    hpe = dense(v, wpe1_ref, o_bpe1, 2 * f, act=True)                 # [P, 2F]
    pe = dense(hpe, wpe2_ref, o_bpe2, 2 * m)                          # [P, 6C]
    vij_i = pe[:, 0:m] * cos_slab                                     # Vij per pair (unmasked)
    vik_i = pe[:, m:2 * m] * cos_slab * mask                          # masked Vik per pair

    # ---------------- fused aggregation: one N=128 push ----------------------
    agg_in = jnp.concatenate([v * mask, vik_i], axis=1).astype(jnp.bfloat16)   # [P, F+3C]
    aggd = jnp.dot(agg, agg_in, preferred_element_type=jnp.float32)            # [A, F+3C]
    vsum = aggd[:, 0:f]                                                        # masked sum of v
    vik_agg = aggd[:, f:f + m]                                                 # Vik  [A, 3C]

    # ---------------- atom-wise branch: vi = atomnet(agg(v, mask)) -----------
    vi = dense(dense(vsum, wa1_ref, o_ba1, f, act=True), wa2_ref, o_ba2, c)
    vi_ref[0, :, :] = vi                                               # [A, C]

    # ---------------- V = Vij + Vik[i] + Vjl (one 0/1 matmul, interleaved) ---
    v_ref[0, :, :] = vij_i + jnp.dot(comb, vik_agg.astype(jnp.bfloat16),
                                     preferred_element_type=jnp.float32)


def _vmem_limit_bytes():
    """Explicit scoped-VMEM limit: above the 16/32 MiB defaults, under physical capacity."""
    cap = None
    try:
        cap = getattr(pltpu.get_tpu_info(), "vmem_capacity_bytes", None)
    except Exception:
        cap = None
    if not cap:
        cap = 64 << 20          # conservative fallback (v7x per-core VMEM)
    return int(min(cap * 3 // 4, 112 << 20))


# ---- JAX wrapper -------------------------------------------------------------
def schnorb_interaction(params, xi, r_ij, cos_ij, neighbors, neighbor_mask, f_ij):
    B, A, Nbh = neighbors.shape
    C = xi.shape[-1]
    S = f_ij.shape[-1]
    F = params["wf1"].shape[-1]
    P = A * Nbh
    M3 = DIMS * C

    nbh_flat = neighbors.reshape(B, P)

    # merged per-pair inputs: [f_ij | r | mask | cos]  -> one DMA per grid step
    pdata = jnp.concatenate(
        [f_ij.reshape(B, P, S).astype(jnp.float32),
         r_ij.reshape(B, P, 1).astype(jnp.float32),
         neighbor_mask.reshape(B, P, 1).astype(jnp.float32),
         cos_ij.reshape(B, P, DIMS).astype(jnp.float32)], axis=-1)
    xi_f = xi.astype(jnp.float32)

    # structural 0/1 matrices, built directly in bf16 (values {0,1,2} are exact in bf16)
    # TODO(synk): cache gmat/comb across calls when the neighbor lists are static.
    gmat = jax.nn.one_hot(nbh_flat, A, dtype=jnp.bfloat16)             # [B, P, A]
    bcast_np = np.repeat(np.eye(A, dtype=np.float32), Nbh, axis=0)     # [P, A]
    comb = gmat + jnp.asarray(bcast_np, dtype=jnp.bfloat16)            # [B, P, A]
    agg = jnp.asarray(bcast_np.T, dtype=jnp.bfloat16)                  # [A, P]

    # weights (bf16 at the MXU); pairnet/envnet fused; 2nd layer widened + interleaved
    bf16 = jnp.bfloat16
    w_in2f = params["w_in2f"].astype(bf16)
    wf1 = params["wf1"].astype(bf16)
    wf2 = params["wf2"].astype(bf16)
    wfo = params["wfo"].astype(bf16)
    wa1 = params["wa1"].astype(bf16)
    wa2 = params["wa2"].astype(bf16)
    wpe1 = jnp.concatenate([params["wp1"], params["we1"]], axis=1).astype(bf16)  # [F, 2F]

    wp2_i = jnp.repeat(params["wp2"], DIMS, axis=1)       # [F, 3C]  col j = wp2[:, j//3]
    we2_i = jnp.repeat(params["we2"], DIMS, axis=1)       # [F, 3C]
    wpe2 = jnp.zeros((2 * F, 2 * M3), jnp.float32)
    wpe2 = wpe2.at[:F, :M3].set(wp2_i).at[F:, M3:].set(we2_i).astype(bf16)       # [2F, 6C]
    bp2_i = jnp.repeat(params["bp2"], DIMS, axis=1)       # [1, 3C]
    be2_i = jnp.repeat(params["be2"], DIMS, axis=1)       # [1, 3C]

    # packed biases (f32): [bf1|bf2|bfo|ba1|ba2|bp1|be1|bp2_i|be2_i]
    bias_pack = jnp.concatenate(
        [params["bf1"], params["bf2"], params["bfo"], params["ba1"], params["ba2"],
         params["bp1"], params["be1"], bp2_i, be2_i], axis=1)

    def dspec(shape):   # per-batch data block
        nd = len(shape)
        return pl.BlockSpec((1,) + tuple(shape[1:]),
                            lambda b, _nd=nd: (b,) + (0,) * (_nd - 1))

    def wspec(shape):   # grid-invariant block (fetched once)
        nd = len(shape)
        return pl.BlockSpec(tuple(shape), lambda b, _nd=nd: (0,) * _nd)

    data = [pdata, xi_f, gmat, comb, agg,
            w_in2f, wf1, wf2, wfo, wa1, wa2, wpe1, wpe2, bias_pack]
    in_specs = [dspec(pdata.shape), dspec(xi_f.shape),
                dspec(gmat.shape), dspec(comb.shape)]
    in_specs += [wspec(x.shape) for x in data[4:]]

    out_shape = (jax.ShapeDtypeStruct((B, A, C), jnp.float32),         # vi
                 jax.ShapeDtypeStruct((B, P, M3), jnp.float32))        # V (interleaved)
    out_specs = (pl.BlockSpec((1, A, C), lambda b: (b, 0, 0)),
                 pl.BlockSpec((1, P, M3), lambda b: (b, 0, 0)))

    vi, v_flat = pl.pallas_call(
        partial(_schnorb_kernel, cutoff=CUTOFF, s=S, f=F, c=C),
        out_shape=out_shape,
        grid=(B,),
        in_specs=in_specs,
        out_specs=out_specs,
        compiler_params=pltpu.CompilerParams(
            dimension_semantics=("parallel",),
            vmem_limit_bytes=_vmem_limit_bytes()),
    )(*data)

    # pure row-major reshape: col = c*DIMS + d  ->  [..., C, DIMS]  (no transpose)
    V = v_flat.reshape(B, A, Nbh, C, DIMS)
    return vi, V


# ---- pure-JAX f32 reference (module semantics) for a loose sanity check -----
def _reference(params, xi, r_ij, cos_ij, neighbors, neighbor_mask, f_ij):
    B, A, Nbh = neighbors.shape

    def ssp(x):
        return jnp.logaddexp(x, 0.0) - LOG2

    def dense(x, w, b):
        return x @ w + b

    W = dense(ssp(dense(f_ij, params["wf1"], params["bf1"])), params["wf2"], params["bf2"])
    cut = jnp.where(r_ij < CUTOFF, 0.5 * (jnp.cos(r_ij * math.pi / CUTOFF) + 1.0), 0.0)
    W = W * cut[..., None]
    y = xi @ params["w_in2f"]                                            # [B, A, F]
    yj = jax.vmap(lambda yb, nb: yb[nb])(y, neighbors)                   # [B, A, Nbh, F]
    v = ssp(dense(yj * W, params["wfo"], params["bfo"]))                 # FTLayer output
    vi = jnp.sum(v * neighbor_mask[..., None], axis=2)                   # Aggregate(axis=2)
    vi = dense(ssp(dense(vi, params["wa1"], params["ba1"])), params["wa2"], params["ba2"])
    vij = dense(ssp(dense(v, params["wp1"], params["bp1"])), params["wp2"], params["bp2"])
    Vij = vij[..., :, None] * cos_ij[..., None, :]
    vik = dense(ssp(dense(v, params["we1"], params["be1"])), params["we2"], params["be2"])
    Vik_p = vik[..., :, None] * cos_ij[..., None, :] * neighbor_mask[..., None, None]
    Vik = jnp.sum(Vik_p, axis=2)                                         # [B, A, C, 3]
    Vjl = jax.vmap(lambda Vb, nb: Vb[nb.reshape(-1)])(Vik, neighbors)
    Vjl = Vjl.reshape(B, A, Nbh, Vik.shape[2], Vik.shape[3])
    V = Vij + Vik[:, :, None] + Vjl
    return vi, V


# ---- deterministic parameter init (shapes from __init__) --------------------
def init_params(key):
    def dense_init(k, nin, nout, bias=True):
        kw, kb = jax.random.split(k)
        w = jax.random.normal(kw, (nin, nout), jnp.float32) / np.sqrt(nin)
        b = 0.1 * jax.random.normal(kb, (1, nout), jnp.float32) if bias else None
        return w, b

    keys = jax.random.split(key, 10)
    p = {}
    p["w_in2f"], _ = dense_init(keys[0], N_COSINE_BASIS, N_FACTORS, bias=False)
    p["wf1"], p["bf1"] = dense_init(keys[1], N_SPATIAL_BASIS, N_FACTORS)
    p["wf2"], p["bf2"] = dense_init(keys[2], N_FACTORS, N_FACTORS)
    p["wfo"], p["bfo"] = dense_init(keys[3], N_FACTORS, N_FACTORS)
    p["wa1"], p["ba1"] = dense_init(keys[4], N_FACTORS, N_FACTORS)
    p["wa2"], p["ba2"] = dense_init(keys[5], N_FACTORS, N_COSINE_BASIS)
    p["wp1"], p["bp1"] = dense_init(keys[6], N_FACTORS, N_FACTORS)
    p["wp2"], p["bp2"] = dense_init(keys[7], N_FACTORS, N_COSINE_BASIS)
    p["we1"], p["be1"] = dense_init(keys[8], N_FACTORS, N_FACTORS)
    p["we2"], p["be2"] = dense_init(keys[9], N_FACTORS, N_COSINE_BASIS)
    return p


if __name__ == "__main__":
    key = jax.random.PRNGKey(0)
    kx, kr, kc, kf, kp = jax.random.split(key, 5)

    B, A = 2, 8
    Nbh = A - 1  # all other atoms as neighbors

    xi = jax.random.normal(kx, (B, A, N_COSINE_BASIS), jnp.float32)
    r_ij = 0.5 + 5.5 * jax.random.uniform(kr, (B, A, Nbh), dtype=jnp.float32)
    raw = jax.random.normal(kc, (B, A, Nbh, DIMS), jnp.float32)
    cos_ij = raw / jnp.linalg.norm(raw, axis=-1, keepdims=True)
    f_ij = jax.random.normal(kf, (B, A, Nbh, N_SPATIAL_BASIS), jnp.float32)

    idx = np.arange(A)
    nbh_np = np.stack([np.delete(idx, i) for i in range(A)], axis=0)      # [A, Nbh]
    neighbors = jnp.asarray(np.broadcast_to(nbh_np, (B, A, Nbh)).copy(),
                            dtype=jnp.int32)
    mask_np = np.ones((B, A, Nbh), np.float32)
    mask_np[1, 3, 5:] = 0.0  # a couple of padded (virtual) neighbors (indices stay in-range)
    neighbor_mask = jnp.asarray(mask_np)

    params = init_params(kp)

    fwd = jax.jit(partial(schnorb_interaction, params))
    vi, V = fwd(xi, r_ij, cos_ij, neighbors, neighbor_mask, f_ij)
    jax.block_until_ready((vi, V))

    assert vi.shape == (B, A, N_COSINE_BASIS)
    assert V.shape == (B, A, Nbh, N_COSINE_BASIS, DIMS)
    assert np.isfinite(np.asarray(vi)).all()
    assert np.isfinite(np.asarray(V)).all()

    # loose sanity check vs the all-f32 reference (kernel uses bf16 MXU operands,
    # so only gross structural / permutation errors would trip these tolerances)
    vi_ref, V_ref = _reference(params, xi, r_ij, cos_ij, neighbors, neighbor_mask, f_ij)
    np.testing.assert_allclose(np.asarray(vi), np.asarray(vi_ref), rtol=0.05, atol=0.3)
    np.testing.assert_allclose(np.asarray(V), np.asarray(V_ref), rtol=0.05, atol=0.6)

    print("KERNEL_OK")
</pallas_src>

<mosaic_0001>
module attributes {stable_mosaic.version = 11 : i64} {
  func.func @_schnorb_kernel(%arg0: i32, %arg1: memref<1x56x21xf32, #tpu.memory_space<vmem>>, %arg2: memref<1x8x32xf32, #tpu.memory_space<vmem>>, %arg3: memref<1x56x8xbf16, #tpu.memory_space<vmem>>, %arg4: memref<1x56x8xbf16, #tpu.memory_space<vmem>>, %arg5: memref<8x56xbf16, #tpu.memory_space<vmem>>, %arg6: memref<32x32xbf16, #tpu.memory_space<vmem>>, %arg7: memref<16x32xbf16, #tpu.memory_space<vmem>>, %arg8: memref<32x32xbf16, #tpu.memory_space<vmem>>, %arg9: memref<32x32xbf16, #tpu.memory_space<vmem>>, %arg10: memref<32x32xbf16, #tpu.memory_space<vmem>>, %arg11: memref<32x32xbf16, #tpu.memory_space<vmem>>, %arg12: memref<32x64xbf16, #tpu.memory_space<vmem>>, %arg13: memref<64x192xbf16, #tpu.memory_space<vmem>>, %arg14: memref<1x416xf32, #tpu.memory_space<vmem>>, %arg15: memref<1x8x32xf32, #tpu.memory_space<vmem>>, %arg16: memref<1x56x96xf32, #tpu.memory_space<vmem>>) attributes {dimension_semantics = [#tpu.dimension_semantics<parallel>], iteration_bounds = array<i64: 2>, scalar_prefetch = 0 : i64, scratch_operands = 0 : i64, tpu.core_type = #tpu.core_type<tc>, window_params = [{transform_indices = @transform_0, window_bounds = array<i64: 1, 56, 21>}, {transform_indices = @transform_1, window_bounds = array<i64: 1, 8, 32>}, {transform_indices = @transform_2, window_bounds = array<i64: 1, 56, 8>}, {transform_indices = @transform_3, window_bounds = array<i64: 1, 56, 8>}, {pipeline_mode = #tpu.pipeline_mode<synchronous>, transform_indices = @transform_4, window_bounds = array<i64: 8, 56>}, {pipeline_mode = #tpu.pipeline_mode<synchronous>, transform_indices = @transform_5, window_bounds = array<i64: 32, 32>}, {pipeline_mode = #tpu.pipeline_mode<synchronous>, transform_indices = @transform_6, window_bounds = array<i64: 16, 32>}, {pipeline_mode = #tpu.pipeline_mode<synchronous>, transform_indices = @transform_7, window_bounds = array<i64: 32, 32>}, {pipeline_mode = #tpu.pipeline_mode<synchronous>, transform_indices = @transform_8, window_bounds = array<i64: 32, 32>}, {pipeline_mode = #tpu.pipeline_mode<synchronous>, transform_indices = @transform_9, window_bounds = array<i64: 32, 32>}, {pipeline_mode = #tpu.pipeline_mode<synchronous>, transform_indices = @transform_10, window_bounds = array<i64: 32, 32>}, {pipeline_mode = #tpu.pipeline_mode<synchronous>, transform_indices = @transform_11, window_bounds = array<i64: 32, 64>}, {pipeline_mode = #tpu.pipeline_mode<synchronous>, transform_indices = @transform_12, window_bounds = array<i64: 64, 192>}, {pipeline_mode = #tpu.pipeline_mode<synchronous>, transform_indices = @transform_13, window_bounds = array<i64: 1, 416>}, {transform_indices = @transform_14, window_bounds = array<i64: 1, 8, 32>}, {transform_indices = @transform_15, window_bounds = array<i64: 1, 56, 96>}]} {
    %c0 = arith.constant 0 : index
    %c0_0 = arith.constant 0 : index
    %c0_1 = arith.constant 0 : index
    %0 = vector.load %arg1[%c0, %c0_0, %c0_1] : memref<1x56x21xf32, #tpu.memory_space<vmem>>, vector<1x56x21xf32>
    %1 = vector.shape_cast %0 : vector<1x56x21xf32> to vector<56x21xf32>
    %2 = vector.extract_strided_slice %1 {offsets = [0, 0], sizes = [56, 16], strides = [1, 1]} : vector<56x21xf32> to vector<56x16xf32>
    %3 = vector.extract_strided_slice %1 {offsets = [0, 16], sizes = [56, 1], strides = [1, 1]} : vector<56x21xf32> to vector<56x1xf32>
    %4 = vector.extract_strided_slice %1 {offsets = [0, 17], sizes = [56, 1], strides = [1, 1]} : vector<56x21xf32> to vector<56x1xf32>
    %5 = vector.extract_strided_slice %1 {offsets = [0, 18], sizes = [56, 3], strides = [1, 1]} : vector<56x21xf32> to vector<56x3xf32>
    %c0_2 = arith.constant 0 : index
    %c0_3 = arith.constant 0 : index
    %c0_4 = arith.constant 0 : index
    %6 = vector.load %arg2[%c0_2, %c0_3, %c0_4] : memref<1x8x32xf32, #tpu.memory_space<vmem>>, vector<1x8x32xf32>
    %7 = vector.shape_cast %6 : vector<1x8x32xf32> to vector<8x32xf32>
    %c0_5 = arith.constant 0 : index
    %c0_6 = arith.constant 0 : index
    %c0_7 = arith.constant 0 : index
    %8 = vector.load %arg3[%c0_5, %c0_6, %c0_7] : memref<1x56x8xbf16, #tpu.memory_space<vmem>>, vector<1x56x8xbf16>
    %9 = vector.shape_cast %8 : vector<1x56x8xbf16> to vector<56x8xbf16>
    %c0_8 = arith.constant 0 : index
    %c0_9 = arith.constant 0 : index
    %c0_10 = arith.constant 0 : index
    %10 = vector.load %arg4[%c0_8, %c0_9, %c0_10] : memref<1x56x8xbf16, #tpu.memory_space<vmem>>, vector<1x56x8xbf16>
    %11 = vector.shape_cast %10 : vector<1x56x8xbf16> to vector<56x8xbf16>
    %c0_11 = arith.constant 0 : index
    %c0_12 = arith.constant 0 : index
    %12 = vector.load %arg5[%c0_11, %c0_12] : memref<8x56xbf16, #tpu.memory_space<vmem>>, vector<8x56xbf16>
    %cst = arith.constant 5.000000e+00 : f32
    %13 = vector.broadcast %cst : f32 to vector<56x1xf32>
    %14 = arith.cmpf olt, %3, %13 : vector<56x1xf32>
    %cst_13 = arith.constant 0.628318548 : f32
    %15 = vector.broadcast %cst_13 : f32 to vector<56x1xf32>
    %16 = arith.mulf %3, %15 : vector<56x1xf32>
    %17 = math.cos %16 : vector<56x1xf32>
    %cst_14 = arith.constant 1.000000e+00 : f32
    %18 = vector.broadcast %cst_14 : f32 to vector<56x1xf32>
    %19 = arith.addf %17, %18 : vector<56x1xf32>
    %cst_15 = arith.constant 5.000000e-01 : f32
    %20 = vector.broadcast %cst_15 : f32 to vector<56x1xf32>
    %21 = arith.mulf %20, %19 : vector<56x1xf32>
    %cst_16 = arith.constant 0.000000e+00 : f32
    %22 = vector.broadcast %cst_16 : f32 to vector<56x1xf32>
    %23 = arith.select %14, %21, %22 : vector<56x1xi1>, vector<56x1xf32>
    %24 = arith.truncf %2 : vector<56x16xf32> to vector<56x16xbf16>
    %c0_17 = arith.constant 0 : index
    %c0_18 = arith.constant 0 : index
    %25 = vector.load %arg7[%c0_17, %c0_18] : memref<16x32xbf16, #tpu.memory_space<vmem>>, vector<16x32xbf16>
    %cst_19 = arith.constant dense<0.000000e+00> : vector<56x32xf32>
    %26 = tpu.matmul %24, %25, %cst_19 {dimension_numbers = #tpu.dot_dimension_numbers<[1], [0], [0], [1], [0, 0, 1, 1], [], []>} : vector<56x16xbf16>, vector<16x32xbf16>, vector<56x32xf32> -> vector<56x32xf32>
    %c0_20 = arith.constant 0 : index
    %c0_21 = arith.constant 0 : index
    %27 = vector.load %arg14[%c0_20, %c0_21] : memref<1x416xf32, #tpu.memory_space<vmem>>, vector<1x32xf32>
    %28 = vector.broadcast %27 : vector<1x32xf32> to vector<56x32xf32>
    %29 = arith.addf %26, %28 : vector<56x32xf32>
    %cst_22 = arith.constant 0.000000e+00 : f32
    %30 = vector.broadcast %cst_22 : f32 to vector<56x32xf32>
    %31 = arith.maximumf %29, %30 : vector<56x32xf32>
    %32 = math.absf %29 : vector<56x32xf32>
    %cst_23 = arith.constant 0.000000e+00 : f32
    %33 = vector.broadcast %cst_23 : f32 to vector<56x32xf32>
    %34 = arith.subf %33, %32 : vector<56x32xf32>
    %35 = math.exp %34 : vector<56x32xf32>
    %cst_24 = arith.constant 1.000000e+00 : f32
    %36 = vector.broadcast %cst_24 : f32 to vector<56x32xf32>
    %37 = arith.addf %36, %35 : vector<56x32xf32>
    %38 = math.log %37 : vector<56x32xf32>
    %39 = arith.addf %31, %38 : vector<56x32xf32>
    %cst_25 = arith.constant 0.693147182 : f32
    %40 = vector.broadcast %cst_25 : f32 to vector<56x32xf32>
    %41 = arith.subf %39, %40 : vector<56x32xf32>
    %42 = arith.truncf %41 : vector<56x32xf32> to vector<56x32xbf16>
    %c0_26 = arith.constant 0 : index
    %c0_27 = arith.constant 0 : index
    %43 = vector.load %arg8[%c0_26, %c0_27] : memref<32x32xbf16, #tpu.memory_space<vmem>>, vector<32x32xbf16>
    %cst_28 = arith.constant dense<0.000000e+00> : vector<56x32xf32>
    %44 = tpu.matmul %42, %43, %cst_28 {dimension_numbers = #tpu.dot_dimension_numbers<[1], [0], [0], [1], [0, 0, 1, 1], [], []>} : vector<56x32xbf16>, vector<32x32xbf16>, vector<56x32xf32> -> vector<56x32xf32>
    %c0_29 = arith.constant 0 : index
    %c32 = arith.constant 32 : index
    %45 = vector.load %arg14[%c0_29, %c32] : memref<1x416xf32, #tpu.memory_space<vmem>>, vector<1x32xf32>
    %46 = vector.broadcast %45 : vector<1x32xf32> to vector<56x32xf32>
    %47 = arith.addf %44, %46 : vector<56x32xf32>
    %48 = vector.broadcast %23 : vector<56x1xf32> to vector<56x32xf32>
    %49 = arith.mulf %47, %48 : vector<56x32xf32>
    %50 = arith.truncf %7 : vector<8x32xf32> to vector<8x32xbf16>
    %c0_30 = arith.constant 0 : index
    %c0_31 = arith.constant 0 : index
    %51 = vector.load %arg6[%c0_30, %c0_31] : memref<32x32xbf16, #tpu.memory_space<vmem>>, vector<32x32xbf16>
    %cst_32 = arith.constant dense<0.000000e+00> : vector<8x32xf32>
    %52 = tpu.matmul %50, %51, %cst_32 {dimension_numbers = #tpu.dot_dimension_numbers<[1], [0], [0], [1], [0, 0, 1, 1], [], []>} : vector<8x32xbf16>, vector<32x32xbf16>, vector<8x32xf32> -> vector<8x32xf32>
    %53 = arith.truncf %52 : vector<8x32xf32> to vector<8x32xbf16>
    %cst_33 = arith.constant dense<0.000000e+00> : vector<56x32xf32>
    %54 = tpu.matmul %9, %53, %cst_33 {dimension_numbers = #tpu.dot_dimension_numbers<[1], [0], [0], [1], [0, 0, 1, 1], [], []>} : vector<56x8xbf16>, vector<8x32xbf16>, vector<56x32xf32> -> vector<56x32xf32>
    %55 = arith.mulf %54, %49 : vector<56x32xf32>
    %56 = arith.truncf %55 : vector<56x32xf32> to vector<56x32xbf16>
    %c0_34 = arith.constant 0 : index
    %c0_35 = arith.constant 0 : index
    %57 = vector.load %arg9[%c0_34, %c0_35] : memref<32x32xbf16, #tpu.memory_space<vmem>>, vector<32x32xbf16>
    %cst_36 = arith.constant dense<0.000000e+00> : vector<56x32xf32>
    %58 = tpu.matmul %56, %57, %cst_36 {dimension_numbers = #tpu.dot_dimension_numbers<[1], [0], [0], [1], [0, 0, 1, 1], [], []>} : vector<56x32xbf16>, vector<32x32xbf16>, vector<56x32xf32> -> vector<56x32xf32>
    %c0_37 = arith.constant 0 : index
    %c64 = arith.constant 64 : index
    %59 = vector.load %arg14[%c0_37, %c64] : memref<1x416xf32, #tpu.memory_space<vmem>>, vector<1x32xf32>
    %60 = vector.broadcast %59 : vector<1x32xf32> to vector<56x32xf32>
    %61 = arith.addf %58, %60 : vector<56x32xf32>
    %cst_38 = arith.constant 0.000000e+00 : f32
    %62 = vector.broadcast %cst_38 : f32 to vector<56x32xf32>
    %63 = arith.maximumf %61, %62 : vector<56x32xf32>
    %64 = math.absf %61 : vector<56x32xf32>
    %cst_39 = arith.constant 0.000000e+00 : f32
    %65 = vector.broadcast %cst_39 : f32 to vector<56x32xf32>
    %66 = arith.subf %65, %64 : vector<56x32xf32>
    %67 = math.exp %66 : vector<56x32xf32>
    %cst_40 = arith.constant 1.000000e+00 : f32
    %68 = vector.broadcast %cst_40 : f32 to vector<56x32xf32>
    %69 = arith.addf %68, %67 : vector<56x32xf32>
    %70 = math.log %69 : vector<56x32xf32>
    %71 = arith.addf %63, %70 : vector<56x32xf32>
    %cst_41 = arith.constant 0.693147182 : f32
    %72 = vector.broadcast %cst_41 : f32 to vector<56x32xf32>
    %73 = arith.subf %71, %72 : vector<56x32xf32>
    %74 = tpu.iota {dimensions = array<i32: 1>} : vector<56x96xi32>
    %c3_i32 = arith.constant 3 : i32
    %c0_i32 = arith.constant 0 : i32
    %75 = arith.cmpi eq, %c3_i32, %c0_i32 : i32
    %c1_i32 = arith.constant 1 : i32
    %76 = arith.select %75, %c1_i32, %c3_i32 : i32
    %77 = vector.broadcast %76 : i32 to vector<56x96xi32>
    %78 = arith.remsi %74, %77 : vector<56x96xi32>
    %c0_i32_42 = arith.constant 0 : i32
    %79 = vector.broadcast %c0_i32_42 : i32 to vector<56x96xi32>
    %80 = arith.cmpi ne, %78, %79 : vector<56x96xi32>
    %c0_i32_43 = arith.constant 0 : i32
    %81 = vector.broadcast %c0_i32_43 : i32 to vector<56x96xi32>
    %82 = arith.cmpi slt, %78, %81 : vector<56x96xi32>
    %c0_i32_44 = arith.constant 0 : i32
    %83 = arith.cmpi slt, %76, %c0_i32_44 : i32
    %84 = vector.broadcast %83 : i1 to vector<56x96xi1>
    %85 = vector.broadcast %84 : vector<56x96xi1> to vector<56x96xi1>
    %86 = arith.xori %82, %85 : vector<56x96xi1>
    %87 = arith.andi %86, %80 : vector<56x96xi1>
    %88 = vector.broadcast %76 : i32 to vector<56x96xi32>
    %89 = arith.addi %78, %88 : vector<56x96xi32>
    %90 = arith.select %87, %89, %78 : vector<56x96xi1>, vector<56x96xi32>
    %91 = vector.extract_strided_slice %5 {offsets = [0, 0], sizes = [56, 1], strides = [1, 1]} : vector<56x3xf32> to vector<56x1xf32>
    %92 = vector.shape_cast %91 : vector<56x1xf32> to vector<56x1xf32>
    %93 = vector.broadcast %92 : vector<56x1xf32> to vector<56x96xf32>
    %94 = vector.extract_strided_slice %5 {offsets = [0, 1], sizes = [56, 1], strides = [1, 1]} : vector<56x3xf32> to vector<56x1xf32>
    %95 = vector.shape_cast %94 : vector<56x1xf32> to vector<56x1xf32>
    %96 = vector.broadcast %95 : vector<56x1xf32> to vector<56x96xf32>
    %97 = vector.extract_strided_slice %5 {offsets = [0, 2], sizes = [56, 1], strides = [1, 1]} : vector<56x3xf32> to vector<56x1xf32>
    %98 = vector.shape_cast %97 : vector<56x1xf32> to vector<56x1xf32>
    %99 = vector.broadcast %98 : vector<56x1xf32> to vector<56x96xf32>
    %c0_i32_45 = arith.constant 0 : i32
    %100 = vector.broadcast %c0_i32_45 : i32 to vector<56x96xi32>
    %101 = arith.cmpi eq, %90, %100 : vector<56x96xi32>
    %c1_i32_46 = arith.constant 1 : i32
    %102 = vector.broadcast %c1_i32_46 : i32 to vector<56x96xi32>
    %103 = arith.cmpi eq, %90, %102 : vector<56x96xi32>
    %104 = arith.select %103, %96, %99 : vector<56x96xi1>, vector<56x96xf32>
    %105 = arith.select %101, %93, %104 : vector<56x96xi1>, vector<56x96xf32>
    %106 = arith.truncf %73 : vector<56x32xf32> to vector<56x32xbf16>
    %c0_47 = arith.constant 0 : index
    %c0_48 = arith.constant 0 : index
    %107 = vector.load %arg12[%c0_47, %c0_48] : memref<32x64xbf16, #tpu.memory_space<vmem>>, vector<32x64xbf16>
    %cst_49 = arith.constant dense<0.000000e+00> : vector<56x64xf32>
    %108 = tpu.matmul %106, %107, %cst_49 {dimension_numbers = #tpu.dot_dimension_numbers<[1], [0], [0], [1], [0, 0, 1, 1], [], []>} : vector<56x32xbf16>, vector<32x64xbf16>, vector<56x64xf32> -> vector<56x64xf32>
    %c0_50 = arith.constant 0 : index
    %c160 = arith.constant 160 : index
    %109 = vector.load %arg14[%c0_50, %c160] : memref<1x416xf32, #tpu.memory_space<vmem>>, vector<1x64xf32>
    %110 = vector.broadcast %109 : vector<1x64xf32> to vector<56x64xf32>
    %111 = arith.addf %108, %110 : vector<56x64xf32>
    %cst_51 = arith.constant 0.000000e+00 : f32
    %112 = vector.broadcast %cst_51 : f32 to vector<56x64xf32>
    %113 = arith.maximumf %111, %112 : vector<56x64xf32>
    %114 = math.absf %111 : vector<56x64xf32>
    %cst_52 = arith.constant 0.000000e+00 : f32
    %115 = vector.broadcast %cst_52 : f32 to vector<56x64xf32>
    %116 = arith.subf %115, %114 : vector<56x64xf32>
    %117 = math.exp %116 : vector<56x64xf32>
    %cst_53 = arith.constant 1.000000e+00 : f32
    %118 = vector.broadcast %cst_53 : f32 to vector<56x64xf32>
    %119 = arith.addf %118, %117 : vector<56x64xf32>
    %120 = math.log %119 : vector<56x64xf32>
    %121 = arith.addf %113, %120 : vector<56x64xf32>
    %cst_54 = arith.constant 0.693147182 : f32
    %122 = vector.broadcast %cst_54 : f32 to vector<56x64xf32>
    %123 = arith.subf %121, %122 : vector<56x64xf32>
    %124 = arith.truncf %123 : vector<56x64xf32> to vector<56x64xbf16>
    %c0_55 = arith.constant 0 : index
    %c0_56 = arith.constant 0 : index
    %125 = vector.load %arg13[%c0_55, %c0_56] : memref<64x192xbf16, #tpu.memory_space<vmem>>, vector<64x192xbf16>
    %cst_57 = arith.constant dense<0.000000e+00> : vector<56x192xf32>
    %126 = tpu.matmul %124, %125, %cst_57 {dimension_numbers = #tpu.dot_dimension_numbers<[1], [0], [0], [1], [0, 0, 1, 1], [], []>} : vector<56x64xbf16>, vector<64x192xbf16>, vector<56x192xf32> -> vector<56x192xf32>
    %c0_58 = arith.constant 0 : index
    %c224 = arith.constant 224 : index
    %127 = vector.load %arg14[%c0_58, %c224] : memref<1x416xf32, #tpu.memory_space<vmem>>, vector<1x192xf32>
    %128 = vector.broadcast %127 : vector<1x192xf32> to vector<56x192xf32>
    %129 = arith.addf %126, %128 : vector<56x192xf32>
    %130 = vector.extract_strided_slice %129 {offsets = [0, 0], sizes = [56, 96], strides = [1, 1]} : vector<56x192xf32> to vector<56x96xf32>
    %131 = arith.mulf %130, %105 : vector<56x96xf32>
    %132 = vector.extract_strided_slice %129 {offsets = [0, 96], sizes = [56, 96], strides = [1, 1]} : vector<56x192xf32> to vector<56x96xf32>
    %133 = arith.mulf %132, %105 : vector<56x96xf32>
    %134 = vector.broadcast %4 : vector<56x1xf32> to vector<56x96xf32>
    %135 = arith.mulf %133, %134 : vector<56x96xf32>
    %136 = vector.broadcast %4 : vector<56x1xf32> to vector<56x32xf32>
    %137 = arith.mulf %73, %136 : vector<56x32xf32>
    %138 = tpu.concatenate %137, %135 in 1 : vector<56x32xf32>, vector<56x96xf32> -> vector<56x128xf32>
    %139 = arith.truncf %138 : vector<56x128xf32> to vector<56x128xbf16>
    %cst_59 = arith.constant dense<0.000000e+00> : vector<8x128xf32>
    %140 = tpu.matmul %12, %139, %cst_59 {dimension_numbers = #tpu.dot_dimension_numbers<[1], [0], [0], [1], [0, 0, 1, 1], [], []>} : vector<8x56xbf16>, vector<56x128xbf16>, vector<8x128xf32> -> vector<8x128xf32>
    %141 = vector.extract_strided_slice %140 {offsets = [0, 0], sizes = [8, 32], strides = [1, 1]} : vector<8x128xf32> to vector<8x32xf32>
    %142 = vector.extract_strided_slice %140 {offsets = [0, 32], sizes = [8, 96], strides = [1, 1]} : vector<8x128xf32> to vector<8x96xf32>
    %143 = arith.truncf %141 : vector<8x32xf32> to vector<8x32xbf16>
    %c0_60 = arith.constant 0 : index
    %c0_61 = arith.constant 0 : index
    %144 = vector.load %arg10[%c0_60, %c0_61] : memref<32x32xbf16, #tpu.memory_space<vmem>>, vector<32x32xbf16>
    %cst_62 = arith.constant dense<0.000000e+00> : vector<8x32xf32>
    %145 = tpu.matmul %143, %144, %cst_62 {dimension_numbers = #tpu.dot_dimension_numbers<[1], [0], [0], [1], [0, 0, 1, 1], [], []>} : vector<8x32xbf16>, vector<32x32xbf16>, vector<8x32xf32> -> vector<8x32xf32>
    %c0_63 = arith.constant 0 : index
    %c96 = arith.constant 96 : index
    %146 = vector.load %arg14[%c0_63, %c96] : memref<1x416xf32, #tpu.memory_space<vmem>>, vector<1x32xf32>
    %147 = vector.broadcast %146 : vector<1x32xf32> to vector<8x32xf32>
    %148 = arith.addf %145, %147 : vector<8x32xf32>
    %cst_64 = arith.constant 0.000000e+00 : f32
    %149 = vector.broadcast %cst_64 : f32 to vector<8x32xf32>
    %150 = arith.maximumf %148, %149 : vector<8x32xf32>
    %151 = math.absf %148 : vector<8x32xf32>
    %cst_65 = arith.constant 0.000000e+00 : f32
    %152 = vector.broadcast %cst_65 : f32 to vector<8x32xf32>
    %153 = arith.subf %152, %151 : vector<8x32xf32>
    %154 = math.exp %153 : vector<8x32xf32>
    %cst_66 = arith.constant 1.000000e+00 : f32
    %155 = vector.broadcast %cst_66 : f32 to vector<8x32xf32>
    %156 = arith.addf %155, %154 : vector<8x32xf32>
    %157 = math.log %156 : vector<8x32xf32>
    %158 = arith.addf %150, %157 : vector<8x32xf32>
    %cst_67 = arith.constant 0.693147182 : f32
    %159 = vector.broadcast %cst_67 : f32 to vector<8x32xf32>
    %160 = arith.subf %158, %159 : vector<8x32xf32>
    %161 = arith.truncf %160 : vector<8x32xf32> to vector<8x32xbf16>
    %c0_68 = arith.constant 0 : index
    %c0_69 = arith.constant 0 : index
    %162 = vector.load %arg11[%c0_68, %c0_69] : memref<32x32xbf16, #tpu.memory_space<vmem>>, vector<32x32xbf16>
    %cst_70 = arith.constant dense<0.000000e+00> : vector<8x32xf32>
    %163 = tpu.matmul %161, %162, %cst_70 {dimension_numbers = #tpu.dot_dimension_numbers<[1], [0], [0], [1], [0, 0, 1, 1], [], []>} : vector<8x32xbf16>, vector<32x32xbf16>, vector<8x32xf32> -> vector<8x32xf32>
    %c0_71 = arith.constant 0 : index
    %c128 = arith.constant 128 : index
    %164 = vector.load %arg14[%c0_71, %c128] : memref<1x416xf32, #tpu.memory_space<vmem>>, vector<1x32xf32>
    %165 = vector.broadcast %164 : vector<1x32xf32> to vector<8x32xf32>
    %166 = arith.addf %163, %165 : vector<8x32xf32>
    %c0_72 = arith.constant 0 : index
    %c0_73 = arith.constant 0 : index
    %c0_74 = arith.constant 0 : index
    %167 = vector.load %arg15[%c0_72, %c0_73, %c0_74] : memref<1x8x32xf32, #tpu.memory_space<vmem>>, vector<1x8x32xf32>
    %168 = vector.shape_cast %167 : vector<1x8x32xf32> to vector<8x32xf32>
    %169 = vector.shape_cast %166 : vector<8x32xf32> to vector<1x8x32xf32>
    tpu.vector_store %arg15[%c0_72, %c0_73, %c0_74], %169 {strides = array<i32>} : memref<1x8x32xf32, #tpu.memory_space<vmem>>, vector<1x8x32xf32>,
    %170 = arith.truncf %142 : vector<8x96xf32> to vector<8x96xbf16>
    %cst_75 = arith.constant dense<0.000000e+00> : vector<56x96xf32>
    %171 = tpu.matmul %11, %170, %cst_75 {dimension_numbers = #tpu.dot_dimension_numbers<[1], [0], [0], [1], [0, 0, 1, 1], [], []>} : vector<56x8xbf16>, vector<8x96xbf16>, vector<56x96xf32> -> vector<56x96xf32>
    %172 = arith.addf %131, %171 : vector<56x96xf32>
    %c0_76 = arith.constant 0 : index
    %c0_77 = arith.constant 0 : index
    %c0_78 = arith.constant 0 : index
    %173 = vector.load %arg16[%c0_76, %c0_77, %c0_78] : memref<1x56x96xf32, #tpu.memory_space<vmem>>, vector<1x56x96xf32>
    %174 = vector.shape_cast %173 : vector<1x56x96xf32> to vector<56x96xf32>
    %175 = vector.shape_cast %172 : vector<56x96xf32> to vector<1x56x96xf32>
    tpu.vector_store %arg16[%c0_76, %c0_77, %c0_78], %175 {strides = array<i32>} : memref<1x56x96xf32, #tpu.memory_space<vmem>>, vector<1x56x96xf32>,
    return
  }
  func.func @transform_0(%arg0: i32) -> (i32, i32, i32) {
    %c0_i32 = arith.constant 0 : i32
    %c0_i32_0 = arith.constant 0 : i32
    %c0_i32_1 = arith.constant 0 : i32
    return %arg0, %c0_i32, %c0_i32_0 : i32, i32, i32
  }
  func.func @transform_1(%arg0: i32) -> (i32, i32, i32) {
    %c0_i32 = arith.constant 0 : i32
    %c0_i32_0 = arith.constant 0 : i32
    %c0_i32_1 = arith.constant 0 : i32
    return %arg0, %c0_i32, %c0_i32_0 : i32, i32, i32
  }
  func.func @transform_2(%arg0: i32) -> (i32, i32, i32) {
    %c0_i32 = arith.constant 0 : i32
    %c0_i32_0 = arith.constant 0 : i32
    %c0_i32_1 = arith.constant 0 : i32
    return %arg0, %c0_i32, %c0_i32_0 : i32, i32, i32
  }
  func.func @transform_3(%arg0: i32) -> (i32, i32, i32) {
    %c0_i32 = arith.constant 0 : i32
    %c0_i32_0 = arith.constant 0 : i32
    %c0_i32_1 = arith.constant 0 : i32
    return %arg0, %c0_i32, %c0_i32_0 : i32, i32, i32
  }
  func.func @transform_4(%arg0: i32) -> (i32, i32) {
    %c0_i32 = arith.constant 0 : i32
    %c0_i32_0 = arith.constant 0 : i32
    %c0_i32_1 = arith.constant 0 : i32
    return %c0_i32, %c0_i32_0 : i32, i32
  }
  func.func @transform_5(%arg0: i32) -> (i32, i32) {
    %c0_i32 = arith.constant 0 : i32
    %c0_i32_0 = arith.constant 0 : i32
    %c0_i32_1 = arith.constant 0 : i32
    return %c0_i32, %c0_i32_0 : i32, i32
  }
  func.func @transform_6(%arg0: i32) -> (i32, i32) {
    %c0_i32 = arith.constant 0 : i32
    %c0_i32_0 = arith.constant 0 : i32
    %c0_i32_1 = arith.constant 0 : i32
    return %c0_i32, %c0_i32_0 : i32, i32
  }
  func.func @transform_7(%arg0: i32) -> (i32, i32) {
    %c0_i32 = arith.constant 0 : i32
    %c0_i32_0 = arith.constant 0 : i32
    %c0_i32_1 = arith.constant 0 : i32
    return %c0_i32, %c0_i32_0 : i32, i32
  }
  func.func @transform_8(%arg0: i32) -> (i32, i32) {
    %c0_i32 = arith.constant 0 : i32
    %c0_i32_0 = arith.constant 0 : i32
    %c0_i32_1 = arith.constant 0 : i32
    return %c0_i32, %c0_i32_0 : i32, i32
  }
  func.func @transform_9(%arg0: i32) -> (i32, i32) {
    %c0_i32 = arith.constant 0 : i32
    %c0_i32_0 = arith.constant 0 : i32
    %c0_i32_1 = arith.constant 0 : i32
    return %c0_i32, %c0_i32_0 : i32, i32
  }
  func.func @transform_10(%arg0: i32) -> (i32, i32) {
    %c0_i32 = arith.constant 0 : i32
    %c0_i32_0 = arith.constant 0 : i32
    %c0_i32_1 = arith.constant 0 : i32
    return %c0_i32, %c0_i32_0 : i32, i32
  }
  func.func @transform_11(%arg0: i32) -> (i32, i32) {
    %c0_i32 = arith.constant 0 : i32
    %c0_i32_0 = arith.constant 0 : i32
    %c0_i32_1 = arith.constant 0 : i32
    return %c0_i32, %c0_i32_0 : i32, i32
  }
  func.func @transform_12(%arg0: i32) -> (i32, i32) {
    %c0_i32 = arith.constant 0 : i32
    %c0_i32_0 = arith.constant 0 : i32
    %c0_i32_1 = arith.constant 0 : i32
    return %c0_i32, %c0_i32_0 : i32, i32
  }
  func.func @transform_13(%arg0: i32) -> (i32, i32) {
    %c0_i32 = arith.constant 0 : i32
    %c0_i32_0 = arith.constant 0 : i32
    %c0_i32_1 = arith.constant 0 : i32
    return %c0_i32, %c0_i32_0 : i32, i32
  }
  func.func @transform_14(%arg0: i32) -> (i32, i32, i32) {
    %c0_i32 = arith.constant 0 : i32
    %c0_i32_0 = arith.constant 0 : i32
    %c0_i32_1 = arith.constant 0 : i32
    return %arg0, %c0_i32, %c0_i32_0 : i32, i32, i32
  }
  func.func @transform_15(%arg0: i32) -> (i32, i32, i32) {
    %c0_i32 = arith.constant 0 : i32
    %c0_i32_0 = arith.constant 0 : i32
    %c0_i32_1 = arith.constant 0 : i32
    return %arg0, %c0_i32, %c0_i32_0 : i32, i32, i32
  }
}

</mosaic_0001>

<bundles_post_ra>
// kernel: eq.1
= control target key start
LH: loop header
LB: loop body
LE: loop exit
PB: predicated region body
PF: predicated region fallthrough
CT: control target
= control target key end

     0   :  { %s7_s6 = smov 3  ;;  %s21_s9 = smov 3  ;;  %vm4_vm0 = vcmask 56320   ;;  %vm11_vm1 = vcmask 458120   ;;  %vm18_vm2 = vcmask 400720   ;;  %vm25_vm3 = vcmask 343320   ;;  %s119_s0 = inlined_call_operand.vmem [shape: s32[2,8,7], index: 0, kind: input, shape index: {}]   ;;  %s120_s1 = inlined_call_operand.vmem [shape: s32[2,56], index: 1, kind: output, shape index: {}]  }
   0x1   :  { %v61_v0 = vld [vmem:[%s119_s0 + $0x7] ss:$8 sm:%s7_s6]   ;;  %s75_s10 = smov 49   ;;  %v63_v1 = vld [vmem:[%s119_s0 + $0x5] ss:$8 sm:%s21_s9]   ;;  %s14_s13 = smov 3 }
   0x2   :  { %9 = vrot.lane.b32.xlu0 %v61_v0, %s75_s10  ;;  %s76_s14 = smov 35   ;;  %v62_v2 = vld [vmem:[%s119_s0 + $0x6] ss:$8 sm:%s14_s13]   ;;  %s28_s17 = smov 3  ;;  %vm32_vm4 = vcmask 285920   ;;  %vm39_vm5 = vcmask 228520  }
   0x3   :  { %23 = vrot.lane.b32.xlu1 %v63_v1, %s76_s14  ;;  %v64_v3 = vld [vmem:[%s119_s0 + $0x4] ss:$8 sm:%s28_s17]   ;;  %s35_s20 = smov 3  ;;  %s42_s21 = smov 3  ;;  %vm46_vm6 = vcmask 171120   ;;  %vm53_vm7 = vcmask 113720  }
   0x4   :  { %s77_s22 = smov 42   ;;  %s78_s23 = smov 28   ;;  %v65_v4 = vld [vmem:[%s119_s0 + $0x3] ss:$8 sm:%s35_s20]   ;;  %v66_v5 = vld [vmem:[%s119_s0 + $0x2] ss:$8 sm:%s42_s21]  }
   0x5   :  { %s2_s26 = smov 3  ;;  %s49_s29 = smov 3 }
   0x6   :  { %16 = vrot.lane.b32.xlu0 %v62_v2, %s77_s22  ;;  %v3_v6 = vld [vmem:[%s119_s0] ss:$8 sm:%s2_s26]   ;;  %s79_s3 = smov 21   ;;  %s80_s4 = smov 14  }
   0x7   :  { %30 = vrot.lane.b32.xlu1 %v64_v3, %s78_s23  ;;  %5 = vst.msk [vmem:[#allocation0] sm:$0x3] %vm4_vm0, %v3_v6   ;;  %v67_v7 = vld [vmem:[%s119_s0 + $0x1] ss:$8 sm:%s49_s29]   ;;  %s81_s0 = smov 7  }
   0xa   :  { %37 = vrot.lane.b32.xlu0 %v65_v4, %s79_s3 }
   0xb   :  { %44 = vrot.lane.b32.xlu1 %v66_v5, %s80_s4 }
   0xe   :  { %51 = vrot.lane.b32.xlu0 %v67_v7, %s81_s0 }
  0x74   :  { %v10_v8 = vpop.permute.xlu0 %9  }
  0x75   :  { %12 = vst.msk [vmem:[#allocation0] sm:$0x3] %vm11_vm1, %v10_v8   ;;  %v24_v9 = vpop.permute.xlu1 %23  }
  0x78   :  { %v17_v10 = vpop.permute.xlu0 %16  }
  0x79   :  { %19 = vst.msk [vmem:[#allocation0] sm:$0x3] %vm18_vm2, %v17_v10   ;;  %v31_v11 = vpop.permute.xlu1 %30  }
  0x7a   :  { %26 = vst.msk [vmem:[#allocation0] sm:$0x3] %vm25_vm3, %v24_v9  }
  0x7b   :  { %33 = vst.msk [vmem:[#allocation0] sm:$0x3] %vm32_vm4, %v31_v11  }
  0x7c   :  { %v38_v12 = vpop.permute.xlu0 %37  }
  0x7d   :  { %40 = vst.msk [vmem:[#allocation0] sm:$0x3] %vm39_vm5, %v38_v12   ;;  %v45_v13 = vpop.permute.xlu1 %44  }
  0x7e   :  { %47 = vst.msk [vmem:[#allocation0] sm:$0x3] %vm46_vm6, %v45_v13  }
  0x80   :  { %v52_v14 = vpop.permute.xlu0 %51  }
  0x81   :  { %54 = vst.msk [vmem:[#allocation0] sm:$0x3] %vm53_vm7, %v52_v14  }
  0x88   :  { %v58_v15 = vld [vmem:[#allocation0] sm:$0x3] }
  0x89   :  { %60 = vst [vmem:[%s120_s1] sm:$0x3] %v58_v15 }

// kernel: schnorb_interaction.1
= control target key start
LH: loop header
LB: loop body
LE: loop exit
PB: predicated region body
PF: predicated region fallthrough
CT: control target
= control target key end

     0   :  { %s5048_s0 = inlined_call_operand.vmem [shape: f32[2,56,21], index: 0, kind: input, shape index: {}]   ;;  %s5049_s1 = inlined_call_operand.vmem [shape: f32[2,8,32], index: 1, kind: input, shape index: {}]   ;;  %s5050_s2 = inlined_call_operand.vmem [shape: bf16[2,56,8], index: 2, kind: input, shape index: {}]   ;;  %s5051_s3 = inlined_call_operand.vmem [shape: bf16[2,56,8], index: 3, kind: input, shape index: {}]   ;;  %s5052_s4 = inlined_call_operand.vmem [shape: bf16[8,56], index: 4, kind: input, shape index: {}]   ;;  %s5053_s5 = inlined_call_operand.vmem [shape: bf16[32,32], index: 5, kind: input, shape index: {}]   ;;  %s5054_s6 = inlined_call_operand.vmem [shape: bf16[16,32], index: 6, kind: input, shape index: {}]   ;;  %s5055_s7 = inlined_call_operand.vmem [shape: bf16[32,32], index: 7, kind: input, shape index: {}]   ;;  %s5056_s8 = inlined_call_operand.vmem [shape: bf16[32,32], index: 8, kind: input, shape index: {}]   ;;  %s5057_s9 = inlined_call_operand.vmem [shape: bf16[32,32], index: 9, kind: input, shape index: {}]   ;;  %s5058_s10 = inlined_call_operand.vmem [shape: bf16[32,32], index: 10, kind: input, shape index: {}]   ;;  %s5059_s11 = inlined_call_operand.vmem [shape: bf16[32,64], index: 11, kind: input, shape index: {}]   ;;  %s5060_s12 = inlined_call_operand.vmem [shape: bf16[64,192], index: 12, kind: input, shape index: {}]   ;;  %s5061_s13 = inlined_call_operand.vmem [shape: f32[1,416], index: 13, kind: input, shape index: {}]   ;;  %s5062_s14 = inlined_call_operand.hbm [shape: f32[2,8,32], index: 14, kind: output, shape index: {0}]   ;;  %s5063_s15 = inlined_call_operand.vmem [shape: f32[2,56,96], index: 15, kind: output, shape index: {1}]  }
   0x1   :  { %5071 = sst [smem:[#allocation6_spill]] %s5048_s0 }
   0x2   :  { %5072 = sst [smem:[#allocation7_spill]] %s5049_s1 }
   0x3   :  { %5073 = sst [smem:[#allocation8_spill]] %s5050_s2 }
   0x4   :  { %5074 = sst [smem:[#allocation9_spill]] %s5054_s6 }
   0x5   :  { %21 = vsyncpa [#allocation3], 0 }
   0x6   :  { %23 = vsyncpa [#allocation3 + $0x1], 0  ;;  %s3791_s18 = smov 0   ;;  %s3793_s19 = smov 0  }
   0x7   :  { %s3795_s20 = smov 0   ;;  %s3797_s21 = smov 0  }
   0x8 LB: > { %s3812_s22 = sadd.s32 4294967295, %s3691_s21   ;;  %s3051_s23 = sadd.s32 4294967294, %s3691_s21   ;;  %s3691_s21 = sphi %s3797_s21, %s5103_s21   ;;  %s3687_s20 = sphi %s3795_s20, %s5102_s20   ;;  %s3683_s19 = sphi %s3793_s19, %s5101_s19   ;;  %s3679_s18 = sphi %s3791_s18, %s5100_s18  }
   0x9   : > { %s3816_s24 = sadd.s32 1, %s3691_s21   ;;  %s350_s25 = sadd.s32 1, %s3687_s20 }
   0xa   : > { %s347_s26 = ssub.s32 %s3691_s21, %s3816_s24  ;;  %p360_p0 = scmp.ne.s32.totalorder %s3687_s20, %s3683_s19 }
   0xb   : > { %p348_p1 = scmp.eq.s32.totalorder %s347_s26, 0  ;;  %p361_p2 = scmp.eq.s32.totalorder %s3812_s22, 1 }
   0xc   : > { %p366_p3 = scmp.ne.s32.totalorder %s3683_s19, %s3679_s18  ;;  %p367_p4 = scmp.eq.s32.totalorder %s3051_s23, 1 }
   0xd   : > { %s3827_s27 = scalar_select %p348_p1, %s3687_s20, %s350_s25  }
   0xe   : > { %p3829_p5 = por %p361_p2, %p360_p0  ;;  %p3833_p6 = por %p367_p4, %p366_p3 }
   0xf   : > { %5075 = sst [smem:[#allocation5_spill]] %s3827_s27  ;;  %p3054_p7 = scmp.ge.s32.totalorder %s3691_s21, 1 }
  0x10   : > { %p472_p8 = scmp.lt.s32.totalorder %s3691_s21, 3 }
  0x12   : > { %p473_p9 = pnand %p3054_p7, %p472_p8 }
  0x13   : > { %s5078_s6 = sld [smem:[#allocation9_spill]] (!%p473_p9)  ;;  %p539_p10 = scmp.lt.s32.totalorder (!%p473_p9), %s3812_s22, 1  ;;  %v3693_v1 = vmov (!%p473_p9), 0.0   ;;  %v3472_v2 = vld [vmem:[%s5053_s5] sm:$0xff] (!%p473_p9)   ;;  %vm1362_vm0 = vcmask (!%p473_p9), 130048   ;;  %v3473_v14 = vld [vmem:[%s5053_s5 + $0x8] sm:$0xff] (!%p473_p9)  }
  0x14   : > { %476 = sbr.rel (%p473_p9) target bundleno = 2106 (0x83a), region = 76  ;;  %s5079_s0 = sld [smem:[#allocation6_spill]] (!%p473_p9)  ;;  %vm3694_vm1 = vmmov (!%p473_p9), 0   ;;  %vm1532_vm2 = vcmask (!%p473_p9), 261120   ;;  %v3474_v18 = vld [vmem:[%s5055_s7] sm:$0xff] (!%p473_p9)   ;;  %v3475_v22 = vld [vmem:[%s5055_s7 + $0x8] sm:$0xff] (!%p473_p9)  }
  0x15   : > { %s5080_s1 = sld [smem:[#allocation7_spill]] (!%p473_p9)  ;;  %v3695_v34 = vmov (!%p473_p9), 2102212464   ;;  %v3696_v38 = vmov (!%p473_p9), 683565275   ;;  %s5081_s2 = sld [smem:[#allocation8_spill]] (!%p473_p9) }
  0x16   : > { %v3697_v40 = vmov (!%p473_p9), 2475754826   ;;  %v3698_v43 = vmov (!%p473_p9), 2131351028   ;;  %v3699_v50 = vmov (!%p473_p9), 920167782  }
  0x17   : > { %v3700_v56 = vmov (!%p473_p9), 1326507024   ;;  %s5066_s27 = smov (!%p473_p9), 96   ;;  %s5069_s26 = smov (!%p473_p9), 64  }
  0x18   : > { %s5096_s30 = smov (!%p473_p9), 32  }
  0x19   : > { %v3471_v0 = vld [vmem:[%s5078_s6] sm:$0xff] (!%p473_p9)  }
  0x1a   : > { %3225 = vmatprep.subr.bf16.mxu0 (!%p473_p9), %v3471_v0  ;;  %3327 = vmatprep.subr.bf16.mxu1 (!%p473_p9), %v3471_v0 }
  0x1b   : > { %s3844_s17 = scalar_select %p539_p10, %s3812_s22, 1  ;;  %3226 = vmatpush3.bf16.msra.mxu0 %v3471_v0  ;;  %3328 = vmatpush3.bf16.msra.mxu1 %v3471_v0 }
  0x1c   : > { %3247 = vmatprep.subr.bf16.mxu0 %v3693_v1  ;;  %3235 = vmatprep.subr.bf16.mxu1 %v3474_v18 }
  0x1d   : > { %s5064_s23 = smul.u32 56, %s3844_s17  ;;  %s3057_s25 = sshll.u32 %s3844_s17, 3 }
  0x1e   : > { %s5065_s6 = smul.u32 28, %s3844_s17 }
  0x1f   : > { %s3854_s16 = scalar_lea.vmem %s5079_s0, %s5064_s23  ;;  %s547_s23 = scalar_lea.vmem %s5080_s1, %s3057_s25 }
  0x20   : > { %v3860_v3 = vld [vmem:[%s3854_s16] sm:$0xff]  ;;  %v3863_v4 = vld [vmem:[%s3854_s16 + $0x8] sm:$0xff]  ;;  %v566_v8 = vld [vmem:[%s3854_s16 + $0x10] sm:$0xff]  ;;  %s3929_s25 = scalar_lea.vmem %s5081_s2, %s5065_s6  ;;  %s5094_s0 = smov 96  }
  0x21   : > { %v3866_v5 = vld [vmem:[%s3854_s16 + $0x20] sm:$0xff]  ;;  %v1343_v6 = vpack.c.bf16 %v3863_v4, %v3860_v3  ;;  %v3874_v7 = vld [vmem:[%s3854_s16 + $0x28] sm:$0xff]  ;;  %v3878_v9 = vld [vmem:[%s3854_s16 + $0x18] sm:$0xff]  ;;  %v3896_v17 = vmul.f32 0.62831855, %v3860_v3  ;;  %s5095_s6 = smov 64  }
  0x22   : > { %v1345_v10 = vpack.c.bf16 %v3874_v7, %v3866_v5  ;;  %v1344_v11 = vpack.c.bf16 %v3878_v9, %v566_v8  ;;  %v570_v12 = vld [vmem:[%s3854_s16 + $0x30] sm:$0xff]  ;;  %v571_v15 = vld [vmem:[%s547_s23] sm:$0xff]  ;;  %v3903_v21 = vmul.f32 0.62831855, %v3863_v4  ;;  %v3909_v32 = vmul.f32 0.62831855, %v566_v8 }
  0x23   : > { %3227 = vmatprep.mubr.msk.bf16.mxu0 %vm1362_vm0, %v1343_v6  ;;  %v1346_v13 = vpack.c.bf16 %v570_v12, %v570_v12  ;;  %v1651_v16 = vpack.c.bf16 %v571_v15, %v571_v15  ;;  %v604_v19 = vand.u32 2139095040, %v3896_v17  ;;  %v601_v33 = vand.u32 2147483647, %v3896_v17 }
  0x24   : > { %3231 = vmatprep.mubr.msk.bf16.mxu1 %vm1362_vm0, %v1345_v10  ;;  %3228 = vmatmul.mubr.msk.bf16.vlgmr.msra.gmra.mrb[0].mxu0 %vm1362_vm0, %v1344_v11  ;;  %v707_v24 = vand.u32 2139095040, %v3903_v21  ;;  %v810_v46 = vand.u32 2139095040, %v3909_v32 }
  0x25   : > { %3232 = vmatmul.mubr.msk.bf16.vlgmr.msra.gmra.mrb[0].mxu1 %vm1362_vm0, %v1346_v13  ;;  %3248 = vmatpush3.bf16.msra.mxu0 %v3472_v2  ;;  %v605_v20 = vshrl.u32 %v604_v19, 23  ;;  %v608_v36 = vand.u32 8388607, %v601_v33 }
  0x26   : > { %3249 = vmatprep.subr.bf16.mxu0 %v3693_v1  ;;  %3251 = vmatprep.mubr.msk.bf16.mxu0 %vm3694_vm1, %v3693_v1  ;;  %v708_v26 = vshrl.u32 %v707_v24, 23  ;;  %v811_v15 = vshrl.u32 %v810_v46, 23 }
  0x27   : > { %3236 = vmatpush3.bf16.msra.mxu1 %v3474_v18  ;;  %v3061_v23 = vadd.s32 4294967169, %v605_v20  ;;  %v609_v47 = vor.u32 8388608, %v608_v36 }
  0x28   : > { %3237 = vmatprep.subr.bf16.mxu1 %v3475_v22  ;;  %v3065_v27 = vadd.s32 4294967169, %v708_v26 }
  0x29   : > { %3250 = vmatpush3.bf16.msra.mxu0 %v3473_v14  ;;  %v611_v25 = vadd.s32 1, %v3061_v23  ;;  %v649_v62 = vshll.u32 %v609_v47, 8  ;;  %v704_v14 = vand.u32 2147483647, %v3903_v21 }
  0x2a   : > { %v714_v31 = vadd.s32 1, %v3065_v27 }
  0x2b   : > { %3238 = vmatpush3.bf16.msra.mxu1 %v3475_v22  ;;  %vm612_vm3 = vcmp.gt.s32.totalorder %v611_v25, 0 }
  0x2c   : > { %3252 = vmatmul.mubr.msk.bf16.vlgmr.msra.gmra.mrb[4].mxu0 %vm1532_vm2, %v1651_v16  ;;  %v613_v28 = vsel %vm612_vm3, %v611_v25, 0  ;;  %vm715_vm5 = vcmp.gt.s32.totalorder %v714_v31, 0  ;;  %v3069_v25 = vadd.s32 4294967169, %v811_v15 }
  0x2d   : > { %v615_v29 = vand.u32 31, %v613_v28  ;;  %v614_v37 = vshrl.u32 %v613_v28, 5  ;;  %v716_v23 = vsel %vm715_vm5, %v714_v31, 0  ;;  %v711_v28 = vand.u32 8388607, %v704_v14 }
  0x2e   : > { %v718_v24 = vand.u32 31, %v716_v23 }
  0x2f   : > { %v616_v30 = vsub.s32 32, %v615_v29  ;;  %v627_v35 = vshll.u32 %v3695_v34, %v615_v29  ;;  %v618_v39 = vshll.u32 %v3696_v38, %v615_v29  ;;  %v621_v42 = vshll.u32 %v3697_v40, %v615_v29 }
  0x30   : > { %v624_v45 = vshll.u32 %v3698_v43, %v615_v29  ;;  %v630_v53 = vshll.u32 %v3699_v50, %v615_v29  ;;  %vm633_vm4 = vcmp.lt.s32.totalorder %v614_v37, 1  ;;  %vm634_vm6 = vcmp.lt.s32.totalorder %v614_v37, 2 }
  0x31   : > { %v619_v41 = vshrl.u32 %v3697_v40, %v616_v30  ;;  %v622_v44 = vshrl.u32 %v3698_v43, %v616_v30  ;;  %v625_v49 = vshrl.u32 %v3695_v34, %v616_v30  ;;  %v628_v51 = vshrl.u32 %v3699_v50, %v616_v30 }
  0x32   : > { %v631_v57 = vshrl.u32 %v3700_v56, %v616_v30  ;;  %vm635_vm7 = vcmp.lt.s32.totalorder %v614_v37, 3  ;;  %v617_v60 = vshrl.u32 %v3696_v38, %v616_v30  ;;  %vm636_vm8 = vcmp.lt.s32.totalorder %v614_v37, 4 }
  0x33   : > { %v620_v48 = vor.u32 %v619_v41, %v618_v39  ;;  %v623_v52 = vor.u32 %v622_v44, %v621_v42  ;;  %v626_v54 = vor.u32 %v625_v49, %v624_v45  ;;  %v629_v55 = vor.u32 %v628_v51, %v627_v35 }
  0x34   : > { %v632_v58 = vor.u32 %v631_v57, %v630_v53  ;;  %v719_v29 = vsub.s32 32, %v718_v24  ;;  %v3955_v30 = vmul.f32 0.62831855, %v3878_v9  ;;  %v717_v35 = vshrl.u32 %v716_v23, 5 }
  0x35   : > { %v641_v59 = vsel %vm633_vm4, %v620_v48, %v623_v52  ;;  %v645_v61 = vsel %vm633_vm4, %v623_v52, %v626_v54  ;;  %v638_v63 = vsel %vm636_vm8, %v626_v54, 2102212464  ;;  %v642_v0 = vsel %vm636_vm8, %v629_v55, 920167782 }
  0x36   : > { %v646_v2 = vsel %vm636_vm8, %v632_v58, 1326507024  ;;  %v637_v6 = vsel %vm633_vm4, %v617_v60, %v620_v48  ;;  %v639_v8 = vsel %vm635_vm7, %v623_v52, %v638_v63  ;;  %v643_v10 = vsel %vm635_vm7, %v626_v54, %v642_v0 }
  0x37   : > { %v647_v11 = vsel %vm635_vm7, %v629_v55, %v646_v2  ;;  %v644_v12 = vsel %vm634_vm6, %v641_v59, %v643_v10  ;;  %v640_v22 = vsel %vm634_vm6, %v637_v6, %v639_v8  ;;  %v721_v36 = vshll.u32 %v3696_v38, %v718_v24 }
  0x38   : > { %v648_v13 = vsel %vm634_vm6, %v645_v61, %v647_v11  ;;  %v3943_v19 = vmul.u32.u64.low %v649_v62, %v644_v12  ;;  %v3944_v20 = vmul.u32.u64.high %v649_v62, %v644_v12, %v3943_v19  ;;  %v656_v26 = vmul.u32 %v649_v62, %v640_v22 }
  0x39   : > { %v3940_v16 = vmul.u32.u64.low %v649_v62, %v648_v13  ;;  %v3941_v18 = vmul.u32.u64.high %v649_v62, %v648_v13, %v3940_v16  ;;  %v724_v31 = vshll.u32 %v3697_v40, %v718_v24  ;;  %v3701_v37 = vmov 16  }
  0x3a   : > { %v659_v27 = vadd.s32 1, %v3944_v20  ;;  %3419 = vset.pattern.permute.xlu0 %v3701_v37  ;;  %v727_v41 = vshll.u32 %v3698_v43, %v718_v24  ;;  %v730_v42 = vshll.u32 %v3695_v34, %v718_v24  ;;  %3420 = vset.pattern.permute.xlu1 %v3701_v37  ;;  %v817_v44 = vadd.s32 1, %v3069_v25 }
  0x3b   : > { %vm658_vm9 = vc.u32 %v3941_v18, %v3943_v19  ;;  %v712_v46 = vor.u32 8388608, %v711_v28  ;;  %v720_v9 = vshrl.u32 %v3696_v38, %v719_v29  ;;  %v733_v47 = vshll.u32 %v3699_v50, %v718_v24 }
  0x3c   : > { %v660_v39 = vsel %vm658_vm9, %v659_v27, %v3944_v20  ;;  %v722_v48 = vshrl.u32 %v3697_v40, %v719_v29  ;;  %v725_v49 = vshrl.u32 %v3698_v43, %v719_v29  ;;  %v728_v51 = vshrl.u32 %v3695_v34, %v719_v29 }
  0x3d   : > { %v661_v45 = vadd.s32 %v660_v39, %v656_v26  ;;  %v731_v52 = vshrl.u32 %v3699_v50, %v719_v29  ;;  %v734_v54 = vshrl.u32 %v3700_v56, %v719_v29  ;;  %vm736_vm10 = vcmp.lt.s32.totalorder %v717_v35, 1 }
  0x3e   : > { %vm737_vm11 = vcmp.lt.s32.totalorder %v717_v35, 2  ;;  %v723_v55 = vor.u32 %v722_v48, %v721_v36  ;;  %v726_v57 = vor.u32 %v725_v49, %v724_v31  ;;  %v729_v58 = vor.u32 %v728_v51, %v727_v41 }
  0x3f   : > { %v662_v53 = vadd.s32 536870912, %v661_v45  ;;  %v732_v59 = vor.u32 %v731_v52, %v730_v42  ;;  %v735_v61 = vor.u32 %v734_v54, %v733_v47  ;;  %vm738_vm12 = vcmp.lt.s32.totalorder %v717_v35, 3 }
  0x40   : > { %vm739_vm13 = vcmp.lt.s32.totalorder %v717_v35, 4  ;;  %v744_v63 = vsel %vm736_vm10, %v723_v55, %v726_v57  ;;  %v752_v2 = vshll.u32 %v712_v46, 8  ;;  %v740_v8 = vsel %vm736_vm10, %v720_v9, %v723_v55 }
  0x41   : > { %v3969_v60 = vshrl.u32 %v662_v53, 30  ;;  %v741_v62 = vsel %vm739_vm13, %v729_v58, 2102212464  ;;  %v745_v0 = vsel %vm739_vm13, %v732_v59, 920167782  ;;  %v748_v13 = vsel %vm736_vm10, %v726_v57, %v729_v58 }
  0x42   : > { %v742_v10 = vsel %vm738_vm12, %v726_v57, %v741_v62  ;;  %v746_v11 = vsel %vm738_vm12, %v729_v58, %v745_v0  ;;  %v749_v15 = vsel %vm739_vm13, %v735_v61, 1326507024  ;;  %vm818_vm14 = vcmp.gt.s32.totalorder %v817_v44, 0 }
  0x43   : > { %v664_v6 = vshll.u32 %v3969_v60, 30  ;;  %v747_v12 = vsel %vm737_vm11, %v744_v63, %v746_v11  ;;  %v750_v20 = vsel %vm738_vm12, %v732_v59, %v749_v15  ;;  %v913_v22 = vand.u32 2139095040, %v3955_v30 }
  0x44   : > { %v743_v23 = vsel %vm737_vm11, %v740_v8, %v742_v10  ;;  %v751_v24 = vsel %vm737_vm11, %v748_v13, %v750_v20  ;;  %v3979_v25 = vmul.u32.u64.low %v752_v2, %v747_v12  ;;  %v3980_v26 = vmul.u32.u64.high %v752_v2, %v747_v12, %v3979_v25 }
  0x45   : > { %v665_v16 = vsub.s32 %v661_v45, %v664_v6  ;;  %v3983_v28 = vmul.u32.u64.low %v752_v2, %v751_v24  ;;  %v3984_v29 = vmul.u32.u64.high %v752_v2, %v751_v24, %v3983_v28  ;;  %v819_v36 = vsel %vm818_vm14, %v817_v44, 0 }
  0x46   : > { %v807_v31 = vand.u32 2147483647, %v3909_v32  ;;  %v759_v39 = vmul.u32 %v752_v2, %v743_v23  ;;  %v762_v41 = vadd.s32 1, %v3980_v26  ;;  %v821_v42 = vand.u32 31, %v819_v36 }
  0x47   : > { %v667_v27 = vsub.s32 0, %v665_v16  ;;  %vm761_vm15 = vc.u32 %v3984_v29, %v3979_v25  ;;  %v914_v35 = vshrl.u32 %v913_v22, 23  ;;  %v657_v46 = vadd.s32 %v3943_v19, %v3941_v18 }
  0x48   : > { %v763_v9 = vsel %vm761_vm15, %v762_v41, %v3980_v26  ;;  %v814_v44 = vand.u32 8388607, %v807_v31  ;;  %v822_v47 = vsub.s32 32, %v821_v42  ;;  %v687_v49 = vsub.s32 4, %v3969_v60 }
  0x49   : > { %v3062_v37 = vmin.u32 %v667_v27, %v665_v16  ;;  %v764_v51 = vadd.s32 %v763_v9, %v759_v39  ;;  %v820_v52 = vshrl.u32 %v819_v36, 5  ;;  %v824_v53 = vshll.u32 %v3696_v38, %v821_v42 }
  0x4a   : > { %v825_v54 = vshrl.u32 %v3697_v40, %v822_v47  ;;  %v827_v55 = vshll.u32 %v3697_v40, %v821_v42  ;;  %v833_v57 = vshll.u32 %v3695_v34, %v821_v42  ;;  %v828_v19 = vshrl.u32 %v3698_v43, %v822_v47 }
  0x4b   : > { %v669_v45 = vclz %v3062_v37  ;;  %v765_v18 = vadd.s32 536870912, %v764_v51  ;;  %v834_v58 = vshrl.u32 %v3699_v50, %v822_v47  ;;  %v830_v61 = vshll.u32 %v3698_v43, %v821_v42 }
  0x4c   : > { %v831_v62 = vshrl.u32 %v3695_v34, %v822_v47  ;;  %v836_v63 = vshll.u32 %v3699_v50, %v821_v42  ;;  %v823_v10 = vshrl.u32 %v3696_v38, %v822_v47  ;;  %v826_v11 = vor.u32 %v825_v54, %v824_v53 }
  0x4d   : > { %v3063_v48 = vadd.s32 4294967294, %v669_v45  ;;  %v4005_v8 = vshrl.u32 %v765_v18, 30  ;;  %v835_v12 = vor.u32 %v834_v58, %v833_v57  ;;  %v837_v13 = vshrl.u32 %v3700_v56, %v822_v47 }
  0x4e   : > { %v829_v23 = vor.u32 %v828_v19, %v827_v55  ;;  %v832_v24 = vor.u32 %v831_v62, %v830_v61  ;;  %vm839_vm3 = vcmp.lt.s32.totalorder %v820_v52, 1  ;;  %vm842_vm4 = vcmp.lt.s32.totalorder %v820_v52, 4 }
  0x4f   : > { %vm3064_vm0 = vcmp.lt.s32.totalorder %v3063_v48, 0  ;;  %v767_v22 = vshll.u32 %v4005_v8, 30  ;;  %v838_v26 = vor.u32 %v837_v13, %v836_v63  ;;  %vm841_vm5 = vcmp.lt.s32.totalorder %v820_v52, 3 }
  0x50   : > { %v672_v59 = vsel %vm3064_vm0, 0, %v3063_v48  ;;  %v815_v36 = vor.u32 8388608, %v814_v44  ;;  %vm840_vm6 = vcmp.lt.s32.totalorder %v820_v52, 2  ;;  %v844_v37 = vsel %vm842_vm4, %v832_v24, 2102212464 }
  0x51   : > { %v673_v0 = vsub.s32 32, %v672_v59  ;;  %v674_v2 = vshll.u32 %v665_v16, %v672_v59  ;;  %v677_v6 = vsub.s32 4294967266, %v672_v59  ;;  %v768_v28 = vsub.s32 %v764_v51, %v767_v22 }
  0x52   : > { %v848_v39 = vsel %vm842_vm4, %v835_v12, 920167782  ;;  %vm603_vm7 = vcmp.lt.s32.totalorder %v3896_v17, 0  ;;  %v851_v47 = vsel %vm839_vm3, %v829_v23, %v832_v24  ;;  %v852_v48 = vsel %vm842_vm4, %v838_v26, 1326507024 }
  0x53   : > { %v675_v15 = vshrl.u32 %v657_v46, %v673_v0  ;;  %v678_v20 = vadd.s32 127, %v677_v6  ;;  %v770_v45 = vsub.s32 0, %v768_v28  ;;  %v847_v46 = vsel %vm839_vm3, %v826_v11, %v829_v23 }
  0x54   : > { %v849_v9 = vsel %vm841_vm5, %v832_v24, %v848_v39  ;;  %v843_v53 = vsel %vm839_vm3, %v823_v10, %v826_v11  ;;  %v845_v54 = vsel %vm841_vm5, %v829_v23, %v844_v37  ;;  %v688_v55 = vsel %vm603_vm7, %v687_v49, %v3969_v60 }
  0x55   : > { %v676_v27 = vor.u32 %v675_v15, %v674_v2  ;;  %v679_v16 = vshll.u32 %v678_v20, 23  ;;  %v3066_v44 = vmin.u32 %v770_v45, %v768_v28  ;;  %v850_v57 = vsel %vm840_vm6, %v847_v46, %v849_v9 }
  0x56   : > { %v853_v18 = vsel %vm841_vm5, %v835_v12, %v852_v48  ;;  %v3073_v19 = vadd.s32 4294967169, %v914_v35  ;;  %v855_v62 = vshll.u32 %v815_v36, 8  ;;  %vm4027_vm8 = vcmp.le.f32.partialorder %v601_v33, 0.7853982 }
  0x57   : > { %v680_v41 = vor.u32 4788187, %v679_v16  ;;  %v683_v42 = vcvt.s32.f32 %v676_v27  ;;  %v772_v59 = vclz %v3066_v44  ;;  %v854_v61 = vsel %vm840_vm6, %v851_v47, %v853_v18 }
  0x58   : > { %v846_v0 = vsel %vm840_vm6, %v843_v53, %v845_v54  ;;  %v4032_v49 = vmul.u32.u64.low %v855_v62, %v854_v61  ;;  %v4033_v6 = vmul.u32.u64.high %v855_v62, %v854_v61, %v4032_v49  ;;  %v690_v35 = vsel %vm4027_vm8, 0, %v688_v55 }
  0x59   : > { %v681_v51 = vand.u32 2147483647, %v680_v41  ;;  %v3067_v60 = vadd.s32 4294967294, %v772_v59  ;;  %v4037_v10 = vmul.u32.u64.low %v855_v62, %v850_v57  ;;  %v4038_v11 = vmul.u32.u64.high %v855_v62, %v850_v57, %v4037_v10 }
  0x5a   : > { %v910_v12 = vand.u32 2147483647, %v3955_v30  ;;  %v760_v52 = vadd.s32 %v3979_v25, %v3984_v29  ;;  %v920_v13 = vadd.s32 1, %v3073_v19  ;;  %v790_v22 = vsub.s32 4, %v4005_v8 }
  0x5b   : > { %v684_v58 = vmul.f32 %v683_v42, %v681_v51  ;;  %vm3068_vm9 = vcmp.lt.s32.totalorder %v3067_v60, 0  ;;  %v862_v23 = vmul.u32 %v855_v62, %v846_v0  ;;  %vm864_vm10 = vc.u32 %v4033_v6, %v4037_v10 }
  0x5c   : > { %v775_v20 = vsel %vm3068_vm9, 0, %v3067_v60  ;;  %v865_v16 = vadd.s32 1, %v4038_v11  ;;  %v917_v25 = vand.u32 8388607, %v910_v12  ;;  %vm706_vm11 = vcmp.lt.s32.totalorder %v3903_v21, 0 }
  0x5d   : > { %v685_v2 = vxor.u32 2147483648, %v684_v58  ;;  %v776_v24 = vsub.s32 32, %v775_v20  ;;  %v777_v26 = vshll.u32 %v768_v28, %v775_v20  ;;  %v780_v27 = vsub.s32 4294967266, %v775_v20 }
  0x5e   : > { %vm921_vm12 = vcmp.gt.s32.totalorder %v920_v13, 0  ;;  %v791_v37 = vsel %vm706_vm11, %v790_v22, %v4005_v8  ;;  %v866_v28 = vsel %vm864_vm10, %v865_v16, %v4038_v11  ;;  %v694_v41 = vand.u32 3, %v690_v35 }
  0x5f   : > { %v686_v33 = vsel %vm603_vm7, %v685_v2, %v684_v58  ;;  %v778_v29 = vshrl.u32 %v760_v52, %v776_v24  ;;  %v781_v36 = vadd.s32 127, %v780_v27  ;;  %v922_v39 = vsel %vm921_vm12, %v920_v13, 0 }
  0x60   : > { %v689_v15 = vsel %vm4027_vm8, %v3896_v17, %v686_v33  ;;  %v867_v46 = vadd.s32 %v866_v28, %v862_v23  ;;  %vm4060_vm13 = vcmp.le.f32.partialorder %v704_v14, 0.7853982  ;;  %v918_v47 = vor.u32 8388608, %v917_v25  ;;  %v4108_v25 = vld [vmem:[%s5061_s13] ss:$0 sm:$0xff] }
  0x61   : > { %3504 = vcosq.f32 %v689_v15  ;;  %v779_v42 = vor.u32 %v778_v29, %v777_v26  ;;  %v782_v45 = vshll.u32 %v781_v36, 23  ;;  %v924_v48 = vand.u32 31, %v922_v39 }
  0x62   : > { %3506 = vsinq.f32 %v689_v15  ;;  %v793_v8 = vsel %vm4060_vm13, 0, %v791_v37  ;;  %v868_v53 = vadd.s32 536870912, %v867_v46  ;;  %vm693_vm14 = vweird.f32 %v3896_v17 }
  0x63   : > { %v783_v51 = vor.u32 4788187, %v782_v45  ;;  %v786_v44 = vcvt.s32.f32 %v779_v42  ;;  %vm695_vm15 = vcmp.lt.s32.totalorder %v694_v41, 2  ;;  %vm696_vm0 = vcmp.eq.s32.totalorder %v694_v41, 0 }
  0x64   : > { %v4067_v55 = vshrl.u32 %v868_v53, 30  ;;  %vm699_vm3 = vcmp.eq.s32.totalorder %v694_v41, 2  ;;  %v4069_v14 = vand.u32 3, %v793_v8  ;;  %v925_v57 = vsub.s32 32, %v924_v48 }
  0x65   : > { %v784_v54 = vand.u32 2147483647, %v783_v51  ;;  %v4071_v18 = vshll.u32 %v918_v47, 8  ;;  %v4074_v59 = vadd.s32 %v4037_v10, %v4033_v6  ;;  %v4078_v62 = vmul.f32 0.62831855, %v3866_v5 }
  0x66   : > { %v870_v61 = vshll.u32 %v4067_v55, 30  ;;  %v4080_v2 = vshrl.u32 %v922_v39, 5  ;;  %v927_v60 = vshll.u32 %v3696_v38, %v924_v48  ;;  %v930_v49 = vshll.u32 %v3697_v40, %v924_v48 }
  0x67   : > { %v787_v58 = vmul.f32 %v786_v44, %v784_v54  ;;  %v933_v6 = vshll.u32 %v3698_v43, %v924_v48  ;;  %v928_v52 = vshrl.u32 %v3697_v40, %v925_v57  ;;  %v936_v5 = vshll.u32 %v3695_v34, %v924_v48 }
  0x68   : > { %v4084_v33 = vsub.s32 %v867_v46, %v870_v61  ;;  %v4091_v13 = vshll.u32 %v3699_v50, %v924_v48  ;;  %vm587_vm4 = vcmp.lt.f32.partialorder %v3860_v3, 5.0  ;;  %v931_v23 = vshrl.u32 %v3698_v43, %v925_v57 }
  0x69   : > { %v788_v11 = vxor.u32 2147483648, %v787_v58  ;;  %v934_v27 = vshrl.u32 %v3695_v34, %v925_v57  ;;  %v937_v16 = vshrl.u32 %v3699_v50, %v925_v57  ;;  %v4114_v37 = vshrl.u32 %v3700_v56, %v925_v57 }
  0x6a   : > { %v873_v22 = vsub.s32 0, %v4084_v33  ;;  %v1013_v39 = vand.u32 2147483647, %v4078_v62  ;;  %v1016_v41 = vand.u32 2139095040, %v4078_v62  ;;  %v893_v45 = vsub.s32 4, %v4067_v55 }
  0x6b   : > { %v3505_v19 = vpop.eup %3504  ;;  %v789_v20 = vsel %vm706_vm11, %v788_v11, %v787_v58  ;;  %v926_v46 = vshrl.u32 %v3696_v38, %v925_v57  ;;  %v4120_v9 = vor.u32 %v928_v52, %v927_v60  ;;  %vm942_vm5 = vcmp.lt.s32.totalorder %v4080_v2, 1 }
  0x6c   : > { %v3507_v63 = vpop.eup %3506  ;;  %v700_v0 = vxor.u32 2147483648, %v3505_v19  ;;  %v792_v26 = vsel %vm4060_vm13, %v3903_v21, %v789_v20  ;;  %v3070_v36 = vmin.u32 %v873_v22, %v4084_v33  ;;  %vm1743_vm6 = vcmask 1043456  }
  0x6d   : > { %v697_v35 = vxor.u32 2147483648, %v3507_v63  ;;  %3508 = vcosq.f32 %v792_v26  ;;  %v4126_v51 = vor.u32 %v931_v23, %v930_v49  ;;  %v4128_v44 = vor.u32 %v934_v27, %v933_v6 }
  0x6e   : > { %v701_v10 = vsel %vm699_vm3, %v700_v0, %v3507_v63  ;;  %3510 = vsinq.f32 %v792_v26  ;;  %v4130_v8 = vor.u32 %v937_v16, %v936_v5  ;;  %vm799_vm7 = vcmp.eq.s32.totalorder %v4069_v14, 0 }
  0x6f   : > { %v698_v15 = vsel %vm696_vm0, %v3505_v19, %v697_v35  ;;  %vm802_vm8 = vcmp.eq.s32.totalorder %v4069_v14, 2  ;;  %v875_v58 = vclz %v3070_v36  ;;  %v941_v61 = vor.u32 %v4114_v37, %v4091_v13 }
  0x70   : > { %v702_v24 = vsel %vm695_vm15, %v698_v15, %v701_v10  ;;  %vm798_vm9 = vcmp.lt.s32.totalorder %v4069_v14, 2  ;;  %vm796_vm10 = vweird.f32 %v3903_v21  ;;  %vm944_vm11 = vcmp.lt.s32.totalorder %v4080_v2, 3 }
  0x71   : > { %v703_v29 = vsel %vm693_vm14, nan, %v702_v24  ;;  %vm945_vm12 = vcmp.lt.s32.totalorder %v4080_v2, 4  ;;  %vm943_vm13 = vcmp.lt.s32.totalorder %v4080_v2, 2  ;;  %v946_v20 = vsel %vm942_vm5, %v926_v46, %v4120_v9 }
  0x72   : > { %v1322_v28 = vadd.f32 1.0, %v703_v29  ;;  %v947_v22 = vsel %vm945_vm12, %v4128_v44, 2102212464  ;;  %vm588_vm14 = vcmp.lt.f32.partialorder %v3863_v4, 5.0  ;;  %vm809_vm15 = vcmp.lt.s32.totalorder %v3909_v32, 0 }
  0x73   : > { %v954_v21 = vsel %vm942_vm5, %v4126_v51, %v4128_v44  ;;  %vm4243_vm3 = vcmp.le.f32.partialorder %v807_v31, 0.7853982 }
  0x74   : > { %v1329_v11 = vmul.f32 0.5, %v1322_v28 }
  0x76   : > { %v1336_v28 = vsel %vm587_vm4, %v1329_v11, 0.0 }
  0x77   : > { %1611 = vperm.xlu0 %3419, %v1336_v28  }
  0xf7   : > { %v3229_v42 = vpop.f32.mrb[0].mxu0 }
  0xf8   : > { %v4124_v17 = vadd.f32 %v3229_v42, %v4108_v25  ;;  %v3233_v47 = vpop.f32.mrb[0].mxu1  ;;  %v1409_v48 = vpop.f32.mrb[1].mxu0 }
  0xf9   : > { %v4133_v53 = vadd.f32 %v3233_v47, %v4108_v25  ;;  %v4136_v54 = vadd.f32 %v4108_v25, %v1409_v48  ;;  %v1425_v57 = vpop.f32.mrb[1].mxu1  ;;  %v3230_v19 = vpop.f32.mrb[2].mxu0 }
  0xfa   : > { %v1448_v63 = vand.u32 2147483647, %v4124_v17  ;;  %v4144_v0 = vadd.f32 %v4108_v25, %v1425_v57  ;;  %v4147_v60 = vadd.f32 %v3230_v19, %v4108_v25  ;;  %v3234_v49 = vpop.f32.mrb[2].mxu1  ;;  %v1412_v35 = vpop.f32.mrb[3].mxu0  ;;  %v3071_v57 = vadd.s32 4294967294, %v875_v58 }
  0xfb   : > { %v1452_v6 = vand.u32 2147483647, %v4133_v53  ;;  %v1446_v10 = vand.u32 2147483647, %v4136_v54  ;;  %v1428_v15 = vpop.f32.mrb[3].mxu1  ;;  %v4165_v27 = vadd.f32 %v4108_v25, %v1412_v35  ;;  %v3509_v42 = vpop.eup %3508 }
  0xfc   : > { %v1455_v52 = vsub.f32 0.0, %v1448_v63  ;;  %v1450_v5 = vand.u32 2147483647, %v4144_v0  ;;  %v1449_v26 = vand.u32 2147483647, %v4147_v60  ;;  %v4168_v36 = vadd.f32 %v4108_v25, %v1428_v15  ;;  %v3511_v19 = vpop.eup %3510 }
  0xfd   : > { %v1459_v23 = vsub.f32 0.0, %v1452_v6  ;;  %v1453_v24 = vsub.f32 0.0, %v1446_v10  ;;  %v1447_v49 = vand.u32 2147483647, %v4165_v27  ;;  %v948_v6 = vsel %vm944_vm11, %v4126_v51, %v947_v22 }
  0xfe   : > { %v1464_v16 = vmul.f32 1.442695, %v1455_v52  ;;  %v1457_v29 = vsub.f32 0.0, %v1450_v5  ;;  %v1456_v48 = vsub.f32 0.0, %v1449_v26  ;;  %v1451_v11 = vand.u32 2147483647, %v4168_v36 }
  0xff   : > { %v1472_v46 = vmul.f32 1.442695, %v1459_v23  ;;  %v1460_v47 = vmul.f32 1.442695, %v1453_v24  ;;  %v1705_v35 = vpop.f32.mrb[4].mxu0  ;;  %v1454_v58 = vsub.f32 0.0, %v1447_v49  ;;  %v950_v22 = vsel %vm942_vm5, %v4120_v9, %v4126_v51 }
 0x100   : > { %3512 = vpow2.f32 %v1464_v16  ;;  %v1468_v63 = vmul.f32 1.442695, %v1457_v29  ;;  %v1466_v3 = vmul.f32 1.442695, %v1456_v48  ;;  %v4178_v10 = vpack.c.bf16 %v1705_v35, %v1705_v35  ;;  %v3253_v52 = vpop.f32.mrb[5].mxu0 }
 0x101   : > { %3514 = vpow2.f32 %v1472_v46  ;;  %v1708_v5 = vpop.f32.mrb[6].mxu0  ;;  %v800_v15 = vxor.u32 2147483648, %v3511_v19  ;;  %v803_v23 = vxor.u32 2147483648, %v3509_v42  ;;  %v1458_v24 = vsub.f32 0.0, %v1451_v11 }
 0x102   : > { %3516 = vpow2.f32 %v1460_v47  ;;  %v3254_v26 = vpop.f32.mrb[7].mxu0  ;;  %3329 = vmatprep.subr.msk.bf16.mxu1 %vm1743_vm6, %v4178_v10  ;;  %vm3072_vm0 = vcmp.lt.s32.totalorder %v3071_v57, 0  ;;  %v1462_v16 = vmul.f32 1.442695, %v1454_v58 }
 0x103   : > { %3518 = vpow2.f32 %v1468_v63  ;;  %v801_v29 = vsel %vm799_vm7, %v3509_v42, %v800_v15  ;;  %v804_v28 = vsel %vm802_vm8, %v803_v23, %v3511_v19  ;;  %v1470_v46 = vmul.f32 1.442695, %v1458_v24 }
 0x104   : > { %3520 = vpow2.f32 %v1466_v3  ;;  %v805_v47 = vsel %vm798_vm9, %v801_v29, %v804_v28  ;;  %v878_v48 = vsel %vm3072_vm0, 0, %v3071_v57  ;;  %v949_v63 = vsel %vm943_vm13, %v946_v20, %v948_v6 }
 0x105   : > { %3522 = vpow2.f32 %v1462_v16  ;;  %v806_v9 = vsel %vm796_vm10, nan, %v805_v47  ;;  %v879_v49 = vsub.s32 32, %v878_v48  ;;  %v880_v35 = vshll.u32 %v4084_v33, %v878_v48 }
 0x106   : > { %3524 = vpow2.f32 %v1470_v46  ;;  %v1323_v42 = vadd.f32 1.0, %v806_v9  ;;  %v883_v3 = vsub.s32 4294967266, %v878_v48  ;;  %v951_v19 = vsel %vm945_vm12, %v4130_v8, 920167782 }
 0x107   : > { %v881_v14 = vshrl.u32 %v4074_v59, %v879_v49  ;;  %v952_v20 = vsel %vm944_vm11, %v4128_v44, %v951_v19  ;;  %v955_v33 = vsel %vm945_vm12, %v941_v61, 1326507024  ;;  %vm899_vm10 = vweird.f32 %v3909_v32 }
 0x108   : > { %v1330_v57 = vmul.f32 0.5, %v1323_v42  ;;  %v884_v6 = vadd.s32 127, %v883_v3  ;;  %v953_v59 = vsel %vm943_vm13, %v950_v22, %v952_v20  ;;  %v956_v11 = vsel %vm944_vm11, %v4130_v8, %v955_v33 }
 0x109   : > { %v882_v58 = vor.u32 %v881_v14, %v880_v35  ;;  %v957_v51 = vsel %vm943_vm13, %v954_v21, %v956_v11  ;;  %v4222_v44 = vmul.u32.u64.low %v4071_v18, %v953_v59  ;;  %v4223_v13 = vmul.u32.u64.high %v4071_v18, %v953_v59, %v4222_v44 }
 0x10a   : > { %v3513_v52 = vpop.eup %3512  ;;  %v1337_v5 = vsel %vm588_vm14, %v1330_v57, 0.0  ;;  %v885_v15 = vshll.u32 %v884_v6, 23  ;;  %v894_v8 = vsel %vm809_vm15, %v893_v45, %v4067_v55  ;;  %v965_v22 = vmul.u32 %v4071_v18, %v949_v63 }
 0x10b   : > { %v3515_v37 = vpop.eup %3514  ;;  %v1476_v61 = vadd.f32 1.0, %v3513_v52  ;;  %1616 = vperm.xlu0 %3419, %v1337_v5   ;;  %v4234_v24 = vmul.u32.u64.low %v4071_v18, %v957_v51  ;;  %v4235_v26 = vmul.u32.u64.high %v4071_v18, %v957_v51, %v4234_v24  ;;  %v889_v28 = vcvt.s32.f32 %v882_v58 }
 0x10c   : > { %v3517_v23 = vpop.eup %3516  ;;  %v1480_v2 = vadd.f32 1.0, %v3515_v37  ;;  %v886_v29 = vor.u32 4788187, %v885_v15  ;;  %v968_v48 = vadd.s32 1, %v4223_v13  ;;  %v1017_v55 = vshrl.u32 %v1016_v41, 23 }
 0x10d   : > { %v3519_v16 = vpop.eup %3518  ;;  %3526 = vlog2.f32 %v1476_v61  ;;  %v1474_v4 = vadd.f32 1.0, %v3517_v23  ;;  %v896_v49 = vsel %vm4243_vm3, 0, %v894_v8  ;;  %vm967_vm4 = vc.u32 %v4235_v26, %v4222_v44 }
 0x10e   : > { %v3521_v46 = vpop.eup %3520  ;;  %3528 = vlog2.f32 %v1480_v2  ;;  %v1478_v47 = vadd.f32 1.0, %v3519_v16  ;;  %v887_v18 = vand.u32 2147483647, %v886_v29  ;;  %v3077_v41 = vadd.s32 4294967169, %v1017_v55 }
 0x10f   : > { %3530 = vlog2.f32 %v1474_v4  ;;  %v1477_v45 = vadd.f32 1.0, %v3521_v46  ;;  %v3523_v63 = vpop.eup %3522  ;;  %1529 = vrot.lane.b32.xlu0 %v4108_v25, %s5066_s27  ;;  %v969_v3 = vsel %vm967_vm4, %v968_v48, %v4223_v13  ;;  %v1020_v20 = vand.u32 8388607, %v1013_v39  ;;  %s5068_s27 = smov 32  }
 0x110   : > { %3532 = vlog2.f32 %v1478_v47  ;;  %v3525_v35 = vpop.eup %3524  ;;  %v1475_v31 = vadd.f32 1.0, %v3523_v63  ;;  %v890_v42 = vmul.f32 %v889_v28, %v887_v18  ;;  %v970_v14 = vadd.s32 %v969_v3, %v965_v22 }
 0x111   : > { %3534 = vlog2.f32 %v1477_v45  ;;  %v1479_v19 = vadd.f32 1.0, %v3525_v35  ;;  %v1023_v21 = vadd.s32 1, %v3077_v41  ;;  %v4256_v57 = vand.u32 3, %v896_v49 }
 0x112   : > { %3536 = vlog2.f32 %v1475_v31  ;;  %v891_v33 = vxor.u32 2147483648, %v890_v42  ;;  %v4259_v6 = vmul.f32 0.62831855, %v3874_v7  ;;  %v1441_v25 = vmax.f32 %v4124_v17, 0.0 }
 0x113   : > { %3538 = vlog2.f32 %v1479_v19  ;;  %v971_v59 = vadd.s32 536870912, %v970_v14  ;;  %vm1024_vm5 = vcmp.gt.s32.totalorder %v1023_v21, 0  ;;  %v1445_v11 = vmax.f32 %v4133_v53, 0.0 }
 0x114   : > { %v1439_v52 = vmax.f32 %v4136_v54, 0.0  ;;  %v892_v58 = vsel %vm809_vm15, %v891_v33, %v890_v42  ;;  %v1025_v51 = vsel %vm1024_vm5, %v1023_v21, 0  ;;  %v1021_v7 = vor.u32 8388608, %v1020_v20 }
 0x115   : > { %v895_v13 = vsel %vm4243_vm3, %v3909_v32, %v892_v58  ;;  %v4269_v37 = vshrl.u32 %v971_v59, 30  ;;  %v4271_v61 = vand.u32 31, %v1025_v51  ;;  %v1443_v5 = vmax.f32 %v4144_v0, 0.0 }
 0x116   : > { %v1442_v53 = vmax.f32 %v4147_v60, 0.0  ;;  %v1440_v54 = vmax.f32 %v4165_v27, 0.0  ;;  %3540 = vcosq.f32 %v895_v13  ;;  %v1444_v23 = vmax.f32 %v4168_v36, 0.0 }
 0x117   : > { %v3527_v17 = vpop.eup %3526  ;;  %3542 = vsinq.f32 %v895_v13  ;;  %v973_v2 = vshll.u32 %v4269_v37, 30  ;;  %v4280_v16 = vsel %vm1743_vm6, %v4178_v10, 0  ;;  %vm905_vm7 = vcmp.eq.s32.totalorder %v4256_v57, 2 }
 0x118   : > { %v3529_v15 = vpop.eup %3528  ;;  %v1486_v8 = vmul.f32 0.6931472, %v3527_v17  ;;  %v4285_v0 = vadd.s32 %v4222_v44, %v4235_v26  ;;  %v4288_v60 = vsub.s32 32, %v4271_v61  ;;  %vm902_vm8 = vcmp.eq.s32.totalorder %v4256_v57, 0  ;;  %v4317_v17 = vld [vmem:[%s3854_s16 + $0x10] sm:$0xff] }
 0x119   : > { %v3531_v24 = vpop.eup %3530  ;;  %v1494_v22 = vmul.f32 0.6931472, %v3529_v15  ;;  %v4291_v4 = vsub.s32 %v970_v14, %v973_v2  ;;  %v4293_v29 = vshll.u32 %v1021_v7, 8  ;;  %v1116_v10 = vand.u32 2147483647, %v4259_v6 }
 0x11a   : > { %v3533_v27 = vpop.eup %3532  ;;  %v1482_v36 = vmul.f32 0.6931472, %v3531_v24  ;;  %v1497_v46 = vadd.f32 %v1486_v8, %v1441_v25  ;;  %vm901_vm9 = vcmp.lt.s32.totalorder %v4256_v57, 2  ;;  %v4297_v44 = vshrl.u32 %v1025_v51, 5 }
 0x11b   : > { %v3535_v28 = vpop.eup %3534  ;;  %v1501_v47 = vadd.f32 %v1494_v22, %v1445_v11  ;;  %v1490_v48 = vmul.f32 0.6931472, %v3533_v27  ;;  %v976_v45 = vsub.s32 0, %v4291_v4  ;;  %v1119_v9 = vand.u32 2139095040, %v4259_v6 }
 0x11c   : > { %v1495_v26 = vadd.f32 %v1482_v36, %v1439_v52  ;;  %v1488_v55 = vmul.f32 0.6931472, %v3535_v28  ;;  %v3537_v18 = vpop.eup %3536  ;;  %v996_v49 = vsub.s32 4, %v4269_v37  ;;  %v1030_v41 = vshll.u32 %v3696_v38, %v4271_v61 }
 0x11d   : > { %v1499_v63 = vadd.f32 %v1490_v48, %v1443_v5  ;;  %v1031_v35 = vshrl.u32 %v3697_v40, %v4288_v60  ;;  %v3539_v31 = vpop.eup %3538  ;;  %v1484_v3 = vmul.f32 0.6931472, %v3537_v18  ;;  %v3074_v19 = vmin.u32 %v976_v45, %v4291_v4 }
 0x11e   : > { %v1498_v42 = vadd.f32 %v1488_v55, %v1442_v53  ;;  %v1033_v14 = vshll.u32 %v3697_v40, %v4271_v61  ;;  %v3097_v20 = vadd.f32 -0.6931472, %v1497_v46  ;;  %v4310_v21 = vadd.f32 -0.6931472, %v1501_v47 }
 0x11f   : > { %v1492_v33 = vmul.f32 0.6931472, %v3539_v31  ;;  %v4314_v25 = vshrl.u32 %v3696_v38, %v4288_v60  ;;  %v3095_v59 = vadd.f32 -0.6931472, %v1495_v26  ;;  %v1496_v52 = vadd.f32 %v1484_v3, %v1440_v54 }
 0x120   : > { %v3098_v11 = vadd.f32 -0.6931472, %v1498_v42  ;;  %v978_v58 = vclz %v3074_v19  ;;  %v3541_v51 = vpop.eup %3540  ;;  %v3099_v13 = vadd.f32 -0.6931472, %v1499_v63  ;;  %vm589_vm11 = vcmp.lt.f32.partialorder %v4317_v17, 5.0 }
 0x121   : > { %v1500_v7 = vadd.f32 %v1492_v33, %v1444_v23  ;;  %v1032_v5 = vor.u32 %v1031_v35, %v1030_v41  ;;  %v1034_v53 = vshrl.u32 %v3698_v43, %v4288_v60  ;;  %v3543_v15 = vpop.eup %3542  ;;  %v3096_v2 = vadd.f32 -0.6931472, %v1496_v52 }
 0x122   : > { %v1510_v8 = vpack.c.bf16 %v3098_v11, %v3097_v20  ;;  %v906_v24 = vxor.u32 2147483648, %v3541_v51  ;;  %v3075_v22 = vadd.s32 4294967294, %v978_v58  ;;  %v903_v36 = vxor.u32 2147483648, %v3543_v15 }
 0x123   : > { %v3100_v27 = vadd.f32 -0.6931472, %v1500_v7  ;;  %v1035_v54 = vor.u32 %v1034_v53, %v1033_v14  ;;  %v1036_v28 = vshll.u32 %v3698_v43, %v4271_v61  ;;  %v1509_v23 = vpack.c.bf16 %v3096_v2, %v3095_v59 }
 0x124   : > { %v907_v46 = vsel %vm905_vm7, %v906_v24, %v3543_v15  ;;  %vm3076_vm12 = vcmp.lt.s32.totalorder %v3075_v22, 0  ;;  %v1037_v47 = vshrl.u32 %v3695_v34, %v4288_v60  ;;  %vm1730_vm13 = vcmask 64512  }
 0x125   : > { %v1511_v48 = vpack.c.bf16 %v3100_v27, %v3099_v13  ;;  %v904_v26 = vsel %vm902_vm8, %v3541_v51, %v903_v36  ;;  %v981_v55 = vsel %vm3076_vm12, 0, %v3075_v22  ;;  %v1039_v45 = vshll.u32 %v3695_v34, %v4271_v61  ;;  %3239 = vmatprep.mubr.msk.bf16.mxu1 %vm1532_vm2, %v1509_v23 }
 0x126   : > { %v908_v18 = vsel %vm901_vm9, %v904_v26, %v907_v46  ;;  %v982_v63 = vsub.s32 32, %v981_v55  ;;  %v983_v41 = vshll.u32 %v4291_v4, %v981_v55  ;;  %v986_v35 = vsub.s32 4294967266, %v981_v55  ;;  %3240 = vmatmul.mubr.msk.bf16.vlgmr.msra.gmra.mrb[4].mxu1 %vm1532_vm2, %v1510_v8 }
 0x127   : > { %v909_v31 = vsel %vm899_vm10, nan, %v908_v18  ;;  %v1038_v42 = vor.u32 %v1037_v47, %v1036_v28  ;;  %v1040_v3 = vshrl.u32 %v3699_v50, %v4288_v60  ;;  %v1042_v19 = vshll.u32 %v3699_v50, %v4271_v61  ;;  %3243 = vmatprep.mubr.msk.bf16.mxu1 %vm1532_vm2, %v1511_v48  ;;  %3256 = vmatpush3.bf16.msra.mxu1 %v4280_v16  ;;  %v3478_v18 = vld [vmem:[%s3929_s25 + $0x10] sm:$0xff]  }
 0x128   : > { %v1324_v57 = vadd.f32 1.0, %v909_v31  ;;  %v984_v4 = vshrl.u32 %v4285_v0, %v982_v63  ;;  %v987_v14 = vadd.s32 127, %v986_v35  ;;  %v1043_v32 = vshrl.u32 %v3700_v56, %v4288_v60 }
 0x129   : > { %v1512_v20 = vpack.c.bf16 %v4310_v21, %v4310_v21  ;;  %v1041_v33 = vor.u32 %v1040_v3, %v1039_v45  ;;  %vm1045_vm14 = vcmp.lt.s32.totalorder %v4297_v44, 1  ;;  %vm1046_vm15 = vcmp.lt.s32.totalorder %v4297_v44, 2  ;;  %v3476_v21 = vld [vmem:[%s3929_s25] sm:$0xff]   ;;  %v3477_v45 = vld [vmem:[%s3929_s25 + $0x8] sm:$0xff]   ;;  %v4417_v3 = vld [vmem:[%s3854_s16 + $0x30] sm:$0xff] }
 0x12a   : > { %v1331_v61 = vmul.f32 0.5, %v1324_v57  ;;  %v985_v59 = vor.u32 %v984_v4, %v983_v41  ;;  %v988_v11 = vshll.u32 %v987_v14, 23  ;;  %v1044_v16 = vor.u32 %v1043_v32, %v1042_v19 }
 0x12b   : > { %vm1047_vm0 = vcmp.lt.s32.totalorder %v4297_v44, 3  ;;  %vm1048_vm3 = vcmp.lt.s32.totalorder %v4297_v44, 4  ;;  %v1053_v0 = vsel %vm1045_vm14, %v1032_v5, %v1035_v54  ;;  %v1057_v60 = vsel %vm1045_vm14, %v1035_v54, %v1038_v42 }
 0x12c   : > { %v1338_v52 = vsel %vm589_vm11, %v1331_v61, 0.0  ;;  %v989_v58 = vor.u32 4788187, %v988_v11  ;;  %v992_v51 = vcvt.s32.f32 %v985_v59  ;;  %v1050_v13 = vsel %vm1048_vm3, %v1038_v42, 2102212464 }
 0x12d   : > { %1621 = vperm.xlu1 %3420, %v1338_v52   ;;  %v1049_v7 = vsel %vm1045_vm14, %v4314_v25, %v1032_v5  ;;  %v1054_v53 = vsel %vm1048_vm3, %v1041_v33, 920167782  ;;  %v1058_v15 = vsel %vm1048_vm3, %v1044_v16, 1326507024  ;;  %v1120_v8 = vshrl.u32 %v1119_v9, 23 }
 0x12e   : > { %v990_v2 = vand.u32 2147483647, %v989_v58  ;;  %v1051_v24 = vsel %vm1047_vm0, %v1035_v54, %v1050_v13  ;;  %v1055_v22 = vsel %vm1047_vm0, %v1038_v42, %v1054_v53  ;;  %v1059_v27 = vsel %vm1047_vm0, %v1041_v33, %v1058_v15  ;;  %3244 = vmatmul.mubr.msk.bf16.gmra.mrb[8].mxu1 %vm1532_vm2, %v1512_v20 }
 0x12f   : > { %vm912_vm4 = vcmp.lt.s32.totalorder %v3955_v30, 0  ;;  %v1056_v25 = vsel %vm1046_vm15, %v1053_v0, %v1055_v22  ;;  %v1060_v9 = vsel %vm1046_vm15, %v1057_v60, %v1059_v27  ;;  %v3081_v5 = vadd.s32 4294967169, %v1120_v8  ;;  %3257 = vmatprep.mubr.msk.bf16.mxu1 %vm1730_vm13, %v3476_v21 }
 0x130   : > { %v993_v36 = vmul.f32 %v992_v51, %v990_v2  ;;  %v997_v54 = vsel %vm912_vm4, %v996_v49, %v4269_v37  ;;  %v4385_v28 = vmul.u32.u64.low %v4293_v29, %v1060_v9  ;;  %v4386_v23 = vmul.u32.u64.high %v4293_v29, %v1060_v9, %v4385_v28 }
 0x131   : > { %v1052_v46 = vsel %vm1046_vm15, %v1049_v7, %v1051_v24  ;;  %v4391_v47 = vmul.u32.u64.low %v4293_v29, %v1056_v25  ;;  %v4392_v48 = vmul.u32.u64.high %v4293_v29, %v1056_v25, %v4391_v47  ;;  %v1126_v26 = vadd.s32 1, %v3081_v5  ;;  %v3479_v7 = vld [vmem:[%s3929_s25 + $0x18] ss:$0 sps:$4 sm:$0xff]  }
 0x132   : > { %vm4397_vm5 = vcmp.le.f32.partialorder %v910_v12, 0.7853982  ;;  %v994_v37 = vxor.u32 2147483648, %v993_v36  ;;  %v1123_v49 = vand.u32 8388607, %v1116_v10  ;;  %v1068_v41 = vmul.u32 %v4293_v29, %v1052_v46 }
 0x133   : > { %v999_v44 = vsel %vm4397_vm5, 0, %v997_v54  ;;  %vm1127_vm7 = vcmp.gt.s32.totalorder %v1126_v26, 0  ;;  %vm1070_vm8 = vc.u32 %v4386_v23, %v4391_v47  ;;  %v1071_v31 = vadd.s32 1, %v4392_v48 }
 0x134   : > { %v995_v63 = vsel %vm912_vm4, %v994_v37, %v993_v36  ;;  %v1128_v12 = vsel %vm1127_vm7, %v1126_v26, 0  ;;  %v4420_v19 = vmul.f32 0.62831855, %v4417_v3  ;;  %v4422_v57 = vand.u32 3, %v999_v44 }
 0x135   : > { %v998_v35 = vsel %vm4397_vm5, %v3955_v30, %v995_v63  ;;  %v1130_v42 = vand.u32 31, %v1128_v12  ;;  %v1124_v29 = vor.u32 8388608, %v1123_v49  ;;  %v4424_v4 = vshrl.u32 %v1128_v12, 5 }
 0x136   : > { %3544 = vcosq.f32 %v998_v35  ;;  %3258 = vmatmul.mubr.msk.bf16.vlgmr.msra.gmra.mrb[12].mxu1 %vm1730_vm13, %v3477_v45  ;;  %v1072_v14 = vsel %vm1070_vm8, %v1071_v31, %v4392_v48  ;;  %v1222_v21 = vand.u32 2139095040, %v4420_v19  ;;  %vm1002_vm9 = vweird.f32 %v3955_v30 }
 0x137   : > { %3546 = vsinq.f32 %v998_v35  ;;  %v1131_v32 = vsub.s32 32, %v1130_v42  ;;  %v1133_v20 = vshll.u32 %v3696_v38, %v1130_v42  ;;  %3261 = vmatprep.mubr.msk.bf16.mxu1 %vm1730_vm13, %v3478_v18  ;;  %v1073_v33 = vadd.s32 %v1072_v14, %v1068_v41 }
 0x138   : > { %v1136_v61 = vshll.u32 %v3697_v40, %v1130_v42  ;;  %v1139_v59 = vshll.u32 %v3698_v43, %v1130_v42  ;;  %v1142_v11 = vshll.u32 %v3695_v34, %v1130_v42  ;;  %v1145_v51 = vshll.u32 %v3699_v50, %v1130_v42 }
 0x139   : > { %v1134_v16 = vshrl.u32 %v3697_v40, %v1131_v32  ;;  %v1137_v0 = vshrl.u32 %v3698_v43, %v1131_v32  ;;  %v1140_v60 = vshrl.u32 %v3695_v34, %v1131_v32  ;;  %v1074_v52 = vadd.s32 536870912, %v1073_v33 }
 0x13a   : > { %v1143_v58 = vshrl.u32 %v3699_v50, %v1131_v32  ;;  %v1146_v13 = vshrl.u32 %v3700_v56, %v1131_v32  ;;  %v4442_v2 = vshll.u32 %v1124_v29, 8  ;;  %vm1148_vm10 = vcmp.lt.s32.totalorder %v4424_v4, 1 }
 0x13b   : > { %v1135_v53 = vor.u32 %v1134_v16, %v1133_v20  ;;  %v1138_v15 = vor.u32 %v1137_v0, %v1136_v61  ;;  %v1141_v8 = vor.u32 %v1140_v60, %v1139_v59  ;;  %v4444_v24 = vshrl.u32 %v1074_v52, 30  ;;  %v4488_v52 = vld [vmem:[%s3854_s16 + $0x18] sm:$0xff] }
 0x13c   : > { %v1144_v22 = vor.u32 %v1143_v58, %v1142_v11  ;;  %v1147_v27 = vor.u32 %v1146_v13, %v1145_v51  ;;  %v1132_v25 = vshrl.u32 %v3696_v38, %v1131_v32  ;;  %vm1150_vm11 = vcmp.lt.s32.totalorder %v4424_v4, 3 }
 0x13d   : > { %vm1151_vm12 = vcmp.lt.s32.totalorder %v4424_v4, 4  ;;  %v1223_v9 = vshrl.u32 %v1222_v21, 23  ;;  %v1076_v5 = vshll.u32 %v4444_v24, 30  ;;  %vm1149_vm14 = vcmp.lt.s32.totalorder %v4424_v4, 2 }
 0x13e   : > { %v1153_v36 = vsel %vm1151_vm12, %v1141_v8, 2102212464  ;;  %v1157_v54 = vsel %vm1151_vm12, %v1144_v22, 920167782  ;;  %3262 = vmatmul.mubr.msk.bf16.gmra.mrb[16].mxu1 %vm1730_vm13, %v3479_v7  ;;  %v1156_v28 = vsel %vm1148_vm10, %v1135_v53, %v1138_v15  ;;  %v1160_v48 = vsel %vm1148_vm10, %v1138_v15, %v1141_v8 }
 0x13f   : > { %v1158_v46 = vsel %vm1150_vm11, %v1141_v8, %v1157_v54  ;;  %v1161_v26 = vsel %vm1151_vm12, %v1147_v27, 1326507024  ;;  %vm1004_vm15 = vcmp.lt.s32.totalorder %v4422_v57, 2  ;;  %vm1005_vm0 = vcmp.eq.s32.totalorder %v4422_v57, 0 }
 0x140   : > { %v3545_v55 = vpop.eup %3544  ;;  %vm1008_vm3 = vcmp.eq.s32.totalorder %v4422_v57, 2  ;;  %v1077_v37 = vsub.s32 %v1073_v33, %v1076_v5  ;;  %v1152_v44 = vsel %vm1148_vm10, %v1132_v25, %v1135_v53  ;;  %v1154_v18 = vsel %vm1150_vm11, %v1138_v15, %v1153_v36 }
 0x141   : > { %v3547_v49 = vpop.eup %3546  ;;  %v1009_v45 = vxor.u32 2147483648, %v3545_v55  ;;  %v1162_v63 = vsel %vm1150_vm11, %v1144_v22, %v1161_v26  ;;  %v1159_v35 = vsel %vm1149_vm14, %v1156_v28, %v1158_v46  ;;  %v3085_v32 = vadd.s32 4294967169, %v1223_v9 }
 0x142   : > { %v1006_v41 = vxor.u32 2147483648, %v3547_v49  ;;  %v1079_v12 = vsub.s32 0, %v1077_v37  ;;  %v1163_v31 = vsel %vm1149_vm14, %v1160_v48, %v1162_v63  ;;  %v1155_v59 = vsel %vm1149_vm14, %v1152_v44, %v1154_v18 }
 0x143   : > { %v1010_v42 = vsel %vm1008_vm3, %v1009_v45, %v3547_v49  ;;  %v4473_v29 = vmul.u32.u64.low %v4442_v2, %v1163_v31  ;;  %v4474_v14 = vmul.u32.u64.high %v4442_v2, %v1163_v31, %v4473_v29  ;;  %v1229_v21 = vadd.s32 1, %v3085_v32 }
 0x144   : > { %v1007_v20 = vsel %vm1005_vm0, %v3545_v55, %v1006_v41  ;;  %v3078_v33 = vmin.u32 %v1079_v12, %v1077_v37  ;;  %v4481_v11 = vmul.u32.u64.low %v4442_v2, %v1159_v35  ;;  %v4482_v16 = vmul.u32.u64.high %v4442_v2, %v1159_v35, %v4481_v11 }
 0x145   : > { %v1011_v61 = vsel %vm1004_vm15, %v1007_v20, %v1010_v42  ;;  %vm590_vm4 = vcmp.lt.f32.partialorder %v4488_v52, 5.0  ;;  %v1219_v57 = vand.u32 2147483647, %v4420_v19  ;;  %v1171_v4 = vmul.u32 %v4442_v2, %v1155_v59 }
 0x146   : > { %v1012_v0 = vsel %vm1002_vm9, nan, %v1011_v61  ;;  %v1081_v60 = vclz %v3078_v33  ;;  %vm1173_vm5 = vc.u32 %v4474_v14, %v4481_v11  ;;  %vm1230_vm7 = vcmp.gt.s32.totalorder %v1229_v21, 0 }
 0x147   : > { %v1325_v58 = vadd.f32 1.0, %v1012_v0  ;;  %v1174_v30 = vadd.s32 1, %v4482_v16  ;;  %v1231_v7 = vsel %vm1230_vm7, %v1229_v21, 0  ;;  %v1069_v53 = vadd.s32 %v4391_v47, %v4386_v23 }
 0x148   : > { %v3079_v51 = vadd.s32 4294967294, %v1081_v60  ;;  %v1233_v15 = vand.u32 31, %v1231_v7  ;;  %v1226_v2 = vand.u32 8388607, %v1219_v57  ;;  %v1232_v54 = vshrl.u32 %v1231_v7, 5 }
 0x149   : > { %v1332_v13 = vmul.f32 0.5, %v1325_v58  ;;  %v1175_v27 = vsel %vm1173_vm5, %v1174_v30, %v4482_v16  ;;  %vm1015_vm9 = vcmp.lt.s32.totalorder %v4078_v62, 0  ;;  %v1099_v35 = vsub.s32 4, %v4444_v24  ;;  %v4571_v30 = vld [vmem:[%s3854_s16 + $0x20] sm:$0xff] }
 0x14a   : > { %vm3080_vm8 = vcmp.lt.s32.totalorder %v3079_v51, 0  ;;  %v1176_v36 = vadd.s32 %v1175_v27, %v1171_v4  ;;  %v1234_v28 = vsub.s32 32, %v1233_v15  ;;  %v1236_v46 = vshll.u32 %v3696_v38, %v1233_v15 }
 0x14b   : > { %v1339_v8 = vsel %vm590_vm4, %v1332_v13, 0.0  ;;  %v1084_v22 = vsel %vm3080_vm8, 0, %v3079_v51  ;;  %v1239_v23 = vshll.u32 %v3697_v40, %v1233_v15  ;;  %v1242_v55 = vshll.u32 %v3698_v43, %v1233_v15 }
 0x14c   : > { %1626 = vperm.xlu1 %3420, %v1339_v8   ;;  %v1085_v25 = vsub.s32 32, %v1084_v22  ;;  %v1086_v9 = vshll.u32 %v1077_v37, %v1084_v22  ;;  %v1089_v5 = vsub.s32 4294967266, %v1084_v22  ;;  %v1177_v26 = vadd.s32 536870912, %v1176_v36 }
 0x14d   : > { %v1237_v49 = vshrl.u32 %v3697_v40, %v1234_v28  ;;  %v1240_v45 = vshrl.u32 %v3698_v43, %v1234_v28  ;;  %v1243_v44 = vshrl.u32 %v3695_v34, %v1234_v28  ;;  %v1245_v37 = vshll.u32 %v3695_v34, %v1233_v15 }
 0x14e   : > { %v1087_v47 = vshrl.u32 %v1069_v53, %v1085_v25  ;;  %v1090_v48 = vadd.s32 127, %v1089_v5  ;;  %v4508_v41 = vshrl.u32 %v1177_v26, 30  ;;  %v1246_v12 = vshrl.u32 %v3699_v50, %v1234_v28 }
 0x14f   : > { %v1227_v31 = vor.u32 8388608, %v1226_v2  ;;  %v1248_v42 = vshll.u32 %v3699_v50, %v1233_v15  ;;  %v1235_v32 = vshrl.u32 %v3696_v38, %v1234_v28  ;;  %v1238_v34 = vor.u32 %v1237_v49, %v1236_v46 }
 0x150   : > { %v1088_v18 = vor.u32 %v1087_v47, %v1086_v9  ;;  %v1091_v63 = vshll.u32 %v1090_v48, 23  ;;  %v1179_v43 = vshll.u32 %v4508_v41, 30  ;;  %v1241_v20 = vor.u32 %v1240_v45, %v1239_v23 }
 0x151   : > { %v1247_v33 = vor.u32 %v1246_v12, %v1245_v37  ;;  %v1249_v61 = vshrl.u32 %v3700_v56, %v1234_v28  ;;  %v1244_v0 = vor.u32 %v1243_v44, %v1242_v55  ;;  %vm1251_vm10 = vcmp.lt.s32.totalorder %v1232_v54, 1 }
 0x152   : > { %v1092_v40 = vor.u32 4788187, %v1091_v63  ;;  %v1095_v29 = vcvt.s32.f32 %v1088_v18  ;;  %v1180_v16 = vsub.s32 %v1176_v36, %v1179_v43  ;;  %vm1253_vm11 = vcmp.lt.s32.totalorder %v1232_v54, 3 }
 0x153   : > { %v1250_v60 = vor.u32 %v1249_v61, %v1248_v42  ;;  %vm1254_vm12 = vcmp.lt.s32.totalorder %v1232_v54, 4  ;;  %v1267_v21 = vshll.u32 %v1227_v31, 8  ;;  %v1255_v51 = vsel %vm1251_vm10, %v1235_v32, %v1238_v34 }
 0x154   : > { %v1093_v59 = vand.u32 2147483647, %v1092_v40  ;;  %v1182_v58 = vsub.s32 0, %v1180_v16  ;;  %v1256_v4 = vsel %vm1254_vm12, %v1244_v0, 2102212464  ;;  %vm1252_vm14 = vcmp.lt.s32.totalorder %v1232_v54, 2 }
 0x155   : > { %v1257_v38 = vsel %vm1253_vm11, %v1241_v20, %v1256_v4  ;;  %v1259_v13 = vsel %vm1251_vm10, %v1238_v34, %v1241_v20  ;;  %v1260_v56 = vsel %vm1254_vm12, %v1247_v33, 920167782  ;;  %vm4524_vm15 = vcmp.le.f32.partialorder %v1013_v39, 0.7853982  ;;  %v3480_v4 = vld [vmem:[%s5056_s8] sm:$0xff]  }
 0x156   : > { %v1096_v50 = vmul.f32 %v1095_v29, %v1093_v59  ;;  %v3082_v53 = vmin.u32 %v1182_v58, %v1180_v16  ;;  %v1263_v15 = vsel %vm1251_vm10, %v1241_v20, %v1244_v0  ;;  %v1100_v8 = vsel %vm1015_vm9, %v1099_v35, %v4444_v24  ;;  %3265 = vmatprep.subr.bf16.mxu0 %v3480_v4 }
 0x157   : > { %v1258_v22 = vsel %vm1252_vm14, %v1255_v51, %v1257_v38  ;;  %v1261_v27 = vsel %vm1253_vm11, %v1244_v0, %v1260_v56  ;;  %v1264_v2 = vsel %vm1254_vm12, %v1250_v60, 1326507024  ;;  %v1172_v26 = vadd.s32 %v4481_v11, %v4474_v14  ;;  %3266 = vmatpush3.bf16.msra.mxu0 %v3480_v4 }
 0x158   : > { %v1097_v7 = vxor.u32 2147483648, %v1096_v50  ;;  %v1184_v25 = vclz %v3082_v53  ;;  %v1262_v9 = vsel %vm1252_vm14, %v1259_v13, %v1261_v27  ;;  %v1265_v5 = vsel %vm1253_vm11, %v1247_v33, %v1264_v2 }
 0x159   : > { %v1266_v24 = vsel %vm1252_vm14, %v1263_v15, %v1265_v5  ;;  %v4543_v28 = vmul.u32.u64.low %v1267_v21, %v1262_v9  ;;  %v4544_v46 = vmul.u32.u64.high %v1267_v21, %v1262_v9, %v4543_v28  ;;  %v1102_v55 = vsel %vm4524_vm15, 0, %v1100_v8 }
 0x15a   : > { %v1098_v39 = vsel %vm1015_vm9, %v1097_v7, %v1096_v50  ;;  %v3083_v23 = vadd.s32 4294967294, %v1184_v25  ;;  %v4547_v47 = vmul.u32.u64.low %v1267_v21, %v1266_v24  ;;  %v4548_v48 = vmul.u32.u64.high %v1267_v21, %v1266_v24, %v4547_v47 }
 0x15b   : > { %v1101_v36 = vsel %vm4524_vm15, %v4078_v62, %v1098_v39  ;;  %v1274_v54 = vmul.u32 %v1267_v21, %v1258_v22  ;;  %v1277_v45 = vadd.s32 1, %v4544_v46  ;;  %v1106_v63 = vand.u32 3, %v1102_v55 }
 0x15c   : > { %3548 = vcosq.f32 %v1101_v36  ;;  %vm3084_vm0 = vcmp.lt.s32.totalorder %v3083_v23, 0  ;;  %vm1276_vm3 = vc.u32 %v4548_v48, %v4543_v28  ;;  %vm1105_vm8 = vweird.f32 %v4078_v62 }
 0x15d   : > { %3550 = vsinq.f32 %v1101_v36  ;;  %v1187_v49 = vsel %vm3084_vm0, 0, %v3083_v23  ;;  %v1278_v31 = vsel %vm1276_vm3, %v1277_v45, %v4544_v46  ;;  %vm1111_vm4 = vcmp.eq.s32.totalorder %v1106_v63, 2 }
 0x15e   : > { %v1188_v44 = vsub.s32 32, %v1187_v49  ;;  %v1189_v37 = vshll.u32 %v1180_v16, %v1187_v49  ;;  %v1192_v18 = vsub.s32 4294967266, %v1187_v49  ;;  %v1279_v14 = vadd.s32 %v1278_v31, %v1274_v54 }
 0x15f   : > { %vm1108_vm5 = vcmp.eq.s32.totalorder %v1106_v63, 0  ;;  %vm1107_vm7 = vcmp.lt.s32.totalorder %v1106_v63, 2  ;;  %vm1118_vm9 = vcmp.lt.s32.totalorder %v4259_v6, 0  ;;  %vm4565_vm10 = vcmp.le.f32.partialorder %v1116_v10, 0.7853982 }
 0x160   : > { %v1190_v12 = vshrl.u32 %v1172_v26, %v1188_v44  ;;  %v1193_v35 = vadd.s32 127, %v1192_v18  ;;  %v1280_v40 = vadd.s32 536870912, %v1279_v14  ;;  %v1202_v13 = vsub.s32 4, %v4508_v41 }
 0x161   : > { %vm591_vm11 = vcmp.lt.f32.partialorder %v4571_v30, 5.0  ;;  %v1275_v25 = vadd.s32 %v4543_v28, %v4548_v48  ;;  %vm1208_vm3 = vweird.f32 %v4259_v6 }
 0x162   : > { %v1191_v11 = vor.u32 %v1190_v12, %v1189_v37  ;;  %v1194_v42 = vshll.u32 %v1193_v35, 23  ;;  %v4558_v33 = vshrl.u32 %v1280_v40, 30  ;;  %v1203_v10 = vsel %vm1118_vm9, %v1202_v13, %v4508_v41 }
 0x163   : > { %v1205_v2 = vsel %vm4565_vm10, 0, %v1203_v10  ;;  %v3703_v13 = vmov 19  }
 0x164   : > { %v1195_v43 = vor.u32 4788187, %v1194_v42  ;;  %v1198_v32 = vcvt.s32.f32 %v1191_v11  ;;  %v1282_v0 = vshll.u32 %v4558_v33, 30  ;;  %v1209_v9 = vand.u32 3, %v1205_v2  ;;  %v2299_v2 = vld [vmem:[%s5061_s13 + $0x1] sm:$0x7] }
 0x165   : > { %v1305_v42 = vsub.s32 4, %v4558_v33 }
 0x166   : > { %v3549_v29 = vpop.eup %3548  ;;  %v1196_v59 = vand.u32 2147483647, %v1195_v43  ;;  %v1283_v58 = vsub.s32 %v1279_v14, %v1282_v0  ;;  %vm1214_vm14 = vcmp.eq.s32.totalorder %v1209_v9, 2  ;;  %vm1211_vm15 = vcmp.eq.s32.totalorder %v1209_v9, 0  ;;  %v4584_v14 = vld [vmem:[%s3854_s16 + $0x28] sm:$0xff] }
 0x167   : > { %v3551_v34 = vpop.eup %3550  ;;  %v1112_v20 = vxor.u32 2147483648, %v3549_v29  ;;  %vm1210_vm0 = vcmp.lt.s32.totalorder %v1209_v9, 2 }
 0x168   : > { %v1109_v61 = vxor.u32 2147483648, %v3551_v34  ;;  %v1199_v21 = vmul.f32 %v1198_v32, %v1196_v59  ;;  %v1285_v56 = vsub.s32 0, %v1283_v58 }
 0x169   : > { %v1113_v16 = vsel %vm1111_vm4, %v1112_v20, %v3551_v34  ;;  %vm592_vm4 = vcmp.lt.f32.partialorder %v4584_v14, 5.0 }
 0x16a   : > { %v1110_v60 = vsel %vm1108_vm5, %v3549_v29, %v1109_v61  ;;  %v1200_v38 = vxor.u32 2147483648, %v1199_v21  ;;  %v3086_v8 = vmin.u32 %v1285_v56, %v1283_v58  ;;  %vm1221_vm5 = vcmp.lt.s32.totalorder %v4420_v19, 0 }
 0x16b   : > { %v1114_v50 = vsel %vm1107_vm7, %v1110_v60, %v1113_v16  ;;  %vm1220_vm7 = vcmp.le.f32.partialorder %v1219_v57, 0.7853982  ;;  %v1306_v32 = vsel %vm1221_vm5, %v1305_v42, %v4558_v33  ;;  %v3705_v56 = vmov 20  }
 0x16c   : > { %v1115_v51 = vsel %vm1105_vm8, nan, %v1114_v50  ;;  %v1201_v7 = vsel %vm1118_vm9, %v1200_v38, %v1199_v21  ;;  %v1287_v27 = vclz %v3086_v8  ;;  %v1308_v34 = vsel %vm1220_vm7, 0, %v1306_v32  ;;  %v3481_v38 = vld [vmem:[%s5056_s8 + $0x8] sm:$0xff]  }
 0x16d   : > { %v1326_v62 = vadd.f32 1.0, %v1115_v51  ;;  %v1204_v15 = vsel %vm4565_vm10, %v4259_v6, %v1201_v7  ;;  %v1312_v20 = vand.u32 3, %v1308_v34  ;;  %3267 = vmatprep.subr.bf16.mxu0 %v3481_v38  ;;  %v3626_v7 = vld [vmem:[%s3854_s16 + $0x8] sm:$0xff]  ;;  %v1987_v8 = vlaneseq }
 0x16e   : > { %3552 = vcosq.f32 %v1204_v15  ;;  %v3087_v39 = vadd.s32 4294967294, %v1287_v27  ;;  %3268 = vmatpush3.bf16.msra.mxu0 %v3481_v38  ;;  %v3707_v27 = vmov 17  }
 0x16f   : > { %v1333_v53 = vmul.f32 0.5, %v1326_v62  ;;  %3554 = vsinq.f32 %v1204_v15  ;;  %vm1317_vm8 = vcmp.eq.s32.totalorder %v1312_v20, 2  ;;  %vm1314_vm9 = vcmp.eq.s32.totalorder %v1312_v20, 0  ;;  %v4608_v62 = vld [vmem:[%s5061_s13] ss:$0 sm:$0xff] }
 0x170   : > { %vm3088_vm12 = vcmp.lt.s32.totalorder %v3087_v39, 0  ;;  %vm1313_vm10 = vcmp.lt.s32.totalorder %v1312_v20, 2  ;;  %v3706_v15 = vmov 18   ;;  %v2302_v10 = vshrl.u32 %v1987_v8, 7 }
 0x171   : > { %v1340_v22 = vsel %vm591_vm11, %v1333_v53, 0.0  ;;  %v1290_v5 = vsel %vm3088_vm12, 0, %v3087_v39  ;;  %vm1311_vm11 = vweird.f32 %v4420_v19  ;;  %vm593_vm12 = vcmp.lt.f32.partialorder %v4417_v3, 5.0  ;;  %v3627_v53 = vld [vmem:[%s3854_s16] sm:$0xff]  ;;  %s5098_s16 = smul.u32 56, %s3844_s17 }
 0x172   : > { %1631 = vperm.xlu1 %3420, %v1340_v22   ;;  %v1291_v36 = vsub.s32 32, %v1290_v5  ;;  %v1292_v24 = vshll.u32 %v1283_v58, %v1290_v5  ;;  %v1295_v46 = vsub.s32 4294967266, %v1290_v5  ;;  %v2307_v22 = vsub.s32 1, %v2302_v10 }
 0x173   : > { %v2311_v9 = vsub.s32 2, %v2302_v10  ;;  %s562_s23 = scalar_lea.vmem %s5063_s15, %s5098_s16 }
 0x174   : > { %v1293_v23 = vshrl.u32 %v1275_v25, %v1291_v36  ;;  %v1296_v41 = vadd.s32 127, %v1295_v46  ;;  %v2308_v39 = vrot.slane %v2299_v2, %v2307_v22  ;;  %v2303_v25 = vsub.s32 0, %v2302_v10  ;;  %v1612_v36 = vpop.permute.xlu0 %1611 }
 0x175   : > { %v2312_v5 = vrot.slane %v2299_v2, %v2311_v9 }
 0x176   : > { %v1294_v49 = vor.u32 %v1293_v23, %v1292_v24  ;;  %v1297_v54 = vshll.u32 %v1296_v41, 23 }
 0x178   : > { %v3553_v47 = vpop.eup %3552  ;;  %v1298_v48 = vor.u32 4788187, %v1297_v54  ;;  %v1301_v44 = vcvt.s32.f32 %v1294_v49 }
 0x179   : > { %v3555_v26 = vpop.eup %3554  ;;  %v1215_v55 = vxor.u32 2147483648, %v3553_v47 }
 0x17a   : > { %v1212_v45 = vxor.u32 2147483648, %v3555_v26  ;;  %v1299_v63 = vand.u32 2147483647, %v1298_v48 }
 0x17b   : > { %v1216_v28 = vsel %vm1214_vm14, %v1215_v55, %v3555_v26 }
 0x17c   : > { %v1213_v37 = vsel %vm1211_vm15, %v3553_v47, %v1212_v45  ;;  %v1302_v31 = vmul.f32 %v1301_v44, %v1299_v63 }
 0x17d   : > { %v1217_v18 = vsel %vm1210_vm0, %v1213_v37, %v1216_v28 }
 0x17e   : > { %v1218_v12 = vsel %vm1208_vm3, nan, %v1217_v18  ;;  %v1303_v6 = vxor.u32 2147483648, %v1302_v31 }
 0x17f   : > { %v1327_v35 = vadd.f32 1.0, %v1218_v12 }
 0x180   : > { %v1304_v29 = vsel %vm1221_vm5, %v1303_v6, %v1302_v31  ;;  %vm2363_vm5 = vcmask 523264  }
 0x181   : > { %v1334_v11 = vmul.f32 0.5, %v1327_v35  ;;  %v1307_v43 = vsel %vm1220_vm7, %v4420_v19, %v1304_v29  ;;  %v3132_v19 = vld [vmem:[%s5061_s13 + $0x1] ss:$0 sm:$0xff]  ;;  %vm2612_vm7 = vcmask 457728  }
 0x182   : > { %3556 = vcosq.f32 %v1307_v43 }
 0x183   : > { %v1341_v40 = vsel %vm592_vm4, %v1334_v11, 0.0  ;;  %3558 = vsinq.f32 %v1307_v43 }
 0x184   : > { %1636 = vperm.xlu0 %3419, %v1341_v40  }
 0x188   : > { %1838 = vrot.lane.b32.xlu0 %v4608_v62, %s5069_s26 }
 0x189   : > { %3423 = vset.pattern.permute.xlu0 %v3705_v56 }
 0x18a   : > { %v1617_v46 = vpop.permute.xlu0 %1616 }
 0x18c   : > { %v3557_v61 = vpop.eup %3556  ;;  %2073 = vperm.xlu0 %3423, %v3626_v7  }
 0x18d   : > { %v3559_v59 = vpop.eup %3558  ;;  %v1318_v16 = vxor.u32 2147483648, %v3557_v61 }
 0x18e   : > { %v1315_v57 = vxor.u32 2147483648, %v3559_v59  ;;  %v1530_v41 = vpop.permute.xlu0 %1529 }
 0x18f   : > { %v1319_v0 = vsel %vm1317_vm8, %v1318_v16, %v3559_v59 }
 0x190   : > { %v1316_v60 = vsel %vm1314_vm9, %v3557_v61, %v1315_v57  ;;  %2081 = vperm.xlu0 %3423, %v4488_v52  }
 0x191   : > { %v1320_v21 = vsel %vm1313_vm10, %v1316_v60, %v1319_v0 }
 0x192   : > { %v1321_v50 = vsel %vm1311_vm11, nan, %v1320_v21 }
 0x193   : > { %v1328_v58 = vadd.f32 1.0, %v1321_v50 }
 0x194   : > { %2089 = vperm.xlu0 %3423, %v4584_v14  }
 0x195   : > { %v1335_v33 = vmul.f32 0.5, %v1328_v58 }
 0x197   : > { %v1342_v51 = vsel %vm593_vm12, %v1335_v33, 0.0 }
 0x198   : > { %1641 = vperm.xlu1 %3420, %v1342_v51   ;;  %3430 = vset.pattern.permute.xlu0 %v3703_v13 }
 0x199   : > { %2041 = vperm.xlu0 %3430, %v3627_v53  }
 0x19c   : > { %2138 = vrot.lane.b32.xlu1 %v3132_v19, %s5094_s0 }
 0x19d   : > { %3421 = vset.pattern.permute.xlu1 %v3703_v13  ;;  %2049 = vperm.xlu0 %3430, %v4317_v17  }
 0x1a0   : > { %2045 = vperm.xlu1 %3421, %v3626_v7  }
 0x1a1   : > { %2057 = vperm.xlu0 %3430, %v4571_v30  }
 0x1a4   : > { %3422 = vset.pattern.permute.xlu1 %v3705_v56 }
 0x1a5   : > { %2069 = vperm.xlu1 %3422, %v3627_v53   ;;  %2065 = vperm.xlu0 %3430, %v4417_v3  }
 0x1a9   : > { %3424 = vset.pattern.permute.xlu1 %v3706_v15  ;;  %3434 = vset.pattern.permute.xlu0 %v3707_v27 }
 0x1aa   : > { %2007 = vperm.xlu1 %3424, %v3627_v53   ;;  %2497 = vperm.xlu0 %3434, %v3627_v53   ;;  %v3483_v53 = vld [vmem:[%s5059_s11 + $0x8] sm:$0xff]  }
 0x1ac   : > { %v1622_v55 = vpop.permute.xlu1 %1621 }
 0x1ae   : > { %2012 = vperm.xlu1 %3424, %v3626_v7   ;;  %2355 = vrot.lane.b32.xlu0 %v2308_v39, %s5068_s27 }
 0x1b2   : > { %3425 = vset.pattern.permute.xlu1 %v3703_v13  ;;  %2505 = vperm.xlu0 %3434, %v4317_v17  }
 0x1b3   : > { %2053 = vperm.xlu1 %3425, %v4488_v52  }
 0x1b6   : > { %2513 = vperm.xlu0 %3434, %v4571_v30  }
 0x1b7   : > { %3426 = vset.pattern.permute.xlu1 %v3705_v56 }
 0x1b8   : > { %2077 = vperm.xlu1 %3426, %v4317_v17  }
 0x1ba   : > { %2521 = vperm.xlu0 %3434, %v4417_v3  }
 0x1bc   : > { %3427 = vset.pattern.permute.xlu1 %v3706_v15 }
 0x1bd   : > { %2017 = vperm.xlu1 %3427, %v4317_v17   ;;  %v2304_v17 = vrot.slane %v2299_v2, %v2303_v25 }
 0x1c1   : > { %2022 = vperm.xlu1 %3427, %v4488_v52  }
 0x1c5   : > { %3428 = vset.pattern.permute.xlu1 %v3703_v13 }
 0x1c6   : > { %2061 = vperm.xlu1 %3428, %v4584_v14  }
 0x1ca   : > { %3429 = vset.pattern.permute.xlu1 %v3705_v56 }
 0x1cb   : > { %2085 = vperm.xlu1 %3429, %v4571_v30   ;;  %v1627_v18 = vpop.permute.xlu1 %1626 }
 0x1cf   : > { %3431 = vset.pattern.permute.xlu1 %v3706_v15 }
 0x1d0   : > { %2027 = vperm.xlu1 %3431, %v4571_v30  }
 0x1d4   : > { %2032 = vperm.xlu1 %3431, %v4584_v14  }
 0x1d8   : > { %3432 = vset.pattern.permute.xlu1 %v3705_v56 }
 0x1d9   : > { %2093 = vperm.xlu1 %3432, %v4417_v3  }
 0x1dd   : > { %3433 = vset.pattern.permute.xlu1 %v3706_v15 }
 0x1de   : > { %2037 = vperm.xlu1 %3433, %v4417_v3  }
 0x1e2   : > { %3435 = vset.pattern.permute.xlu1 %v3707_v27 }
 0x1e3   : > { %2501 = vperm.xlu1 %3435, %v3626_v7   ;;  %v3482_v7 = vld [vmem:[%s5059_s11] sm:$0xff]  }
 0x1e4   : > { %3277 = vmatprep.subr.bf16.mxu1 %v3482_v7 }
 0x1e5   : > { %3278 = vmatpush3.bf16.msra.mxu1 %v3482_v7 }
 0x1e6   : > { %3279 = vmatprep.subr.bf16.mxu1 %v3483_v53 }
 0x1e7   : > { %2353 = vrot.lane.b32.xlu1 %v2304_v17, %s5068_s27 }
 0x1e9   : > { %3280 = vmatpush3.bf16.msra.mxu1 %v3483_v53 }
 0x1ea   : > { %3289 = vmatprep.subr.bf16.mxu1 %v3693_v1 }
 0x1eb   : > { %2357 = vrot.lane.b32.xlu1 %v2312_v5, %s5068_s27  ;;  %s3175_s27 = sshll.u32 %s3812_s22, 7 }
 0x1ec   : > { %s5005_s2 = scalar_lea.hbm %s5062_s14, %s3175_s27 }
 0x1ef   : > { %2509 = vperm.xlu1 %3435, %v4488_v52  }
 0x1f1   : > { %v1632_v61 = vpop.permute.xlu1 %1631 }
 0x1f3   : > { %2517 = vperm.xlu1 %3435, %v4584_v14  }
 0x1f9   : > { %v3241_v30 = vpop.f32.mrb[4].mxu1 }
 0x1fa   : > { %v1579_v24 = vpop.f32.mrb[5].mxu1  ;;  %v1588_v45 = vadd.f32 %v3241_v30, %v1530_v41 }
 0x1fb   : > { %v3242_v23 = vpop.f32.mrb[6].mxu1  ;;  %v1580_v28 = vadd.f32 %v1579_v24, %v1530_v41 }
 0x1fc   : > { %v1582_v3 = vpop.f32.mrb[7].mxu1  ;;  %v1591_v48 = vadd.f32 %v3242_v23, %v1530_v41  ;;  %v1646_v37 = vmul.f32 %v1622_v55, %v1588_v45 }
 0x1fd   : > { %v1583_v44 = vadd.f32 %v1582_v3, %v1530_v41  ;;  %v1644_v63 = vmul.f32 %v1612_v36, %v1580_v28 }
 0x1fe   : > { %v1647_v31 = vmul.f32 %v1627_v18, %v1591_v48 }
 0x1ff   : > { %v1645_v6 = vmul.f32 %v1617_v46, %v1583_v44 }
 0x201   : > { %v3245_v47 = vpop.f32.mrb[8].mxu1 }
 0x202   : > { %v1595_v26 = vpop.f32.mrb[9].mxu1  ;;  %v1604_v4 = vadd.f32 %v3245_v47, %v1530_v41 }
 0x203   : > { %v3246_v49 = vpop.f32.mrb[10].mxu1  ;;  %v1596_v29 = vadd.f32 %v1595_v26, %v1530_v41  ;;  %v1637_v57 = vpop.permute.xlu0 %1636 }
 0x204   : > { %v1598_v54 = vpop.f32.mrb[11].mxu1 }
 0x205   : > { %v1599_v34 = vadd.f32 %v1598_v54, %v1530_v41  ;;  %v1648_v16 = vmul.f32 %v1632_v61, %v1596_v29 }
 0x207   : > { %v1649_v50 = vmul.f32 %v1637_v57, %v1599_v34  ;;  %v1839_v15 = vpop.permute.xlu0 %1838 }
 0x209   : > { %v3259_v52 = vpop.f32.mrb[12].mxu1 }
 0x20a   : > { %v1813_v12 = vmul.f32 %v3259_v52, %v1646_v37  ;;  %v1781_v35 = vpop.f32.mrb[13].mxu1 }
 0x20b   : > { %v1811_v14 = vmul.f32 %v1781_v35, %v1644_v63  ;;  %v3260_v11 = vpop.f32.mrb[14].mxu1 }
 0x20c   : > { %v1814_v42 = vmul.f32 %v3260_v11, %v1647_v31  ;;  %v1784_v40 = vpop.f32.mrb[15].mxu1 }
 0x20d   : > { %v1812_v43 = vmul.f32 %v1784_v40, %v1645_v6 }
 0x20e   : > { %v1819_v32 = vpack.c.bf16 %v1814_v42, %v1813_v12 }
 0x20f   : > { %v1818_v20 = vpack.c.bf16 %v1812_v43, %v1811_v14 }
 0x211   : > { %v3263_v59 = vpop.f32.mrb[16].mxu1  ;;  %3269 = vmatprep.mubr.msk.bf16.mxu0 %vm1532_vm2, %v1818_v20 }
 0x212   : > { %v1797_v0 = vpop.f32.mrb[17].mxu1  ;;  %3270 = vmatmul.mubr.msk.bf16.vlgmr.msra.gmra.mrb[8].mxu0 %vm1532_vm2, %v1819_v32 }
 0x213   : > { %v1815_v60 = vmul.f32 %v1797_v0, %v1648_v16  ;;  %v3264_v21 = vpop.f32.mrb[18].mxu1 }
 0x214   : > { %v1800_v58 = vpop.f32.mrb[19].mxu1 }
 0x215   : > { %v1816_v33 = vmul.f32 %v1800_v58, %v1649_v50 }
 0x217   : > { %v1820_v51 = vpack.c.bf16 %v1816_v33, %v1815_v60  ;;  %v1642_v38 = vpop.permute.xlu1 %1641 }
 0x218   : > { %v1650_v19 = vmul.f32 %v1642_v38, %v1604_v4 }
 0x219   : > { %3273 = vmatprep.mubr.msk.bf16.mxu0 %vm1532_vm2, %v1820_v51 }
 0x21a   : > { %v1817_v13 = vmul.f32 %v3263_v59, %v1650_v19 }
 0x21c   : > { %v1821_v56 = vpack.c.bf16 %v1817_v13, %v1817_v13 }
 0x21e   : > { %3274 = vmatmul.mubr.msk.bf16.gmra.mrb[12].mxu0 %vm1532_vm2, %v1821_v56 }
 0x2e5   : > { %v3271_v10 = vpop.f32.mrb[8].mxu0 }
 0x2e6   : > { %v4652_v22 = vadd.f32 %v3271_v10, %v1839_v15  ;;  %v1887_v27 = vpop.f32.mrb[9].mxu0 }
 0x2e7   : > { %v4654_v2 = vadd.f32 %v1887_v27, %v1839_v15  ;;  %v3272_v39 = vpop.f32.mrb[10].mxu0 }
 0x2e8   : > { %v1926_v25 = vand.u32 2147483647, %v4652_v22  ;;  %v4657_v17 = vadd.f32 %v3272_v39, %v1839_v15  ;;  %v1890_v9 = vpop.f32.mrb[11].mxu0  ;;  %v1919_v0 = vmax.f32 %v4652_v22, 0.0 }
 0x2e9   : > { %v1924_v5 = vand.u32 2147483647, %v4654_v2  ;;  %v4660_v36 = vadd.f32 %v1890_v9, %v1839_v15  ;;  %v1917_v50 = vmax.f32 %v4654_v2, 0.0 }
 0x2ea   : > { %v1933_v30 = vsub.f32 0.0, %v1926_v25  ;;  %v1927_v24 = vand.u32 2147483647, %v4657_v17  ;;  %v1920_v4 = vmax.f32 %v4657_v17, 0.0 }
 0x2eb   : > { %v1931_v46 = vsub.f32 0.0, %v1924_v5  ;;  %v1925_v23 = vand.u32 2147483647, %v4660_v36  ;;  %v1918_v56 = vmax.f32 %v4660_v36, 0.0 }
 0x2ec   : > { %v1942_v3 = vmul.f32 1.442695, %v1933_v30  ;;  %v1934_v41 = vsub.f32 0.0, %v1927_v24 }
 0x2ed   : > { %v1938_v47 = vmul.f32 1.442695, %v1931_v46  ;;  %v1932_v26 = vsub.f32 0.0, %v1925_v23 }
 0x2ee   : > { %3560 = vpow2.f32 %v1942_v3  ;;  %v1944_v55 = vmul.f32 1.442695, %v1934_v41 }
 0x2ef   : > { %3562 = vpow2.f32 %v1938_v47  ;;  %v1940_v49 = vmul.f32 1.442695, %v1932_v26 }
 0x2f0   : > { %3564 = vpow2.f32 %v1944_v55 }
 0x2f1   : > { %3566 = vpow2.f32 %v1940_v49  ;;  %v3275_v54 = vpop.f32.mrb[12].mxu0 }
 0x2f2   : > { %v4664_v45 = vadd.f32 %v3275_v54, %v1839_v15  ;;  %v1903_v28 = vpop.f32.mrb[13].mxu0 }
 0x2f3   : > { %v4666_v48 = vadd.f32 %v1903_v28, %v1839_v15  ;;  %v3276_v44 = vpop.f32.mrb[14].mxu0 }
 0x2f4   : > { %v1930_v18 = vand.u32 2147483647, %v4664_v45  ;;  %v1906_v52 = vpop.f32.mrb[15].mxu0  ;;  %v1923_v23 = vmax.f32 %v4664_v45, 0.0 }
 0x2f5   : > { %v1928_v35 = vand.u32 2147483647, %v4666_v48  ;;  %v4670_v31 = vadd.f32 %v1906_v52, %v1839_v15  ;;  %v1921_v41 = vmax.f32 %v4666_v48, 0.0 }
 0x2f6   : > { %v1937_v6 = vsub.f32 0.0, %v1930_v18 }
 0x2f7   : > { %v1935_v29 = vsub.f32 0.0, %v1928_v35  ;;  %v1929_v34 = vand.u32 2147483647, %v4670_v31  ;;  %v1922_v54 = vmax.f32 %v4670_v31, 0.0 }
 0x2f8   : > { %v3561_v37 = vpop.eup %3560  ;;  %v1950_v32 = vmul.f32 1.442695, %v1937_v6  ;;  %v1988_v6 = vand.u32 127, %v1987_v8  ;;  %v3484_v8 = vld [vmem:[%s5060_s12] ss:$8 sps:$4 sm:$0xff]  }
 0x2f9   : > { %v3563_v63 = vpop.eup %3562  ;;  %v1954_v12 = vadd.f32 1.0, %v3561_v37  ;;  %v1946_v20 = vmul.f32 1.442695, %v1935_v29  ;;  %v1936_v61 = vsub.f32 0.0, %v1929_v34 }
 0x2fa   : > { %v3565_v14 = vpop.eup %3564  ;;  %v1952_v11 = vadd.f32 1.0, %v3563_v63  ;;  %v4708_v63 = vpop.permute.xlu1 %2138 }
 0x2fb   : > { %v3567_v42 = vpop.eup %3566  ;;  %3568 = vlog2.f32 %v1954_v12  ;;  %v1955_v40 = vadd.f32 1.0, %v3565_v14  ;;  %v1948_v59 = vmul.f32 1.442695, %v1936_v61 }
 0x2fc   : > { %3570 = vlog2.f32 %v1952_v11  ;;  %v1953_v43 = vadd.f32 1.0, %v3567_v42 }
 0x2fd   : > { %3572 = vlog2.f32 %v1955_v40  ;;  %v4711_v40 = vmul.u32.u64.low 2863311531, %v1988_v6  ;;  %v4712_v29 = vmul.u32.u64.high 2863311531, %v1988_v6, %v4711_v40 }
 0x2fe   : > { %3574 = vlog2.f32 %v1953_v43  ;;  %v2046_v12 = vpop.permute.xlu1 %2045 }
 0x2ff   : > { %3576 = vpow2.f32 %v1950_v32  ;;  %v2074_v32 = vpop.permute.xlu0 %2073  ;;  %v1995_v34 = vshrl.u32 %v4712_v29, 1 }
 0x300   : > { %3578 = vpow2.f32 %v1946_v20 }
 0x301   : > { %3580 = vpow2.f32 %v1948_v59  ;;  %v1996_v59 = vmul.u32 3, %v1995_v34 }
 0x302   : > { %v2070_v35 = vpop.permute.xlu1 %2069 }
 0x303   : > { %v2082_v61 = vpop.permute.xlu0 %2081 }
 0x305   : > { %v3569_v16 = vpop.eup %3568 }
 0x306   : > { %v3571_v57 = vpop.eup %3570  ;;  %v1964_v60 = vmul.f32 0.6931472, %v3569_v16  ;;  %v2008_v31 = vpop.permute.xlu1 %2007 }
 0x307   : > { %v3573_v21 = vpop.eup %3572  ;;  %v1960_v58 = vmul.f32 0.6931472, %v3571_v57  ;;  %v3486_v57 = vld [vmem:[%s5060_s12 + $0x4] ss:$8 sps:$4 sm:$0xff]  }
 0x308   : > { %v3575_v33 = vpop.eup %3574  ;;  %v1975_v51 = vadd.f32 %v1964_v60, %v1919_v0  ;;  %v1966_v38 = vmul.f32 0.6931472, %v3573_v21  ;;  %v1997_v0 = vsub.s32 %v1988_v6, %v1996_v59  ;;  %2376 = vmatprep.subr.bf16.mxu0 %v3486_v57  ;;  %v2090_v60 = vpop.permute.xlu0 %2089  ;;  %v3489_v21 = vld [vmem:[%s5060_s12 + $0x14] ss:$8 sps:$4 sm:$0xff]  }
 0x309   : > { %v3577_v19 = vpop.eup %3576  ;;  %v1973_v13 = vadd.f32 %v1960_v58, %v1917_v50  ;;  %v1962_v7 = vmul.f32 0.6931472, %v3575_v33  ;;  %2377 = vmatpush1.bf16.msra.mxu0 %v3484_v8  ;;  %v3487_v50 = vld [vmem:[%s5060_s12 + $0x10] ss:$8 sps:$4 sm:$0xff]  }
 0x30a   : > { %v3579_v53 = vpop.eup %3578  ;;  %v1976_v15 = vadd.f32 %v1966_v38, %v1920_v4  ;;  %v1958_v10 = vadd.f32 1.0, %v3577_v19  ;;  %v4677_v25 = vadd.f32 -0.6931472, %v1975_v51  ;;  %v2013_v14 = vpop.permute.xlu1 %2012  ;;  %vm2000_vm14 = vcmp.ne.s32.totalorder %v1997_v0, 0  ;;  %2378 = vmatprep.subr.bf16.mxu0 %v3489_v21  ;;  %v3492_v51 = vld [vmem:[%s5060_s12 + $0x24] ss:$8 sps:$4 sm:$0xff]  }
 0x30b   : > { %v1974_v27 = vadd.f32 %v1962_v7, %v1918_v56  ;;  %v1956_v22 = vadd.f32 1.0, %v3579_v53  ;;  %v3581_v39 = vpop.eup %3580  ;;  %v4681_v9 = vadd.f32 -0.6931472, %v1973_v13  ;;  %vm2001_vm15 = vcmp.lt.s32.totalorder %v1997_v0, 0  ;;  %v3490_v38 = vld [vmem:[%s5060_s12 + $0x20] ss:$8 sps:$4 sm:$0xff]  }
 0x30c   : > { %v4679_v2 = vadd.f32 -0.6931472, %v1976_v15  ;;  %3582 = vlog2.f32 %v1958_v10  ;;  %v1957_v5 = vadd.f32 1.0, %v3581_v39  ;;  %v2003_v33 = vadd.s32 3, %v1997_v0  ;;  %vm2002_vm0 = vmand %vm2001_vm15, %vm2000_vm14  ;;  %v2042_v4 = vpop.permute.xlu0 %2041  ;;  %v3495_v19 = vld [vmem:[%s5060_s12 + $0x34] ss:$8 sps:$4 sm:$0xff]  }
 0x30d   : > { %v4683_v17 = vadd.f32 -0.6931472, %v1974_v27  ;;  %3584 = vlog2.f32 %v1956_v22  ;;  %2379 = vmatpush1.bf16.msra.mxu0 %v3487_v50  ;;  %v3493_v13 = vld [vmem:[%s5060_s12 + $0x30] ss:$8 sps:$4 sm:$0xff]   ;;  %v3709_v56 = vmov 0  }
 0x30e   : > { %v2113_v36 = vpack.c.bf16 %v4679_v2, %v4677_v25  ;;  %3586 = vlog2.f32 %v1957_v5  ;;  %v2054_v11 = vpop.permute.xlu1 %2053  ;;  %2380 = vmatprep.subr.bf16.mxu0 %v3492_v51  ;;  %2408 = vmatprep.mubr.bf16.mxu0 %v3709_v56  ;;  %v2004_v7 = vsel %vm2002_vm0, %v2003_v33, %v1997_v0 }
 0x30f   : > { %v2112_v30 = vpack.c.bf16 %v4683_v17, %v4681_v9  ;;  %vm2097_vm3 = vcmp.eq.s32.totalorder %v2004_v7, 1  ;;  %vm2096_vm4 = vcmp.eq.s32.totalorder %v2004_v7, 0 }
 0x310   : > { %v2050_v15 = vpop.permute.xlu0 %2049  ;;  %v2099_v10 = vsel %vm2097_vm3, %v2046_v12, %v2074_v32  ;;  %v2098_v27 = vsel %vm2097_vm3, %v2042_v4, %v2070_v35  ;;  %v2101_v39 = vsel %vm2097_vm3, %v2054_v11, %v2082_v61 }
 0x311   : > { %3281 = vmatprep.mubr.msk.bf16.mxu1 %vm1532_vm2, %v2112_v30  ;;  %2381 = vmatpush1.bf16.msra.mxu0 %v3490_v38  ;;  %v4745_v30 = vsel %vm2096_vm4, %v2013_v14, %v2099_v10 }
 0x312   : > { %3282 = vmatmul.mubr.msk.bf16.vlgmr.msra.gmra.mrb[20].mxu1 %vm1532_vm2, %v2113_v36  ;;  %v2078_v42 = vpop.permute.xlu1 %2077  ;;  %2382 = vmatprep.subr.bf16.mxu0 %v3495_v19 }
 0x313   : > { %v2100_v5 = vsel %vm2097_vm3, %v2050_v15, %v2078_v42  ;;  %2463 = vrot.lane.b32.xlu1 %v4745_v30, %s5094_s0 }
 0x314   : > { %v2058_v36 = vpop.permute.xlu0 %2057 }
 0x315   : > { %2383 = vmatpush1.bf16.msra.mxu0 %v3493_v13 }
 0x316   : > { %v3583_v24 = vpop.eup %3582  ;;  %v2018_v43 = vpop.permute.xlu1 %2017 }
 0x317   : > { %v3585_v46 = vpop.eup %3584  ;;  %v1972_v3 = vmul.f32 0.6931472, %v3583_v24  ;;  %v4748_v24 = vsel %vm2096_vm4, %v2008_v31, %v2098_v27 }
 0x318   : > { %v1968_v47 = vmul.f32 0.6931472, %v3585_v46  ;;  %v3587_v26 = vpop.eup %3586  ;;  %2461 = vrot.lane.b32.xlu0 %v4748_v24, %s5094_s0 }
 0x319   : > { %v1979_v55 = vadd.f32 %v1972_v3, %v1923_v23  ;;  %v1970_v28 = vmul.f32 0.6931472, %v3587_v26  ;;  %v4758_v23 = vsel %vm2096_vm4, %v2018_v43, %v2100_v5  ;;  %v2066_v26 = vpop.permute.xlu0 %2065 }
 0x31a   : > { %v1977_v49 = vadd.f32 %v1968_v47, %v1921_v41  ;;  %v2023_v20 = vpop.permute.xlu1 %2022 }
 0x31b   : > { %v1978_v44 = vadd.f32 %v1970_v28, %v1922_v54  ;;  %v4694_v37 = vadd.f32 -0.6931472, %v1979_v55  ;;  %v4755_v46 = vsel %vm2096_vm4, %v2023_v20, %v2101_v39 }
 0x31c   : > { %v4696_v18 = vadd.f32 -0.6931472, %v1977_v49  ;;  %2467 = vrot.lane.b32.xlu1 %v4755_v46, %s5094_s0  ;;  %2465 = vrot.lane.b32.xlu0 %v4758_v23, %s5094_s0 }
 0x31d   : > { %v4698_v52 = vadd.f32 -0.6931472, %v1978_v44  ;;  %v2115_v48 = vpack.c.bf16 %v4694_v37, %v4694_v37 }
 0x31e   : > { %v2062_v16 = vpop.permute.xlu1 %2061 }
 0x31f   : > { %v2114_v45 = vpack.c.bf16 %v4698_v52, %v4696_v18  ;;  %v2103_v3 = vsel %vm2097_vm3, %v2062_v16, %v2090_v60 }
 0x321   : > { %3285 = vmatprep.mubr.msk.bf16.mxu1 %vm1532_vm2, %v2114_v45 }
 0x322   : > { %3286 = vmatmul.mubr.msk.bf16.gmra.mrb[24].mxu1 %vm1532_vm2, %v2115_v48  ;;  %v2086_v58 = vpop.permute.xlu1 %2085 }
 0x323   : > { %3297 = vmatprep.mubr.msk.bf16.mxu1 %vm3694_vm1, %v3693_v1  ;;  %v2102_v47 = vsel %vm2097_vm3, %v2058_v36, %v2086_v58 }
 0x326   : > { %v2028_v53 = vpop.permute.xlu1 %2027 }
 0x327   : > { %v4770_v49 = vsel %vm2096_vm4, %v2028_v53, %v2102_v47 }
 0x328   : > { %2469 = vrot.lane.b32.xlu1 %v4770_v49, %s5094_s0 }
 0x32a   : > { %v2033_v22 = vpop.permute.xlu1 %2032 }
 0x32b   : > { %v4767_v55 = vsel %vm2096_vm4, %v2033_v22, %v2103_v3 }
 0x32c   : > { %2471 = vrot.lane.b32.xlu0 %v4767_v55, %s5094_s0 }
 0x32e   : > { %v2094_v41 = vpop.permute.xlu1 %2093 }
 0x32f   : > { %v2104_v54 = vsel %vm2097_vm3, %v2066_v26, %v2094_v41 }
 0x332   : > { %v2038_v28 = vpop.permute.xlu1 %2037 }
 0x333   : > { %v4778_v44 = vsel %vm2096_vm4, %v2038_v28, %v2104_v54 }
 0x334   : > { %2473 = vrot.lane.b32.xlu1 %v4778_v44, %s5094_s0 }
 0x3e5   : > { %v3283_v45 = vpop.f32.mrb[20].mxu1 }
 0x3e6   : > { %v4783_v48 = vadd.f32 %v3283_v45, %v4708_v63  ;;  %v2187_v12 = vpop.f32.mrb[21].mxu1 }
 0x3e7   : > { %v4786_v35 = vadd.f32 %v2187_v12, %v4708_v63  ;;  %v3284_v31 = vpop.f32.mrb[22].mxu1 }
 0x3e8   : > { %v2226_v14 = vand.u32 2147483647, %v4783_v48  ;;  %v4790_v11 = vadd.f32 %v3284_v31, %v4708_v63  ;;  %v2190_v6 = vpop.f32.mrb[23].mxu1  ;;  %v2219_v28 = vmax.f32 %v4783_v48, 0.0 }
 0x3e9   : > { %v2224_v42 = vand.u32 2147483647, %v4786_v35  ;;  %v4794_v40 = vadd.f32 %v2190_v6, %v4708_v63  ;;  %v2217_v31 = vmax.f32 %v4786_v35, 0.0 }
 0x3ea   : > { %v2233_v29 = vsub.f32 0.0, %v2226_v14  ;;  %v2227_v43 = vand.u32 2147483647, %v4790_v11 }
 0x3eb   : > { %v2231_v32 = vsub.f32 0.0, %v2224_v42  ;;  %v2225_v34 = vand.u32 2147483647, %v4794_v40 }
 0x3ec   : > { %v2242_v20 = vmul.f32 1.442695, %v2233_v29  ;;  %v2234_v61 = vsub.f32 0.0, %v2227_v43  ;;  %v2220_v29 = vmax.f32 %v4790_v11, 0.0 }
 0x3ed   : > { %v2238_v59 = vmul.f32 1.442695, %v2231_v32  ;;  %v2232_v16 = vsub.f32 0.0, %v2225_v34 }
 0x3ee   : > { %3588 = vpow2.f32 %v2242_v20  ;;  %v2244_v57 = vmul.f32 1.442695, %v2234_v61  ;;  %v2218_v20 = vmax.f32 %v4794_v40, 0.0 }
 0x3ef   : > { %3590 = vpow2.f32 %v2238_v59  ;;  %v2240_v8 = vmul.f32 1.442695, %v2232_v16 }
 0x3f0   : > { %3592 = vpow2.f32 %v2244_v57 }
 0x3f1   : > { %3594 = vpow2.f32 %v2240_v8 }
 0x3f5   : > { %v3287_v0 = vpop.f32.mrb[24].mxu1 }
 0x3f6   : > { %v4799_v60 = vadd.f32 %v3287_v0, %v4708_v63  ;;  %v2203_v21 = vpop.f32.mrb[25].mxu1 }
 0x3f7   : > { %v4802_v58 = vadd.f32 %v2203_v21, %v4708_v63  ;;  %v3288_v33 = vpop.f32.mrb[26].mxu1 }
 0x3f8   : > { %v3589_v50 = vpop.eup %3588  ;;  %v2230_v38 = vand.u32 2147483647, %v4799_v60  ;;  %v2206_v19 = vpop.f32.mrb[27].mxu1 }
 0x3f9   : > { %v3591_v51 = vpop.eup %3590  ;;  %v2254_v4 = vadd.f32 1.0, %v3589_v50  ;;  %v2228_v53 = vand.u32 2147483647, %v4802_v58  ;;  %v4807_v15 = vadd.f32 %v2206_v19, %v4708_v63 }
 0x3fa   : > { %v3593_v13 = vpop.eup %3592  ;;  %v2252_v7 = vadd.f32 1.0, %v3591_v51  ;;  %v2237_v22 = vsub.f32 0.0, %v2230_v38 }
 0x3fb   : > { %v3595_v10 = vpop.eup %3594  ;;  %3596 = vlog2.f32 %v2254_v4  ;;  %v2255_v27 = vadd.f32 1.0, %v3593_v13  ;;  %v2235_v5 = vsub.f32 0.0, %v2228_v53  ;;  %v2229_v3 = vand.u32 2147483647, %v4807_v15 }
 0x3fc   : > { %3598 = vlog2.f32 %v2252_v7  ;;  %v2253_v39 = vadd.f32 1.0, %v3595_v10  ;;  %v2250_v36 = vmul.f32 1.442695, %v2237_v22  ;;  %v2221_v13 = vmax.f32 %v4802_v58, 0.0 }
 0x3fd   : > { %3600 = vlog2.f32 %v2255_v27  ;;  %v2246_v41 = vmul.f32 1.442695, %v2235_v5  ;;  %v2236_v47 = vsub.f32 0.0, %v2229_v3  ;;  %v2222_v10 = vmax.f32 %v4807_v15, 0.0  ;;  %v4826_v15 = vpop.permute.xlu1 %2501 }
 0x3fe   : > { %3602 = vlog2.f32 %v2253_v39  ;;  %v2223_v5 = vmax.f32 %v4799_v60, 0.0 }
 0x3ff   : > { %3604 = vpow2.f32 %v2250_v36  ;;  %v2248_v26 = vmul.f32 1.442695, %v2236_v47 }
 0x400   : > { %3606 = vpow2.f32 %v2246_v41 }
 0x401   : > { %3608 = vpow2.f32 %v2248_v26 }
 0x405   : > { %v3597_v63 = vpop.eup %3596 }
 0x406   : > { %v3599_v54 = vpop.eup %3598  ;;  %v2264_v45 = vmul.f32 0.6931472, %v3597_v63  ;;  %v4824_v63 = vpop.permute.xlu0 %2497 }
 0x407   : > { %v3601_v12 = vpop.eup %3600  ;;  %v2260_v14 = vmul.f32 0.6931472, %v3599_v54 }
 0x408   : > { %v3603_v6 = vpop.eup %3602  ;;  %v2275_v42 = vadd.f32 %v2264_v45, %v2219_v28  ;;  %v2266_v43 = vmul.f32 0.6931472, %v3601_v12  ;;  %v2354_v28 = vpop.permute.xlu1 %2353 }
 0x409   : > { %v3605_v32 = vpop.eup %3604  ;;  %v2273_v34 = vadd.f32 %v2260_v14, %v2217_v31  ;;  %v2262_v61 = vmul.f32 0.6931472, %v3603_v6 }
 0x40a   : > { %v3607_v59 = vpop.eup %3606  ;;  %v2276_v16 = vadd.f32 %v2266_v43, %v2220_v29  ;;  %v2258_v8 = vadd.f32 1.0, %v3605_v32  ;;  %v3141_v0 = vadd.f32 -0.6931472, %v2275_v42  ;;  %v2356_v54 = vpop.permute.xlu0 %2355 }
 0x40b   : > { %v2274_v57 = vadd.f32 %v2262_v61, %v2218_v20  ;;  %v2256_v48 = vadd.f32 1.0, %v3607_v59  ;;  %v3609_v50 = vpop.eup %3608  ;;  %v3139_v35 = vadd.f32 -0.6931472, %v2273_v34 }
 0x40c   : > { %v3142_v21 = vadd.f32 -0.6931472, %v2276_v16  ;;  %v2257_v4 = vadd.f32 1.0, %v3609_v50  ;;  %v2358_v60 = vpop.permute.xlu1 %2357 }
 0x40d   : > { %v3140_v33 = vadd.f32 -0.6931472, %v2274_v57  ;;  %3610 = vlog2.f32 %v2256_v48  ;;  %v4842_v29 = vsel %vm1532_vm2, %v2356_v54, %v2358_v60 }
 0x40e   : > { %v2288_v51 = vpack.c.bf16 %v3142_v21, %v3141_v0  ;;  %3612 = vlog2.f32 %v2258_v8  ;;  %v4828_v45 = vpop.permute.xlu0 %2505 }
 0x40f   : > { %v2287_v11 = vpack.c.bf16 %v3140_v33, %v3139_v35  ;;  %3614 = vlog2.f32 %v2257_v4 }
 0x410   : > { %v4832_v31 = vpop.permute.xlu1 %2509 }
 0x411   : > { %3154 = vmatmul.mubr.msk.bf16.vlgmr.msra.gmra.mrb[16].mxu0 %vm2363_vm5, %v2287_v11 }
 0x412   : > { %2418 = vmatprep.mubr.bf16.mxu0 %v3709_v56  ;;  %v4830_v12 = vpop.permute.xlu0 %2513 }
 0x414   : > { %v4839_v6 = vpop.permute.xlu1 %2517 }
 0x416   : > { %v4834_v14 = vpop.permute.xlu0 %2521 }
 0x417   : > { %v3611_v40 = vpop.eup %3610 }
 0x418   : > { %v2268_v38 = vmul.f32 0.6931472, %v3611_v40  ;;  %v3613_v19 = vpop.eup %3612  ;;  %v2464_v8 = vpop.permute.xlu1 %2463 }
 0x419   : > { %3155 = vmatmul.mubr.msk.bf16.gmra.mrb[20].mxu0 %vm2363_vm5, %v2288_v51  ;;  %v3615_v7 = vpop.eup %3614  ;;  %v2272_v22 = vmul.f32 0.6931472, %v3613_v19 }
 0x41a   : > { %2428 = vmatprep.mubr.bf16.mxu0 %v3709_v56  ;;  %v2277_v53 = vadd.f32 %v2268_v38, %v2221_v13  ;;  %v2270_v27 = vmul.f32 0.6931472, %v3615_v7  ;;  %v2462_v34 = vpop.permute.xlu0 %2461 }
 0x41b   : > { %v2279_v41 = vadd.f32 %v2272_v22, %v2223_v5 }
 0x41c   : > { %v2278_v39 = vadd.f32 %v2270_v27, %v2222_v10  ;;  %v3143_v36 = vadd.f32 -0.6931472, %v2277_v53  ;;  %v2468_v5 = vpop.permute.xlu1 %2467 }
 0x41d   : > { %v3145_v58 = vadd.f32 -0.6931472, %v2279_v41 }
 0x41e   : > { %v3144_v3 = vadd.f32 -0.6931472, %v2278_v39  ;;  %v2466_v13 = vpop.permute.xlu0 %2465 }
 0x41f   : > { %v2290_v26 = vpack.c.bf16 %v3145_v58, %v3145_v58 }
 0x420   : > { %v2289_v47 = vpack.c.bf16 %v3144_v3, %v3143_v36 }
 0x422   : > { %3156 = vmatmul.mubr.msk.bf16.gmra.mrb[24].mxu0 %vm2363_vm5, %v2289_v47 }
 0x423   : > { %2438 = vmatprep.mubr.bf16.mxu0 %v3709_v56  ;;  %v4837_v56 = vsel %vm1532_vm2, %v2354_v28, %v2356_v54 }
 0x42a   : > { %3157 = vmatmul.mubr.msk.bf16.gmra.mrb[28].mxu0 %vm2363_vm5, %v2290_v26 }
 0x4e4   : > { %v2410_v42 = vpop.f32.mrb[16].mxu0 }
 0x4e5   : > { %v4845_v43 = vadd.f32 %v2410_v42, %v4837_v56  ;;  %v2412_v32 = vpop.f32.mrb[17].mxu0 }
 0x4e6   : > { %v2413_v20 = vadd.f32 %v2412_v32, %v4842_v29  ;;  %v2414_v61 = vpop.f32.mrb[18].mxu0 }
 0x4e7   : > { %v2482_v59 = vmul.f32 %v2462_v34, %v4845_v43  ;;  %v4850_v16 = vadd.f32 %v2414_v61, %v4837_v56  ;;  %v2416_v57 = vpop.f32.mrb[19].mxu0  ;;  %v2470_v61 = vpop.permute.xlu1 %2469 }
 0x4e8   : > { %v2483_v48 = vmul.f32 %v2462_v34, %v2413_v20  ;;  %v2417_v0 = vadd.f32 %v2416_v57, %v4842_v29 }
 0x4e9   : > { %v2524_v21 = vmul.f32 %v4824_v63, %v2482_v59  ;;  %v2484_v50 = vmul.f32 %v2464_v8, %v4850_v16 }
 0x4ea   : > { %v2525_v35 = vmul.f32 %v4824_v63, %v2483_v48  ;;  %v2485_v33 = vmul.f32 %v2464_v8, %v2417_v0 }
 0x4eb   : > { %v2526_v51 = vmul.f32 %v4826_v15, %v2484_v50 }
 0x4ec   : > { %v2527_v4 = vmul.f32 %v4826_v15, %v2485_v33  ;;  %v2420_v11 = vpop.f32.mrb[20].mxu0  ;;  %v3436_v40 = vpack.i.bf16 %v2525_v35, %v2524_v21  ;;  %v2472_v21 = vpop.permute.xlu0 %2471 }
 0x4ed   : > { %v4859_v38 = vadd.f32 %v2420_v11, %v4837_v56  ;;  %v2422_v19 = vpop.f32.mrb[21].mxu0 }
 0x4ee   : > { %v2423_v7 = vadd.f32 %v2422_v19, %v4842_v29  ;;  %v2424_v53 = vpop.f32.mrb[22].mxu0  ;;  %3437 = vrot.lane.b32.xlu0 %v3436_v40, %s5095_s6  ;;  %v3441_v10 = vpack.i.bf16 %v2527_v4, %v2526_v51 }
 0x4ef   : > { %v2486_v27 = vmul.f32 %v2466_v13, %v4859_v38  ;;  %v4865_v22 = vadd.f32 %v2424_v53, %v4837_v56  ;;  %v2426_v39 = vpop.f32.mrb[23].mxu0 }
 0x4f0   : > { %v2487_v36 = vmul.f32 %v2466_v13, %v2423_v7  ;;  %v2427_v3 = vadd.f32 %v2426_v39, %v4842_v29  ;;  %3442 = vrot.lane.b32.xlu1 %v3441_v10, %s5095_s6 }
 0x4f1   : > { %v2528_v41 = vmul.f32 %v4828_v45, %v2486_v27  ;;  %v2488_v47 = vmul.f32 %v2468_v5, %v4865_v22  ;;  %v2474_v27 = vpop.permute.xlu1 %2473 }
 0x4f2   : > { %v2529_v58 = vmul.f32 %v4828_v45, %v2487_v36  ;;  %v2489_v26 = vmul.f32 %v2468_v5, %v2427_v3 }
 0x4f3   : > { %v2530_v54 = vmul.f32 %v4832_v31, %v2488_v47 }
 0x4f4   : > { %v2531_v28 = vmul.f32 %v4832_v31, %v2489_v26  ;;  %v3446_v60 = vpack.i.bf16 %v2529_v58, %v2528_v41 }
 0x4f5   : > { %v2430_v42 = vpop.f32.mrb[24].mxu0 }
 0x4f6   : > { %3447 = vrot.lane.b32.xlu0 %v3446_v60, %s5095_s6  ;;  %v3451_v32 = vpack.i.bf16 %v2531_v28, %v2530_v54  ;;  %v4876_v34 = vadd.f32 %v2430_v42, %v4837_v56  ;;  %v2432_v20 = vpop.f32.mrb[25].mxu0 }
 0x4f7   : > { %v2433_v59 = vadd.f32 %v2432_v20, %v4842_v29  ;;  %v2434_v57 = vpop.f32.mrb[26].mxu0 }
 0x4f8   : > { %3452 = vrot.lane.b32.xlu1 %v3451_v32, %s5095_s6  ;;  %v2490_v8 = vmul.f32 %v2470_v61, %v4876_v34  ;;  %v4882_v48 = vadd.f32 %v2434_v57, %v4837_v56  ;;  %v2436_v0 = vpop.f32.mrb[27].mxu0 }
 0x4f9   : > { %v2491_v50 = vmul.f32 %v2470_v61, %v2433_v59  ;;  %v2437_v35 = vadd.f32 %v2436_v0, %v4842_v29  ;;  %v2539_v61 = vmul.f32 %v4683_v17, %v4826_v15  ;;  %v2538_v59 = vmul.f32 %v4681_v9, %v4824_v63 }
 0x4fa   : > { %v2532_v33 = vmul.f32 %v4830_v12, %v2490_v8  ;;  %v2492_v51 = vmul.f32 %v2472_v21, %v4882_v48  ;;  %v2540_v9 = vmul.f32 %v4677_v25, %v4828_v45  ;;  %v2541_v63 = vmul.f32 %v4679_v2, %v4832_v31 }
 0x4fb   : > { %v2533_v4 = vmul.f32 %v4830_v12, %v2491_v50  ;;  %v2493_v11 = vmul.f32 %v2472_v21, %v2437_v35  ;;  %v2542_v2 = vmul.f32 %v4696_v18, %v4830_v12  ;;  %v2543_v31 = vmul.f32 %v4698_v52, %v4839_v6 }
 0x4fc   : > { %v2534_v40 = vmul.f32 %v4839_v6, %v2492_v51 }
 0x4fd   : > { %v2535_v19 = vmul.f32 %v4839_v6, %v2493_v11  ;;  %v2440_v13 = vpop.f32.mrb[28].mxu0  ;;  %v3456_v7 = vpack.i.bf16 %v2533_v4, %v2532_v33 }
 0x4fe   : > { %v4891_v53 = vadd.f32 %v2440_v13, %v4837_v56  ;;  %v2442_v10 = vpop.f32.mrb[29].mxu0 }
 0x4ff   : > { %v2443_v39 = vadd.f32 %v2442_v10, %v4842_v29  ;;  %v2444_v5 = vpop.f32.mrb[30].mxu0  ;;  %3457 = vrot.lane.b32.xlu0 %v3456_v7, %s5095_s6  ;;  %v3461_v36 = vpack.i.bf16 %v2535_v19, %v2534_v40 }
 0x500   : > { %v2494_v3 = vmul.f32 %v2474_v27, %v4891_v53  ;;  %v2445_v41 = vpop.f32.mrb[31].mxu0 }
 0x501   : > { %v2495_v47 = vmul.f32 %v2474_v27, %v2443_v39  ;;  %3462 = vrot.lane.b32.xlu1 %v3461_v36, %s5095_s6 }
 0x502   : > { %v2536_v58 = vmul.f32 %v4834_v14, %v2494_v3 }
 0x503   : > { %v2537_v26 = vmul.f32 %v4834_v14, %v2495_v47 }
 0x505   : > { %v3466_v56 = vpack.i.bf16 %v2537_v26, %v2536_v58  ;;  %2676 = vrot.lane.b32.xlu1 %v4608_v62, %s5096_s30 }
 0x507   : > { %3467 = vrot.lane.b32.xlu0 %v3466_v56, %s5095_s6  ;;  %v2544_v56 = vmul.f32 %v4694_v37, %v4834_v14  ;;  %v3496_v37 = vld [vmem:[%s5057_s9] sm:$0xff]   ;;  %v3497_v14 = vld [vmem:[%s5057_s9 + $0x8] sm:$0xff]   ;;  %s5097_s6 = smul.u32 28, %s3844_s17  ;;  %s529_s17 = sand.u32 1, %s3683_s19  }
 0x508   : > { %s2910_s22 = scalar_lea.sflag [#allocation3], %s529_s17 }
 0x509   : > { %s557_s25 = scalar_lea.vmem %s5051_s3, %s5097_s6 }
 0x560   : > { %v3438_v29 = vpop.permute.xlu0 %3437 }
 0x561   : > { %v3440_v54 = vunpack.i.h.bf16 %v3438_v29  ;;  %v3439_v28 = vunpack.i.l.bf16 %v3438_v29  ;;  %v586_v29 = vld [vmem:[%s5052_s4] sm:$0xf] }
 0x562   : > { %v3443_v60 = vpop.permute.xlu1 %3442 }
 0x563   : > { %v2587_v42 = vsel %vm2363_vm5, %v3439_v28, %v3440_v54  ;;  %v3445_v32 = vunpack.i.h.bf16 %v3443_v60  ;;  %v3444_v20 = vunpack.i.l.bf16 %v3443_v60  ;;  %v3498_v54 = vld [vmem:[%s557_s25] sm:$0xff]  }
 0x564   : > { %v2601_v62 = vsel %vm1532_vm2, %v2538_v59, %v2587_v42  ;;  %3319 = vmatprep.mubr.msk.bf16.mxu0 %vm1730_vm13, %v3498_v54 }
 0x565   : > { %v2588_v57 = vsel %vm2363_vm5, %v3444_v20, %v3445_v32 }
 0x566   : > { %v2602_v8 = vsel %vm1532_vm2, %v2539_v61, %v2588_v57  ;;  %v3499_v57 = vld [vmem:[%s557_s25 + $0x8] sm:$0xff]  }
 0x567   : > { %v2608_v0 = vpack.c.bf16 %v2602_v8, %v2601_v62  ;;  %v3500_v62 = vld [vmem:[%s557_s25 + $0x10] sm:$0xff]   ;;  %v3502_v8 = vld [vmem:[%s5058_s10] sm:$0xff]  }
 0x568   : > { %v3448_v21 = vpop.permute.xlu0 %3447 }
 0x569   : > { %v3450_v50 = vunpack.i.h.bf16 %v3448_v21  ;;  %v3449_v35 = vunpack.i.l.bf16 %v3448_v21  ;;  %3290 = vmatpush3.bf16.msra.mxu1 %v2608_v0  ;;  %v3501_v0 = vld [vmem:[%s557_s25 + $0x18] ss:$0 sps:$4 sm:$0xff]   ;;  %v3503_v21 = vld [vmem:[%s5058_s10 + $0x8] sm:$0xff]   ;;  %s3055_s25 = sshll.u32 %s529_s17, 3 }
 0x56a   : > { %v3453_v33 = vpop.permute.xlu1 %3452  ;;  %3291 = vmatprep.subr.bf16.mxu1 %v3693_v1 }
 0x56b   : > { %v2589_v51 = vsel %vm2363_vm5, %v3449_v35, %v3450_v50  ;;  %v3455_v17 = vunpack.i.h.bf16 %v3453_v33  ;;  %v3454_v15 = vunpack.i.l.bf16 %v3453_v33 }
 0x56c   : > { %v2603_v11 = vsel %vm1532_vm2, %v2540_v9, %v2589_v51 }
 0x56d   : > { %v2590_v4 = vsel %vm2363_vm5, %v3454_v15, %v3455_v17 }
 0x56e   : > { %v2604_v40 = vsel %vm1532_vm2, %v2541_v63, %v2590_v4 }
 0x56f   : > { %v2609_v19 = vpack.c.bf16 %v2604_v40, %v2603_v11 }
 0x571   : > { %3292 = vmatpush3.bf16.msra.mxu1 %v2609_v19  ;;  %v3458_v13 = vpop.permute.xlu0 %3457 }
 0x572   : > { %3293 = vmatprep.subr.bf16.mxu1 %v3693_v1  ;;  %v3460_v7 = vunpack.i.h.bf16 %v3458_v13  ;;  %v3459_v10 = vunpack.i.l.bf16 %v3458_v13 }
 0x573   : > { %v3463_v27 = vpop.permute.xlu1 %3462 }
 0x574   : > { %v2591_v39 = vsel %vm2363_vm5, %v3459_v10, %v3460_v7  ;;  %v3465_v25 = vunpack.i.h.bf16 %v3463_v27  ;;  %v3464_v45 = vunpack.i.l.bf16 %v3463_v27 }
 0x575   : > { %v2605_v36 = vsel %vm1532_vm2, %v2542_v2, %v2591_v39  ;;  %v2449_v39 = vmul.f32 %v4859_v38, %v4758_v23  ;;  %v2448_v23 = vmul.f32 %v4850_v16, %v4745_v30  ;;  %v2451_v30 = vmul.f32 %v4876_v34, %v4770_v49 }
 0x576   : > { %v2592_v5 = vsel %vm2363_vm5, %v3464_v45, %v3465_v25  ;;  %v2447_v45 = vmul.f32 %v4845_v43, %v4748_v24  ;;  %v2453_v24 = vmul.f32 %v4891_v53, %v4778_v44  ;;  %v3628_v44 = vld [vmem:[%s5061_s13 + $0x1] ss:$0 sm:$0xff] }
 0x577   : > { %v2606_v3 = vsel %vm1532_vm2, %v2543_v31, %v2592_v5  ;;  %v2677_v50 = vpop.permute.xlu1 %2676  ;;  %v2450_v5 = vmul.f32 %v4865_v22, %v4755_v46 }
 0x578   : > { %v2610_v41 = vpack.c.bf16 %v2606_v3, %v2605_v36 }
 0x579   : > { %v3468_v47 = vpop.permute.xlu0 %3467 }
 0x57a   : > { %v3470_v58 = vunpack.i.h.bf16 %v3468_v47  ;;  %v3469_v26 = vunpack.i.l.bf16 %v3468_v47  ;;  %3294 = vmatpush3.bf16.msra.mxu1 %v2610_v41 }
 0x57b   : > { %3295 = vmatprep.subr.bf16.mxu1 %v3693_v1 }
 0x57c   : > { %v2593_v18 = vsel %vm2363_vm5, %v3469_v26, %v3470_v58  ;;  %v2452_v26 = vmul.f32 %v4882_v48, %v4767_v55 }
 0x57d   : > { %v2607_v52 = vsel %vm1532_vm2, %v2544_v56, %v2593_v18 }
 0x57e   : > { %v2611_v12 = vpack.c.bf16 %v2607_v52, %v2607_v52 }
 0x580   : > { %v2617_v6 = vsel %vm1743_vm6, %v2611_v12, 0 }
 0x581   : > { %3296 = vmatpush3.bf16.msra.mxu1 %v2617_v6 }
 0x582   : > { %3301 = vmatprep.subr.bf16.mxu1 %v3693_v1 }
 0x584   : > { %3298 = vmatmul.mubr.msk.bf16.vlgmr.msra.gmra.mrb[28].mxu1 %vm2612_vm7, %v586_v29 }
 0x585   : > { %3302 = vmatpush3.bf16.msra.mxu1 %v3496_v37  ;;  %3305 = vmatprep.mubr.msk.bf16.mxu1 %vm3694_vm1, %v3693_v1 }
 0x586   : > { %3303 = vmatprep.subr.bf16.mxu1 %v3693_v1 }
 0x589   : > { %3304 = vmatpush3.bf16.msra.mxu1 %v3497_v14 }
 0x58a   : > { %3309 = vmatprep.subr.bf16.mxu1 %v3693_v1 }
 0x657   : > { %v2653_v28 = vpop.f32.mrb[28].mxu1 }
 0x658   : > { %v2659_v60 = vpack.c.bf16 %v2653_v28, %v2653_v28  ;;  %v3299_v42 = vpop.f32.mrb[29].mxu1 }
 0x659   : > { %v2656_v32 = vpop.f32.mrb[30].mxu1 }
 0x65a   : > { %2813 = vrot.lane.b32.xlu0 %v2659_v60, %s5094_s0  ;;  %v3300_v20 = vpop.f32.mrb[31].mxu1  ;;  %3306 = vmatmul.mubr.msk.bf16.vlgmr.msra.gmra.mrb[32].mxu1 %vm1532_vm2, %v2659_v60  ;;  %s531_s0 = scalar_lea.vmem [#allocation2], %s3055_s25  ;;  %s3710_s25 = smov [#allocation2]  }
 0x65b   : > { %3313 = vmatprep.mubr.msk.bf16.mxu1 %vm3694_vm1, %v3693_v1  ;;  %3310 = vmatpush3.bf16.msra.mxu1 %v3502_v8  ;;  %vm2901_vm1 = vcmask 785408   ;;  %s2928_s1 = sshll.u32 %s531_s0, 4  ;;  %s3633_s26 = sshll.u32 %s3710_s25, 4  ;;  %s5007_s1 = int_to_ptr.vmem [resolvable:$true] %s2928_s1  ;;  %s3634_s26 = int_to_ptr.vmem [resolvable:$false] %s3633_s26 }
 0x65c   : > { %3311 = vmatprep.subr.bf16.mxu1 %v3693_v1  ;;  %s3635_s27 = scalar_lea.vmem %s3634_s26, 256  ;;  %p3636_p0 = scmp.lt.s32.totalorder %s5007_s1, %s3634_s26 }
 0x65f   : > { %3312 = vmatpush3.bf16.msra.mxu1 %v3503_v21 }
 0x6cc   : > { %v2814_v61 = vpop.permute.xlu0 %2813 }
 0x6cd   : > { %v2828_v59 = vsel %vm1743_vm6, %v2814_v61, 0  ;;  %3330 = vmatprep.subr.msk.bf16.mxu0 %vm1743_vm6, %v2814_v61 }
 0x6ce   : > { %3318 = vmatpush3.bf16.msra.mxu0 %v2828_v59 }
 0x6d1   : > { %3320 = vmatmul.mubr.msk.bf16.vlgmr.msra.gmra.mrb[32].mxu0 %vm1730_vm13, %v3499_v57 }
 0x6d2   : > { %3323 = vmatprep.mubr.msk.bf16.mxu0 %vm1730_vm13, %v3500_v62 }
 0x6d9   : > { %3324 = vmatmul.mubr.msk.bf16.gmra.mrb[36].mxu0 %vm1730_vm13, %v3501_v0 }
 0x72d   : > { %v2716_v35 = vpop.f32.mrb[32].mxu1 }
 0x72e   : > { %v2717_v33 = vadd.f32 %v2716_v35, %v2677_v50  ;;  %v3307_v51 = vpop.f32.mrb[33].mxu1 }
 0x72f   : > { %v2719_v17 = vpop.f32.mrb[34].mxu1 }
 0x730   : > { %v2723_v15 = vand.u32 2147483647, %v2717_v33  ;;  %v3308_v9 = vpop.f32.mrb[35].mxu1  ;;  %v2722_v13 = vmax.f32 %v2717_v33, 0.0 }
 0x732   : > { %v2724_v63 = vsub.f32 0.0, %v2723_v15 }
 0x734   : > { %v2725_v4 = vmul.f32 1.442695, %v2724_v63 }
 0x736   : > { %3616 = vpow2.f32 %v2725_v4 }
 0x740   : > { %v3617_v11 = vpop.eup %3616 }
 0x741   : > { %v2727_v40 = vadd.f32 1.0, %v3617_v11 }
 0x743   : > { %3618 = vlog2.f32 %v2727_v40 }
 0x74d   : > { %v3619_v19 = vpop.eup %3618 }
 0x74e   : > { %v2729_v1 = vmul.f32 0.6931472, %v3619_v19 }
 0x750   : > { %v2730_v7 = vadd.f32 %v2729_v1, %v2722_v13 }
 0x752   : > { %v3162_v10 = vadd.f32 -0.6931472, %v2730_v7 }
 0x754   : > { %v2732_v27 = vpack.c.bf16 %v3162_v10, %v3162_v10 }
 0x756   : > { %3314 = vmatmul.mubr.msk.bf16.vlgmr.msra.gmra.mrb[36].mxu1 %vm1532_vm2, %v2732_v27 }
 0x7a4   : > { %v3321_v25 = vpop.f32.mrb[32].mxu0 }
 0x7a5   : > { %v2896_v2 = vadd.f32 %v3321_v25, %v2449_v39  ;;  %v2864_v31 = vpop.f32.mrb[33].mxu0 }
 0x7a6   : > { %v2894_v36 = vadd.f32 %v2864_v31, %v2447_v45  ;;  %v3322_v3 = vpop.f32.mrb[34].mxu0 }
 0x7a7   : > { %2904 = vst.msk [vmem:[%s562_s23 + $0x10] sm:$0xff] %vm2901_vm1, %v2896_v2  ;;  %v2897_v38 = vadd.f32 %v3322_v3, %v2450_v5  ;;  %v2867_v41 = vpop.f32.mrb[35].mxu0 }
 0x7a8   : > { %2902 = vst.msk [vmem:[%s562_s23] sm:$0xff] %vm2901_vm1, %v2894_v36  ;;  %v2895_v47 = vadd.f32 %v2867_v41, %v2448_v23 }
 0x7a9   : > { %2905 = vst.msk [vmem:[%s562_s23 + $0x18] sm:$0xff] %vm2901_vm1, %v2897_v38 }
 0x7aa   : > { %2903 = vst.msk [vmem:[%s562_s23 + $0x8] sm:$0xff] %vm2901_vm1, %v2895_v47 }
 0x7ac   : > { %v3325_v46 = vpop.f32.mrb[36].mxu0 }
 0x7ad   : > { %v2900_v43 = vadd.f32 %v3325_v46, %v2453_v24  ;;  %v2880_v16 = vpop.f32.mrb[37].mxu0 }
 0x7ae   : > { %v2898_v22 = vadd.f32 %v2880_v16, %v2451_v30  ;;  %v3326_v58 = vpop.f32.mrb[38].mxu0 }
 0x7af   : > { %2908 = vst.msk [vmem:[%s562_s23 + $0x30] sm:$0xff] %vm2901_vm1, %v2900_v43  ;;  %v2883_v56 = vpop.f32.mrb[39].mxu0 }
 0x7b0   : > { %2906 = vst.msk [vmem:[%s562_s23 + $0x20] sm:$0xff] %vm2901_vm1, %v2898_v22  ;;  %v2899_v18 = vadd.f32 %v2883_v56, %v2452_v26 }
 0x7b2   : > { %2907 = vst.msk [vmem:[%s562_s23 + $0x28] sm:$0xff] %vm2901_vm1, %v2899_v18  ;;  %s3629_s23 = scalar_lea.vmem %s5007_s1, 128 }
 0x7b3   : > { %p3630_p11 = scmp.ne.s32.totalorder %s5007_s1, %s3629_s23  ;;  %p3637_p1 = scmp.lt.s32.totalorder %s3635_s27, %s3629_s23 }
 0x7b5   : > { %p3631_p12 = pnand %p3630_p11, %p3829_p5  ;;  %p3638_p2 = por %p3637_p1, %p3636_p0 }
 0x7b7   : > { %p3632_p13 = pneg %p3631_p12 }
 0x7b9   : > { %p3639_p3 = pnand %p3638_p2, %p3632_p13 }
 0x829   : > { %v2787_v49 = vpop.f32.mrb[36].mxu1 }
 0x82a   : > { %v2788_v55 = vadd.f32 %v3628_v44, %v2787_v49  ;;  %v3315_v34 = vpop.f32.mrb[37].mxu1 }
 0x82b   : > { %v2790_v48 = vpop.f32.mrb[38].mxu1 }
 0x82c   : > { %v3316_v53 = vpop.f32.mrb[39].mxu1  ;;  %2793 = vst.msk [vmem:[%s531_s0] sm:$0xff] %vm1532_vm2, %v2788_v55 }
 0x82d   : > { %3642 = shalt.err (!%p3639_p3)
}
 0x82e   : > { %s3643_s17 = scalar_lea.hbm %s5005_s2, 128  ;;  %s3647_s6 = scalar_lea.hbm %s5062_s14, 256 }
 0x82f   : > { %p3644_p4 = scmp.ne.s32.totalorder %s5005_s2, %s3643_s17  ;;  %p3648_p9 = scmp.lt.u32.totalorder %s5005_s2, %s5062_s14 }
 0x830   : > { %p3649_p10 = scmp.lt.u32.totalorder %s3647_s6, %s3643_s17  ;;  %p3651_p12 = scmp.lt.u32.totalorder %s3643_s17, %s5005_s2 }
 0x831   : > { %p3645_p7 = pnand %p3644_p4, %p3829_p5 }
 0x832   : > { %p3650_p11 = por %p3649_p10, %p3648_p9 }
 0x833   : > { %p3646_p8 = pneg %p3645_p7 }
 0x834   : > { %p3652_p13 = por %p3651_p12, %p3650_p11 }
 0x836   : > { %p3653_p0 = pnand %p3652_p13, %p3646_p8 }
 0x838   : > { %3656 = shalt.err (!%p3653_p0)
}
 0x839   : > { %3363 = dma.vmem_to_hbm [thread:$0]  (%p3829_p5), %s5007_s1, 128, %s5005_s2, %s2910_s22  }
 0x83a PF: > { %p3369_p1 = scmp.ge.s32.totalorder %s3691_s21, 2  ;;  %s2943_s23 = sand.u32 1, %s3679_s18  }
 0x83b   : > { %s2944_s26 = scalar_lea.sflag [#allocation3], %s2943_s23 }
 0x83c   : > { %p3366_p2 = pnand %p3369_p1, %p3833_p6 }
 0x83e   : > { %3674 = dma.done.wait (!%p3366_p2), %s2944_s26, 128  }
 0x83f   : > { %3676 = vsyncadd (!%p3366_p2), %s2944_s26, 4294967168  ;;  %s5099_s27 = sld [smem:[#allocation5_spill]]  ;;  %p26_p3 = scmp.ge.s32.totalorder %s3816_s24, 4  }
 0x840   : > { %s5100_s18 = smov %s3683_s19  ;;  %s5101_s19 = smov %s3687_s20 }
 0x841   : > { %s5103_s21 = smov %s3816_s24  ;;  %28 = sbr.rel (!%p26_p3) target bundleno = 8 (0x8), region = 132 }
 0x845   : > { %s5102_s20 = smov %s5099_s27 }
 0x848   :  { %2957 = vsyncpa [#allocation3], 1 }
 0x849   :  { %2959 = vsyncpa [#allocation3 + $0x1], 1 }

</bundles_post_ra>
